<compile_context>
chip_gen: v6e
topology: v6e:2x2x1
jax: 0.10.0
libtpu: 0.0.40
codegen_flags: <defaults>
</compile_context>

<pallas_src>
import functools

import jax
import jax.numpy as jnp
import numpy as np
from jax.experimental import pallas as pl
from jax.experimental.pallas import tpu as pltpu

# TODO(synk): `elu_clip` is not defined in the provided source file; implemented
# here as a smooth two-sided ELU clip (identity on [lo, hi], ELU-saturating
# outside) with bounds [-50, 50] to keep exp() finite.  Do NOT simplify it to a
# hard clamp + single exp until validated against the real elu_clip.
_ELU_CLIP_LO = -50.0
_ELU_CLIP_HI = 50.0


def _elu(x):
    return jnp.where(x > 0, x, jnp.expm1(x))


def _elu_clip(x, lo=_ELU_CLIP_LO, hi=_ELU_CLIP_HI):
    return hi - _elu(hi - (lo + _elu(x - lo)))


def _exp_elu_clip(x, lo=_ELU_CLIP_LO, hi=_ELU_CLIP_HI):
    """exp(_elu_clip(x)) in the algebraically-equivalent piecewise-in-x form.

    In-range values take a single exp; the two saturating tails reuse one exp
    each.  Total EUP work stays at 3 transcendentals per element (cannot be
    reduced further without changing the stand-in elu_clip definition), but the
    VPU select/add chain is shorter than exp(nested-ELU).
    """
    low = lo - 1.0 + jnp.exp(x - lo)     # x < lo   (== lo + expm1(x - lo))
    high = hi + 1.0 - jnp.exp(hi - x)    # x > hi   (== hi - expm1(hi - x))
    return jnp.exp(jnp.where(x < lo, low, jnp.where(x > hi, high, x)))


# --------------------------------------------------------------------------- #
# Hardware queries (trace-time, defensive)                                    #
# --------------------------------------------------------------------------- #
def _vmem_capacity_bytes():
    """Per-TensorCore VMEM capacity with a v7x-safe (64 MiB) fallback."""
    try:
        return int(pltpu.get_tpu_info().vmem_capacity_bytes)
    except Exception:
        return 64 * 1024 * 1024


def _num_tensorcores():
    """TensorCores per chip (v5e/v6e: 1, v7x: 2); defaults to 1 if unknown."""
    try:
        info = pltpu.get_tpu_info()
    except Exception:
        info = None
    if info is not None:
        for attr in ("num_tensorcores", "tensorcores_per_chip", "num_cores",
                     "cores_per_chip", "core_count"):
            v = getattr(info, attr, None)
            try:
                v = int(v)
            except (TypeError, ValueError):
                continue
            if v > 0:
                return v
    try:
        v = int(getattr(jax.devices()[0], "num_cores", 0) or 0)
        if v > 0:
            return v
    except Exception:
        pass
    return 1


# --------------------------------------------------------------------------- #
# VMEM accounting                                                             #
# --------------------------------------------------------------------------- #
def _vmem_estimate(block_b, S, Q, input_dim, query_dim, num_head,
                   compute_itemsize, weight_buffer_count):
    """Estimated VMEM footprint of one grid step (weights now included)."""
    f32 = 4
    # resident weight/bias blocks (constant index maps)
    w = weight_buffer_count * compute_itemsize * (
        2 * input_dim * input_dim + query_dim * input_dim)
    w += weight_buffer_count * f32 * (3 * input_dim)
    # double-buffered I/O blocks (all f32)
    io = 2 * f32 * block_b * (S * input_dim + Q * query_dim + S + Q * input_dim)
    # in-kernel intermediates: k/v/q projections (+compute-dtype copies),
    # scores / exp / attention weights, per-head outputs
    mid = block_b * ((f32 + compute_itemsize)
                     * (2 * S * input_dim + 2 * Q * input_dim)
                     + 3 * f32 * num_head * Q * S)
    return w + io + mid


def _pick_block_b(B, S, Q, input_dim, query_dim, num_head,
                  compute_itemsize, weight_buffer_count, num_cores):
    """Batch rows per grid step: largest divisor of B that
      (a) keeps >= num_cores grid steps when the chip has >1 TensorCore (only
          v7x benefits; single-TC v5e/v6e take block_b = B),
      (b) fits weights + double-buffered I/O + intermediates in a conservative
          slice of this chip's VMEM (queried, not hard-coded)."""
    cap = _vmem_capacity_bytes()
    # ~50% of VMEM on 128 MiB chips (v5e/v6e), ~37% on 64 MiB v7x.
    budget = cap // 2 if cap >= (96 << 20) else (cap * 3) // 8
    best = 1
    for tb in range(1, B + 1):
        if B % tb:
            continue
        if num_cores >= 2 and B >= num_cores and (B // tb) < num_cores:
            continue
        est = _vmem_estimate(tb, S, Q, input_dim, query_dim, num_head,
                             compute_itemsize, weight_buffer_count)
        if est <= budget:
            best = tb
    return best


# --------------------------------------------------------------------------- #
# Kernels                                                                     #
# --------------------------------------------------------------------------- #
def _project(x_ref, qry_ref, wk_ref, bk_ref, wv_ref, bv_ref, wq_ref, bq_ref,
             compute_dtype):
    """Shared K/V/Q projections: tall-M MXU matmuls, f32 accumulation."""
    TB, S, input_dim = x_ref.shape
    _, Q, query_dim = qry_ref.shape
    x = x_ref[...].reshape(TB * S, input_dim).astype(compute_dtype)
    qin = qry_ref[...].reshape(TB * Q, query_dim).astype(compute_dtype)
    # W_k / W_v are lane-aligned halves of the fused torch fc_kv weight (split
    # in the wrapper); the 1/sqrt(input_dim) scale is pre-folded into W_q/b_q.
    k = jnp.dot(x, wk_ref[...], preferred_element_type=jnp.float32) + bk_ref[...]
    v = jnp.dot(x, wv_ref[...], preferred_element_type=jnp.float32) + bv_ref[...]
    q = jnp.dot(qin, wq_ref[...], preferred_element_type=jnp.float32) + bq_ref[...]
    return k, v, q


def _mha_kernel_batched(x_ref, qry_ref, mask_ref,
                        wk_ref, bk_ref, wv_ref, bv_ref, wq_ref, bq_ref,
                        out_ref, *, num_head, head_dim, compute_dtype,
                        flatten_out):
    """All heads batched into single dot_general contractions (one relayout per
    tensor instead of num_head lane slices / tiny MXU pushes)."""
    TB, S, input_dim = x_ref.shape
    _, Q, _ = qry_ref.shape
    H, D = num_head, head_dim

    k, v, q = _project(x_ref, qry_ref, wk_ref, bk_ref, wv_ref, bv_ref,
                       wq_ref, bq_ref, compute_dtype)
    k4 = k.reshape(TB, S, H, D).astype(compute_dtype)
    v4 = v.reshape(TB, S, H, D).astype(compute_dtype)
    q4 = q.reshape(TB, Q, H, D).astype(compute_dtype)
    mask = mask_ref[...][:, :, None, :]                    # [TB, 1, 1, S]

    u = jnp.einsum("bqhd,bshd->bhqs", q4, k4,
                   preferred_element_type=jnp.float32)      # [TB, H, Q, S]
    e = _exp_elu_clip(u) * mask
    # Precondition (matches torch module): at least one unmasked position per
    # row, otherwise sum(e) == 0 and the normalization divides by zero.
    att = e * pl.reciprocal(jnp.sum(e, axis=-1, keepdims=True), approx=True)
    out = jnp.einsum("bhqs,bshd->bqhd", att.astype(compute_dtype), v4,
                     preferred_element_type=jnp.float32)    # [TB, Q, H, D]
    out = out.reshape(TB, Q, input_dim)
    if flatten_out:
        out = out.reshape(TB, 1, Q * input_dim)             # lane-dense store
    out_ref[...] = out.astype(out_ref.dtype)


def _mha_kernel_loop(x_ref, qry_ref, mask_ref,
                     wk_ref, bk_ref, wv_ref, bv_ref, wq_ref, bq_ref,
                     out_ref, *, num_head, head_dim, compute_dtype,
                     flatten_out):
    """Fallback: proven per-head loop (3-D contractions only)."""
    TB, S, input_dim = x_ref.shape
    _, Q, _ = qry_ref.shape

    k, v, q = _project(x_ref, qry_ref, wk_ref, bk_ref, wv_ref, bv_ref,
                       wq_ref, bq_ref, compute_dtype)
    k3 = k.reshape(TB, S, input_dim).astype(compute_dtype)
    v3 = v.reshape(TB, S, input_dim).astype(compute_dtype)
    q3 = q.reshape(TB, Q, input_dim).astype(compute_dtype)
    mask = mask_ref[...]                                    # [TB, 1, S]

    outs = []
    for h in range(num_head):
        sl = slice(h * head_dim, (h + 1) * head_dim)
        u = jnp.einsum("bqd,bsd->bqs", q3[:, :, sl], k3[:, :, sl],
                       preferred_element_type=jnp.float32)  # [TB, Q, S]
        e = _exp_elu_clip(u) * mask
        att = e * pl.reciprocal(jnp.sum(e, axis=-1, keepdims=True), approx=True)
        outs.append(jnp.einsum("bqs,bsd->bqd", att.astype(compute_dtype),
                               v3[:, :, sl],
                               preferred_element_type=jnp.float32))
    out = jnp.concatenate(outs, axis=-1)                    # [TB, Q, input_dim]
    if flatten_out:
        out = out.reshape(TB, 1, Q * input_dim)
    out_ref[...] = out.astype(out_ref.dtype)


# --------------------------------------------------------------------------- #
# Wrapper                                                                     #
# --------------------------------------------------------------------------- #
def multi_head_attention(params, inputs, queries, masks=None, *, num_head,
                         block_b=None, compute_dtype=jnp.bfloat16,
                         batched_heads=None, single_buffer_weights=True):
    """Pallas forward matching MultiHeadAttention.forward (returns `attend`).

    compute_dtype: dtype of the MXU operands (weights + activations);
    accumulation and all elementwise / EUP math stay float32.  bfloat16 is the
    default (v5e's MXU has no native f32 path; ~2x throughput on v6e/v7x).

    Preferred config is tried first (head-batched contraction, single-buffered
    weights); on any lowering failure it falls back to the conservative,
    previously-validated config.  NOTE: the fallback only triggers on an eager
    call -- under jax.jit pass explicit batched_heads/single_buffer_weights.
    """
    w_kv, b_kv, w_q, b_q = params
    B, S, input_dim = inputs.shape
    assert input_dim % num_head == 0
    head_dim = input_dim // num_head

    query_rank = queries.ndim
    assert query_rank in (2, 3)
    if query_rank == 2:
        queries = queries[:, None, :]
    Q, query_dim = queries.shape[1], queries.shape[2]

    if masks is None:
        masks = jnp.ones((B, S), inputs.dtype)
    masks3 = masks.astype(jnp.float32).reshape(B, 1, S)   # (8,128)-conformant

    # Trace-time (zero in-kernel cost) weight preprocessing:
    #  * split fused kv weight into lane-aligned K / V halves,
    #  * fold the 1/sqrt(input_dim) score scale into the query projection.
    scale = 1.0 / (input_dim ** 0.5)
    w_k = w_kv[:, :input_dim].astype(compute_dtype)
    w_v = w_kv[:, input_dim:].astype(compute_dtype)
    b_k = b_kv[:, :input_dim].astype(jnp.float32)
    b_v = b_kv[:, input_dim:].astype(jnp.float32)
    w_qs = (w_q * scale).astype(compute_dtype)
    b_qs = (b_q * scale).astype(jnp.float32)

    itemsize = jnp.dtype(compute_dtype).itemsize
    num_cores = _num_tensorcores()
    cap = _vmem_capacity_bytes()

    if block_b is None:
        block_b = _pick_block_b(
            B, S, Q, input_dim, query_dim, num_head, itemsize,
            weight_buffer_count=1 if single_buffer_weights else 2,
            num_cores=num_cores)
    assert B % block_b == 0, (B, block_b)
    grid = (B // block_b,)

    if batched_heads is None:
        batched_heads = num_head > 1
    # Lane-dense output store when input_dim under-fills the 128-lane vreg.
    want_flatten = (input_dim % 128 != 0)

    def _call(batched, single_buf, flatten_out):
        kern = functools.partial(
            _mha_kernel_batched if batched else _mha_kernel_loop,
            num_head=num_head, head_dim=head_dim,
            compute_dtype=compute_dtype, flatten_out=flatten_out)

        def const_spec(shape):
            idx = lambda b: (0,) * len(shape)
            if single_buf:
                # Constant index map => block never changes; one buffer halves
                # the weights' resident VMEM (matters most on v7x's 64 MiB/TC).
                return pl.BlockSpec(shape, idx, pipeline_mode=pl.Buffered(1))
            return pl.BlockSpec(shape, idx)

        in_specs = [
            pl.BlockSpec((block_b, S, input_dim), lambda b: (b, 0, 0)),   # inputs
            pl.BlockSpec((block_b, Q, query_dim), lambda b: (b, 0, 0)),   # queries
            pl.BlockSpec((block_b, 1, S), lambda b: (b, 0, 0)),           # masks
            const_spec((input_dim, input_dim)),                           # W_k
            const_spec((1, input_dim)),                                   # b_k
            const_spec((input_dim, input_dim)),                           # W_v
            const_spec((1, input_dim)),                                   # b_v
            const_spec((query_dim, input_dim)),                           # W_q (scaled)
            const_spec((1, input_dim)),                                   # b_q (scaled)
        ]
        if flatten_out:
            out_shape = jax.ShapeDtypeStruct((B, 1, Q * input_dim), inputs.dtype)
            out_spec = pl.BlockSpec((block_b, 1, Q * input_dim),
                                    lambda b: (b, 0, 0))
        else:
            out_shape = jax.ShapeDtypeStruct((B, Q, input_dim), inputs.dtype)
            out_spec = pl.BlockSpec((block_b, Q, input_dim),
                                    lambda b: (b, 0, 0))

        est = _vmem_estimate(block_b, S, Q, input_dim, query_dim, num_head,
                             itemsize, 1 if single_buf else 2)
        vmem_limit = None
        # Threshold = the smallest scoped-VMEM default across generations
        # (16 MiB on v5e); cap at 0.9x physical capacity to leave compiler
        # scratch headroom (matters on v7x).
        if est > (16 << 20):
            vmem_limit = int(min(est * 3 // 2, cap * 9 // 10))

        out = pl.pallas_call(
            kern,
            out_shape=out_shape,
            grid=grid,
            in_specs=in_specs,
            out_specs=out_spec,
            compiler_params=pltpu.CompilerParams(
                dimension_semantics=("parallel",),
                vmem_limit_bytes=vmem_limit),
        )(inputs, queries, masks3, w_k, b_k, w_v, b_v, w_qs, b_qs)

        if flatten_out:
            out = out.reshape(B, Q, input_dim)
        return out

    configs = [(batched_heads, single_buffer_weights, want_flatten)]
    for cfg in [(False, single_buffer_weights, want_flatten),
                (False, False, want_flatten),
                (False, False, False)]:          # previously-validated config
        if cfg not in configs:
            configs.append(cfg)

    out, last_err = None, None
    for bh, sb, fl in configs:
        try:
            out = _call(bh, sb, fl)
            break
        except Exception as e:                   # lowering/compile fallback
            last_err = e
            out = None
    if out is None:
        raise last_err

    # TODO(synk): for production-sized S, add an 'arbitrary' grid axis over S
    # with a running sum-of-exp accumulator (flash-style) instead of holding
    # full [S, ...] tiles in VMEM (highest priority on v7x's 64 MiB).
    if query_rank == 2:
        out = out[:, 0, :]
    return out


# --------------------------------------------------------------------------- #
# Pure-JAX reference & init (for verification)                                #
# --------------------------------------------------------------------------- #
def reference(params, inputs, queries, masks, num_head):
    """Pure-JAX transcription of the torch forward (returns `attend`)."""
    w_kv, b_kv, w_q, b_q = params
    B, S, input_dim = inputs.shape
    D = input_dim // num_head
    query_rank = queries.ndim
    if query_rank == 2:
        queries = queries[:, None, :]
    kv = (inputs @ w_kv + b_kv).reshape(B, 1, S, 2, num_head, D)
    k, v = kv[:, :, :, 0], kv[:, :, :, 1]                 # [B,1,S,H,D]
    q = (queries @ w_q + b_q).reshape(B, -1, 1, num_head, D)
    u = (q * k).sum(-1)                                   # [B,Q,S,H]
    exp_u = jnp.exp(_elu_clip(u / (input_dim ** 0.5)))
    if masks is not None:
        exp_u = exp_u * masks.reshape(B, 1, S, 1)
    att = exp_u / exp_u.sum(2, keepdims=True)
    attend = (v * att[..., None]).sum(-3).reshape(B, -1, input_dim)
    if query_rank == 2:
        attend = attend[:, 0]
    return attend


def init_params(key, input_dim, query_dim):
    """Deterministic torch.nn.Linear-style init (U(-1/sqrt(fan_in), 1/sqrt(fan_in)))."""
    k1, k2, k3, k4 = jax.random.split(key, 4)
    lim_kv = 1.0 / (input_dim ** 0.5)
    lim_q = 1.0 / (query_dim ** 0.5)
    w_kv = jax.random.uniform(k1, (input_dim, 2 * input_dim), jnp.float32, -lim_kv, lim_kv)
    b_kv = jax.random.uniform(k2, (1, 2 * input_dim), jnp.float32, -lim_kv, lim_kv)
    w_q = jax.random.uniform(k3, (query_dim, input_dim), jnp.float32, -lim_q, lim_q)
    b_q = jax.random.uniform(k4, (1, input_dim), jnp.float32, -lim_q, lim_q)
    return (w_kv, b_kv, w_q, b_q)


if __name__ == "__main__":
    B, S, Q = 2, 8, 4
    input_dim, query_dim, num_head = 32, 16, 4

    key = jax.random.PRNGKey(0)
    kp, kx, kq = jax.random.split(key, 3)
    params = init_params(kp, input_dim, query_dim)

    inputs = jax.random.normal(kx, (B, S, input_dim), jnp.float32)
    queries = jax.random.normal(kq, (B, Q, query_dim), jnp.float32)
    # mask out the last two sequence positions
    masks = jnp.concatenate(
        [jnp.ones((B, S - 2), jnp.float32), jnp.zeros((B, 2), jnp.float32)], axis=1)

    ref = reference(params, inputs, queries, masks, num_head)

    # Default path: bf16 MXU operands, f32 accumulation / elementwise math.
    out = multi_head_attention(params, inputs, queries, masks, num_head=num_head)
    out = jax.block_until_ready(out)
    assert out.shape == (B, Q, input_dim), out.shape
    np.testing.assert_allclose(np.asarray(out), np.asarray(ref), rtol=5e-2, atol=5e-2)

    # f32 MXU path (tolerance bounded by the approximate EUP reciprocal).
    out_f32 = multi_head_attention(params, inputs, queries, masks,
                                   num_head=num_head, compute_dtype=jnp.float32)
    out_f32 = jax.block_until_ready(out_f32)
    np.testing.assert_allclose(np.asarray(out_f32), np.asarray(ref),
                               rtol=1e-2, atol=1e-2)

    # rank-2 query path (torch's query_rank == 2 branch).
    q2 = queries[:, 0, :]
    ref2 = reference(params, inputs, q2, masks, num_head)
    out2 = multi_head_attention(params, inputs, q2, masks, num_head=num_head,
                                compute_dtype=jnp.float32)
    out2 = jax.block_until_ready(out2)
    assert out2.shape == (B, input_dim), out2.shape
    np.testing.assert_allclose(np.asarray(out2), np.asarray(ref2),
                               rtol=1e-2, atol=1e-2)

    print("KERNEL_OK")
</pallas_src>

<mosaic_0001>
module attributes {stable_mosaic.version = 11 : i64} {
  func.func @_mha_kernel_loop(%arg0: i32, %arg1: memref<2x8x32xf32, #tpu.memory_space<vmem>>, %arg2: memref<2x4x16xf32, #tpu.memory_space<vmem>>, %arg3: memref<2x1x8xf32, #tpu.memory_space<vmem>>, %arg4: memref<32x32xbf16, #tpu.memory_space<vmem>>, %arg5: memref<1x32xf32, #tpu.memory_space<vmem>>, %arg6: memref<32x32xbf16, #tpu.memory_space<vmem>>, %arg7: memref<1x32xf32, #tpu.memory_space<vmem>>, %arg8: memref<16x32xbf16, #tpu.memory_space<vmem>>, %arg9: memref<1x32xf32, #tpu.memory_space<vmem>>, %arg10: memref<2x1x128xf32, #tpu.memory_space<vmem>>) attributes {dimension_semantics = [#tpu.dimension_semantics<parallel>], iteration_bounds = array<i64: 1>, scalar_prefetch = 0 : i64, scratch_operands = 0 : i64, tpu.core_type = #tpu.core_type<tc>, window_params = [{transform_indices = @transform_0, window_bounds = array<i64: 2, 8, 32>}, {transform_indices = @transform_1, window_bounds = array<i64: 2, 4, 16>}, {transform_indices = @transform_2, window_bounds = array<i64: 2, 1, 8>}, {pipeline_mode = #tpu.pipeline_mode<synchronous>, transform_indices = @transform_3, window_bounds = array<i64: 32, 32>}, {pipeline_mode = #tpu.pipeline_mode<synchronous>, transform_indices = @transform_4, window_bounds = array<i64: 1, 32>}, {pipeline_mode = #tpu.pipeline_mode<synchronous>, transform_indices = @transform_5, window_bounds = array<i64: 32, 32>}, {pipeline_mode = #tpu.pipeline_mode<synchronous>, transform_indices = @transform_6, window_bounds = array<i64: 1, 32>}, {pipeline_mode = #tpu.pipeline_mode<synchronous>, transform_indices = @transform_7, window_bounds = array<i64: 16, 32>}, {pipeline_mode = #tpu.pipeline_mode<synchronous>, transform_indices = @transform_8, window_bounds = array<i64: 1, 32>}, {transform_indices = @transform_9, window_bounds = array<i64: 2, 1, 128>}]} {
    %c0 = arith.constant 0 : index
    %c0_0 = arith.constant 0 : index
    %c0_1 = arith.constant 0 : index
    %0 = vector.load %arg1[%c0, %c0_0, %c0_1] : memref<2x8x32xf32, #tpu.memory_space<vmem>>, vector<2x8x32xf32>
    %1 = vector.shape_cast %0 : vector<2x8x32xf32> to vector<16x32xf32>
    %2 = arith.truncf %1 : vector<16x32xf32> to vector<16x32xbf16>
    %c0_2 = arith.constant 0 : index
    %c0_3 = arith.constant 0 : index
    %c0_4 = arith.constant 0 : index
    %3 = vector.load %arg2[%c0_2, %c0_3, %c0_4] : memref<2x4x16xf32, #tpu.memory_space<vmem>>, vector<2x4x16xf32>
    %4 = vector.shape_cast %3 : vector<2x4x16xf32> to vector<8x16xf32>
    %5 = arith.truncf %4 : vector<8x16xf32> to vector<8x16xbf16>
    %c0_5 = arith.constant 0 : index
    %c0_6 = arith.constant 0 : index
    %6 = vector.load %arg4[%c0_5, %c0_6] : memref<32x32xbf16, #tpu.memory_space<vmem>>, vector<32x32xbf16>
    %cst = arith.constant dense<0.000000e+00> : vector<16x32xf32>
    %7 = tpu.matmul %2, %6, %cst {dimension_numbers = #tpu.dot_dimension_numbers<[1], [0], [0], [1], [0, 0, 1, 1], [], []>} : vector<16x32xbf16>, vector<32x32xbf16>, vector<16x32xf32> -> vector<16x32xf32>
    %c0_7 = arith.constant 0 : index
    %c0_8 = arith.constant 0 : index
    %8 = vector.load %arg5[%c0_7, %c0_8] : memref<1x32xf32, #tpu.memory_space<vmem>>, vector<1x32xf32>
    %9 = vector.broadcast %8 : vector<1x32xf32> to vector<16x32xf32>
    %10 = arith.addf %7, %9 : vector<16x32xf32>
    %c0_9 = arith.constant 0 : index
    %c0_10 = arith.constant 0 : index
    %11 = vector.load %arg6[%c0_9, %c0_10] : memref<32x32xbf16, #tpu.memory_space<vmem>>, vector<32x32xbf16>
    %cst_11 = arith.constant dense<0.000000e+00> : vector<16x32xf32>
    %12 = tpu.matmul %2, %11, %cst_11 {dimension_numbers = #tpu.dot_dimension_numbers<[1], [0], [0], [1], [0, 0, 1, 1], [], []>} : vector<16x32xbf16>, vector<32x32xbf16>, vector<16x32xf32> -> vector<16x32xf32>
    %c0_12 = arith.constant 0 : index
    %c0_13 = arith.constant 0 : index
    %13 = vector.load %arg7[%c0_12, %c0_13] : memref<1x32xf32, #tpu.memory_space<vmem>>, vector<1x32xf32>
    %14 = vector.broadcast %13 : vector<1x32xf32> to vector<16x32xf32>
    %15 = arith.addf %12, %14 : vector<16x32xf32>
    %c0_14 = arith.constant 0 : index
    %c0_15 = arith.constant 0 : index
    %16 = vector.load %arg8[%c0_14, %c0_15] : memref<16x32xbf16, #tpu.memory_space<vmem>>, vector<16x32xbf16>
    %cst_16 = arith.constant dense<0.000000e+00> : vector<8x32xf32>
    %17 = tpu.matmul %5, %16, %cst_16 {dimension_numbers = #tpu.dot_dimension_numbers<[1], [0], [0], [1], [0, 0, 1, 1], [], []>} : vector<8x16xbf16>, vector<16x32xbf16>, vector<8x32xf32> -> vector<8x32xf32>
    %c0_17 = arith.constant 0 : index
    %c0_18 = arith.constant 0 : index
    %18 = vector.load %arg9[%c0_17, %c0_18] : memref<1x32xf32, #tpu.memory_space<vmem>>, vector<1x32xf32>
    %19 = vector.broadcast %18 : vector<1x32xf32> to vector<8x32xf32>
    %20 = arith.addf %17, %19 : vector<8x32xf32>
    %21 = vector.shape_cast %10 : vector<16x32xf32> to vector<2x8x32xf32>
    %22 = arith.truncf %21 : vector<2x8x32xf32> to vector<2x8x32xbf16>
    %23 = vector.shape_cast %15 : vector<16x32xf32> to vector<2x8x32xf32>
    %24 = arith.truncf %23 : vector<2x8x32xf32> to vector<2x8x32xbf16>
    %25 = vector.shape_cast %20 : vector<8x32xf32> to vector<2x4x32xf32>
    %26 = arith.truncf %25 : vector<2x4x32xf32> to vector<2x4x32xbf16>
    %c0_19 = arith.constant 0 : index
    %c0_20 = arith.constant 0 : index
    %c0_21 = arith.constant 0 : index
    %27 = vector.load %arg3[%c0_19, %c0_20, %c0_21] : memref<2x1x8xf32, #tpu.memory_space<vmem>>, vector<2x1x8xf32>
    %28 = vector.extract_strided_slice %26 {offsets = [0, 0, 0], sizes = [2, 4, 8], strides = [1, 1, 1]} : vector<2x4x32xbf16> to vector<2x4x8xbf16>
    %29 = vector.extract_strided_slice %22 {offsets = [0, 0, 0], sizes = [2, 8, 8], strides = [1, 1, 1]} : vector<2x8x32xbf16> to vector<2x8x8xbf16>
    "tpu.trace_start"() <{level = 10 : i32, message = "bqd,bsd->bqs"}> : () -> ()
    %cst_22 = arith.constant dense<0.000000e+00> : vector<2x4x8xf32>
    %30 = tpu.matmul %28, %29, %cst_22 {dimension_numbers = #tpu.dot_dimension_numbers<[2], [2], [1], [1], [0, 0, 0, 1, 1, 1], [0], [0]>} : vector<2x4x8xbf16>, vector<2x8x8xbf16>, vector<2x4x8xf32> -> vector<2x4x8xf32>
    "tpu.trace_stop"() : () -> ()
    %cst_23 = arith.constant -5.000000e+01 : f32
    %31 = vector.broadcast %cst_23 : f32 to vector<2x4x8xf32>
    %32 = arith.subf %30, %31 : vector<2x4x8xf32>
    %33 = math.exp %32 : vector<2x4x8xf32>
    %cst_24 = arith.constant -5.100000e+01 : f32
    %34 = vector.broadcast %cst_24 : f32 to vector<2x4x8xf32>
    %35 = arith.addf %34, %33 : vector<2x4x8xf32>
    %cst_25 = arith.constant 5.000000e+01 : f32
    %36 = vector.broadcast %cst_25 : f32 to vector<2x4x8xf32>
    %37 = arith.subf %36, %30 : vector<2x4x8xf32>
    %38 = math.exp %37 : vector<2x4x8xf32>
    %cst_26 = arith.constant 5.100000e+01 : f32
    %39 = vector.broadcast %cst_26 : f32 to vector<2x4x8xf32>
    %40 = arith.subf %39, %38 : vector<2x4x8xf32>
    %cst_27 = arith.constant -5.000000e+01 : f32
    %41 = vector.broadcast %cst_27 : f32 to vector<2x4x8xf32>
    %42 = arith.cmpf olt, %30, %41 : vector<2x4x8xf32>
    %cst_28 = arith.constant 5.000000e+01 : f32
    %43 = vector.broadcast %cst_28 : f32 to vector<2x4x8xf32>
    %44 = arith.cmpf ogt, %30, %43 : vector<2x4x8xf32>
    %45 = arith.select %44, %40, %30 : vector<2x4x8xi1>, vector<2x4x8xf32>
    %46 = arith.select %42, %35, %45 : vector<2x4x8xi1>, vector<2x4x8xf32>
    %47 = math.exp %46 : vector<2x4x8xf32>
    %48 = vector.broadcast %27 : vector<2x1x8xf32> to vector<2x4x8xf32>
    %49 = arith.mulf %47, %48 : vector<2x4x8xf32>
    %cst_29 = arith.constant dense<0.000000e+00> : vector<2x4xf32>
    %50 = vector.multi_reduction <add>, %49, %cst_29 [2] : vector<2x4x8xf32> to vector<2x4xf32>
    %51 = vector.shape_cast %50 : vector<2x4xf32> to vector<2x4x1xf32>
    %52 = tpu.reciprocal %51 {approx = true} : vector<2x4x1xf32> -> vector<2x4x1xf32>
    %53 = vector.broadcast %52 : vector<2x4x1xf32> to vector<2x4x8xf32>
    %54 = arith.mulf %49, %53 : vector<2x4x8xf32>
    %55 = arith.truncf %54 : vector<2x4x8xf32> to vector<2x4x8xbf16>
    %56 = vector.extract_strided_slice %24 {offsets = [0, 0, 0], sizes = [2, 8, 8], strides = [1, 1, 1]} : vector<2x8x32xbf16> to vector<2x8x8xbf16>
    "tpu.trace_start"() <{level = 10 : i32, message = "bqs,bsd->bqd"}> : () -> ()
    %cst_30 = arith.constant dense<0.000000e+00> : vector<2x4x8xf32>
    %57 = tpu.matmul %55, %56, %cst_30 {dimension_numbers = #tpu.dot_dimension_numbers<[2], [1], [1], [2], [0, 0, 0, 1, 1, 2], [0], [0]>} : vector<2x4x8xbf16>, vector<2x8x8xbf16>, vector<2x4x8xf32> -> vector<2x4x8xf32>
    "tpu.trace_stop"() : () -> ()
    %58 = vector.extract_strided_slice %26 {offsets = [0, 0, 8], sizes = [2, 4, 8], strides = [1, 1, 1]} : vector<2x4x32xbf16> to vector<2x4x8xbf16>
    %59 = vector.extract_strided_slice %22 {offsets = [0, 0, 8], sizes = [2, 8, 8], strides = [1, 1, 1]} : vector<2x8x32xbf16> to vector<2x8x8xbf16>
    "tpu.trace_start"() <{level = 10 : i32, message = "bqd,bsd->bqs"}> : () -> ()
    %cst_31 = arith.constant dense<0.000000e+00> : vector<2x4x8xf32>
    %60 = tpu.matmul %58, %59, %cst_31 {dimension_numbers = #tpu.dot_dimension_numbers<[2], [2], [1], [1], [0, 0, 0, 1, 1, 1], [0], [0]>} : vector<2x4x8xbf16>, vector<2x8x8xbf16>, vector<2x4x8xf32> -> vector<2x4x8xf32>
    "tpu.trace_stop"() : () -> ()
    %cst_32 = arith.constant -5.000000e+01 : f32
    %61 = vector.broadcast %cst_32 : f32 to vector<2x4x8xf32>
    %62 = arith.subf %60, %61 : vector<2x4x8xf32>
    %63 = math.exp %62 : vector<2x4x8xf32>
    %cst_33 = arith.constant -5.100000e+01 : f32
    %64 = vector.broadcast %cst_33 : f32 to vector<2x4x8xf32>
    %65 = arith.addf %64, %63 : vector<2x4x8xf32>
    %cst_34 = arith.constant 5.000000e+01 : f32
    %66 = vector.broadcast %cst_34 : f32 to vector<2x4x8xf32>
    %67 = arith.subf %66, %60 : vector<2x4x8xf32>
    %68 = math.exp %67 : vector<2x4x8xf32>
    %cst_35 = arith.constant 5.100000e+01 : f32
    %69 = vector.broadcast %cst_35 : f32 to vector<2x4x8xf32>
    %70 = arith.subf %69, %68 : vector<2x4x8xf32>
    %cst_36 = arith.constant -5.000000e+01 : f32
    %71 = vector.broadcast %cst_36 : f32 to vector<2x4x8xf32>
    %72 = arith.cmpf olt, %60, %71 : vector<2x4x8xf32>
    %cst_37 = arith.constant 5.000000e+01 : f32
    %73 = vector.broadcast %cst_37 : f32 to vector<2x4x8xf32>
    %74 = arith.cmpf ogt, %60, %73 : vector<2x4x8xf32>
    %75 = arith.select %74, %70, %60 : vector<2x4x8xi1>, vector<2x4x8xf32>
    %76 = arith.select %72, %65, %75 : vector<2x4x8xi1>, vector<2x4x8xf32>
    %77 = math.exp %76 : vector<2x4x8xf32>
    %78 = vector.broadcast %27 : vector<2x1x8xf32> to vector<2x4x8xf32>
    %79 = arith.mulf %77, %78 : vector<2x4x8xf32>
    %cst_38 = arith.constant dense<0.000000e+00> : vector<2x4xf32>
    %80 = vector.multi_reduction <add>, %79, %cst_38 [2] : vector<2x4x8xf32> to vector<2x4xf32>
    %81 = vector.shape_cast %80 : vector<2x4xf32> to vector<2x4x1xf32>
    %82 = tpu.reciprocal %81 {approx = true} : vector<2x4x1xf32> -> vector<2x4x1xf32>
    %83 = vector.broadcast %82 : vector<2x4x1xf32> to vector<2x4x8xf32>
    %84 = arith.mulf %79, %83 : vector<2x4x8xf32>
    %85 = arith.truncf %84 : vector<2x4x8xf32> to vector<2x4x8xbf16>
    %86 = vector.extract_strided_slice %24 {offsets = [0, 0, 8], sizes = [2, 8, 8], strides = [1, 1, 1]} : vector<2x8x32xbf16> to vector<2x8x8xbf16>
    "tpu.trace_start"() <{level = 10 : i32, message = "bqs,bsd->bqd"}> : () -> ()
    %cst_39 = arith.constant dense<0.000000e+00> : vector<2x4x8xf32>
    %87 = tpu.matmul %85, %86, %cst_39 {dimension_numbers = #tpu.dot_dimension_numbers<[2], [1], [1], [2], [0, 0, 0, 1, 1, 2], [0], [0]>} : vector<2x4x8xbf16>, vector<2x8x8xbf16>, vector<2x4x8xf32> -> vector<2x4x8xf32>
    "tpu.trace_stop"() : () -> ()
    %88 = vector.extract_strided_slice %26 {offsets = [0, 0, 16], sizes = [2, 4, 8], strides = [1, 1, 1]} : vector<2x4x32xbf16> to vector<2x4x8xbf16>
    %89 = vector.extract_strided_slice %22 {offsets = [0, 0, 16], sizes = [2, 8, 8], strides = [1, 1, 1]} : vector<2x8x32xbf16> to vector<2x8x8xbf16>
    "tpu.trace_start"() <{level = 10 : i32, message = "bqd,bsd->bqs"}> : () -> ()
    %cst_40 = arith.constant dense<0.000000e+00> : vector<2x4x8xf32>
    %90 = tpu.matmul %88, %89, %cst_40 {dimension_numbers = #tpu.dot_dimension_numbers<[2], [2], [1], [1], [0, 0, 0, 1, 1, 1], [0], [0]>} : vector<2x4x8xbf16>, vector<2x8x8xbf16>, vector<2x4x8xf32> -> vector<2x4x8xf32>
    "tpu.trace_stop"() : () -> ()
    %cst_41 = arith.constant -5.000000e+01 : f32
    %91 = vector.broadcast %cst_41 : f32 to vector<2x4x8xf32>
    %92 = arith.subf %90, %91 : vector<2x4x8xf32>
    %93 = math.exp %92 : vector<2x4x8xf32>
    %cst_42 = arith.constant -5.100000e+01 : f32
    %94 = vector.broadcast %cst_42 : f32 to vector<2x4x8xf32>
    %95 = arith.addf %94, %93 : vector<2x4x8xf32>
    %cst_43 = arith.constant 5.000000e+01 : f32
    %96 = vector.broadcast %cst_43 : f32 to vector<2x4x8xf32>
    %97 = arith.subf %96, %90 : vector<2x4x8xf32>
    %98 = math.exp %97 : vector<2x4x8xf32>
    %cst_44 = arith.constant 5.100000e+01 : f32
    %99 = vector.broadcast %cst_44 : f32 to vector<2x4x8xf32>
    %100 = arith.subf %99, %98 : vector<2x4x8xf32>
    %cst_45 = arith.constant -5.000000e+01 : f32
    %101 = vector.broadcast %cst_45 : f32 to vector<2x4x8xf32>
    %102 = arith.cmpf olt, %90, %101 : vector<2x4x8xf32>
    %cst_46 = arith.constant 5.000000e+01 : f32
    %103 = vector.broadcast %cst_46 : f32 to vector<2x4x8xf32>
    %104 = arith.cmpf ogt, %90, %103 : vector<2x4x8xf32>
    %105 = arith.select %104, %100, %90 : vector<2x4x8xi1>, vector<2x4x8xf32>
    %106 = arith.select %102, %95, %105 : vector<2x4x8xi1>, vector<2x4x8xf32>
    %107 = math.exp %106 : vector<2x4x8xf32>
    %108 = vector.broadcast %27 : vector<2x1x8xf32> to vector<2x4x8xf32>
    %109 = arith.mulf %107, %108 : vector<2x4x8xf32>
    %cst_47 = arith.constant dense<0.000000e+00> : vector<2x4xf32>
    %110 = vector.multi_reduction <add>, %109, %cst_47 [2] : vector<2x4x8xf32> to vector<2x4xf32>
    %111 = vector.shape_cast %110 : vector<2x4xf32> to vector<2x4x1xf32>
    %112 = tpu.reciprocal %111 {approx = true} : vector<2x4x1xf32> -> vector<2x4x1xf32>
    %113 = vector.broadcast %112 : vector<2x4x1xf32> to vector<2x4x8xf32>
    %114 = arith.mulf %109, %113 : vector<2x4x8xf32>
    %115 = arith.truncf %114 : vector<2x4x8xf32> to vector<2x4x8xbf16>
    %116 = vector.extract_strided_slice %24 {offsets = [0, 0, 16], sizes = [2, 8, 8], strides = [1, 1, 1]} : vector<2x8x32xbf16> to vector<2x8x8xbf16>
    "tpu.trace_start"() <{level = 10 : i32, message = "bqs,bsd->bqd"}> : () -> ()
    %cst_48 = arith.constant dense<0.000000e+00> : vector<2x4x8xf32>
    %117 = tpu.matmul %115, %116, %cst_48 {dimension_numbers = #tpu.dot_dimension_numbers<[2], [1], [1], [2], [0, 0, 0, 1, 1, 2], [0], [0]>} : vector<2x4x8xbf16>, vector<2x8x8xbf16>, vector<2x4x8xf32> -> vector<2x4x8xf32>
    "tpu.trace_stop"() : () -> ()
    %118 = vector.extract_strided_slice %26 {offsets = [0, 0, 24], sizes = [2, 4, 8], strides = [1, 1, 1]} : vector<2x4x32xbf16> to vector<2x4x8xbf16>
    %119 = vector.extract_strided_slice %22 {offsets = [0, 0, 24], sizes = [2, 8, 8], strides = [1, 1, 1]} : vector<2x8x32xbf16> to vector<2x8x8xbf16>
    "tpu.trace_start"() <{level = 10 : i32, message = "bqd,bsd->bqs"}> : () -> ()
    %cst_49 = arith.constant dense<0.000000e+00> : vector<2x4x8xf32>
    %120 = tpu.matmul %118, %119, %cst_49 {dimension_numbers = #tpu.dot_dimension_numbers<[2], [2], [1], [1], [0, 0, 0, 1, 1, 1], [0], [0]>} : vector<2x4x8xbf16>, vector<2x8x8xbf16>, vector<2x4x8xf32> -> vector<2x4x8xf32>
    "tpu.trace_stop"() : () -> ()
    %cst_50 = arith.constant -5.000000e+01 : f32
    %121 = vector.broadcast %cst_50 : f32 to vector<2x4x8xf32>
    %122 = arith.subf %120, %121 : vector<2x4x8xf32>
    %123 = math.exp %122 : vector<2x4x8xf32>
    %cst_51 = arith.constant -5.100000e+01 : f32
    %124 = vector.broadcast %cst_51 : f32 to vector<2x4x8xf32>
    %125 = arith.addf %124, %123 : vector<2x4x8xf32>
    %cst_52 = arith.constant 5.000000e+01 : f32
    %126 = vector.broadcast %cst_52 : f32 to vector<2x4x8xf32>
    %127 = arith.subf %126, %120 : vector<2x4x8xf32>
    %128 = math.exp %127 : vector<2x4x8xf32>
    %cst_53 = arith.constant 5.100000e+01 : f32
    %129 = vector.broadcast %cst_53 : f32 to vector<2x4x8xf32>
    %130 = arith.subf %129, %128 : vector<2x4x8xf32>
    %cst_54 = arith.constant -5.000000e+01 : f32
    %131 = vector.broadcast %cst_54 : f32 to vector<2x4x8xf32>
    %132 = arith.cmpf olt, %120, %131 : vector<2x4x8xf32>
    %cst_55 = arith.constant 5.000000e+01 : f32
    %133 = vector.broadcast %cst_55 : f32 to vector<2x4x8xf32>
    %134 = arith.cmpf ogt, %120, %133 : vector<2x4x8xf32>
    %135 = arith.select %134, %130, %120 : vector<2x4x8xi1>, vector<2x4x8xf32>
    %136 = arith.select %132, %125, %135 : vector<2x4x8xi1>, vector<2x4x8xf32>
    %137 = math.exp %136 : vector<2x4x8xf32>
    %138 = vector.broadcast %27 : vector<2x1x8xf32> to vector<2x4x8xf32>
    %139 = arith.mulf %137, %138 : vector<2x4x8xf32>
    %cst_56 = arith.constant dense<0.000000e+00> : vector<2x4xf32>
    %140 = vector.multi_reduction <add>, %139, %cst_56 [2] : vector<2x4x8xf32> to vector<2x4xf32>
    %141 = vector.shape_cast %140 : vector<2x4xf32> to vector<2x4x1xf32>
    %142 = tpu.reciprocal %141 {approx = true} : vector<2x4x1xf32> -> vector<2x4x1xf32>
    %143 = vector.broadcast %142 : vector<2x4x1xf32> to vector<2x4x8xf32>
    %144 = arith.mulf %139, %143 : vector<2x4x8xf32>
    %145 = arith.truncf %144 : vector<2x4x8xf32> to vector<2x4x8xbf16>
    %146 = vector.extract_strided_slice %24 {offsets = [0, 0, 24], sizes = [2, 8, 8], strides = [1, 1, 1]} : vector<2x8x32xbf16> to vector<2x8x8xbf16>
    "tpu.trace_start"() <{level = 10 : i32, message = "bqs,bsd->bqd"}> : () -> ()
    %cst_57 = arith.constant dense<0.000000e+00> : vector<2x4x8xf32>
    %147 = tpu.matmul %145, %146, %cst_57 {dimension_numbers = #tpu.dot_dimension_numbers<[2], [1], [1], [2], [0, 0, 0, 1, 1, 2], [0], [0]>} : vector<2x4x8xbf16>, vector<2x8x8xbf16>, vector<2x4x8xf32> -> vector<2x4x8xf32>
    "tpu.trace_stop"() : () -> ()
    %148 = tpu.concatenate %57, %87, %117, %147 in 2 : vector<2x4x8xf32>, vector<2x4x8xf32>, vector<2x4x8xf32>, vector<2x4x8xf32> -> vector<2x4x32xf32>
    %149 = vector.shape_cast %148 : vector<2x4x32xf32> to vector<2x1x128xf32>
    %c0_58 = arith.constant 0 : index
    %c0_59 = arith.constant 0 : index
    %c0_60 = arith.constant 0 : index
    %150 = vector.load %arg10[%c0_58, %c0_59, %c0_60] : memref<2x1x128xf32, #tpu.memory_space<vmem>>, vector<2x1x128xf32>
    tpu.vector_store %arg10[%c0_58, %c0_59, %c0_60], %149 {strides = array<i32>} : memref<2x1x128xf32, #tpu.memory_space<vmem>>, vector<2x1x128xf32>,
    return
  }
  func.func @transform_0(%arg0: i32) -> (i32, i32, i32) {
    %c0_i32 = arith.constant 0 : i32
    %c0_i32_0 = arith.constant 0 : i32
    %c0_i32_1 = arith.constant 0 : i32
    return %arg0, %c0_i32, %c0_i32_0 : i32, i32, i32
  }
  func.func @transform_1(%arg0: i32) -> (i32, i32, i32) {
    %c0_i32 = arith.constant 0 : i32
    %c0_i32_0 = arith.constant 0 : i32
    %c0_i32_1 = arith.constant 0 : i32
    return %arg0, %c0_i32, %c0_i32_0 : i32, i32, i32
  }
  func.func @transform_2(%arg0: i32) -> (i32, i32, i32) {
    %c0_i32 = arith.constant 0 : i32
    %c0_i32_0 = arith.constant 0 : i32
    %c0_i32_1 = arith.constant 0 : i32
    return %arg0, %c0_i32, %c0_i32_0 : i32, i32, i32
  }
  func.func @transform_3(%arg0: i32) -> (i32, i32) {
    %c0_i32 = arith.constant 0 : i32
    %c0_i32_0 = arith.constant 0 : i32
    %c0_i32_1 = arith.constant 0 : i32
    return %c0_i32, %c0_i32_0 : i32, i32
  }
  func.func @transform_4(%arg0: i32) -> (i32, i32) {
    %c0_i32 = arith.constant 0 : i32
    %c0_i32_0 = arith.constant 0 : i32
    %c0_i32_1 = arith.constant 0 : i32
    return %c0_i32, %c0_i32_0 : i32, i32
  }
  func.func @transform_5(%arg0: i32) -> (i32, i32) {
    %c0_i32 = arith.constant 0 : i32
    %c0_i32_0 = arith.constant 0 : i32
    %c0_i32_1 = arith.constant 0 : i32
    return %c0_i32, %c0_i32_0 : i32, i32
  }
  func.func @transform_6(%arg0: i32) -> (i32, i32) {
    %c0_i32 = arith.constant 0 : i32
    %c0_i32_0 = arith.constant 0 : i32
    %c0_i32_1 = arith.constant 0 : i32
    return %c0_i32, %c0_i32_0 : i32, i32
  }
  func.func @transform_7(%arg0: i32) -> (i32, i32) {
    %c0_i32 = arith.constant 0 : i32
    %c0_i32_0 = arith.constant 0 : i32
    %c0_i32_1 = arith.constant 0 : i32
    return %c0_i32, %c0_i32_0 : i32, i32
  }
  func.func @transform_8(%arg0: i32) -> (i32, i32) {
    %c0_i32 = arith.constant 0 : i32
    %c0_i32_0 = arith.constant 0 : i32
    %c0_i32_1 = arith.constant 0 : i32
    return %c0_i32, %c0_i32_0 : i32, i32
  }
  func.func @transform_9(%arg0: i32) -> (i32, i32, i32) {
    %c0_i32 = arith.constant 0 : i32
    %c0_i32_0 = arith.constant 0 : i32
    %c0_i32_1 = arith.constant 0 : i32
    return %arg0, %c0_i32, %c0_i32_0 : i32, i32, i32
  }
}

module attributes {stable_mosaic.version = 11 : i64} {
  func.func @_mha_kernel_loop(%arg0: i32, %arg1: memref<2x8x32xf32, #tpu.memory_space<vmem>>, %arg2: memref<2x4x16xf32, #tpu.memory_space<vmem>>, %arg3: memref<2x1x8xf32, #tpu.memory_space<vmem>>, %arg4: memref<32x32xbf16, #tpu.memory_space<vmem>>, %arg5: memref<1x32xf32, #tpu.memory_space<vmem>>, %arg6: memref<32x32xbf16, #tpu.memory_space<vmem>>, %arg7: memref<1x32xf32, #tpu.memory_space<vmem>>, %arg8: memref<16x32xbf16, #tpu.memory_space<vmem>>, %arg9: memref<1x32xf32, #tpu.memory_space<vmem>>, %arg10: memref<2x1x128xf32, #tpu.memory_space<vmem>>) attributes {dimension_semantics = [#tpu.dimension_semantics<parallel>], iteration_bounds = array<i64: 1>, scalar_prefetch = 0 : i64, scratch_operands = 0 : i64, tpu.core_type = #tpu.core_type<tc>, window_params = [{transform_indices = @transform_0, window_bounds = array<i64: 2, 8, 32>}, {transform_indices = @transform_1, window_bounds = array<i64: 2, 4, 16>}, {transform_indices = @transform_2, window_bounds = array<i64: 2, 1, 8>}, {pipeline_mode = #tpu.pipeline_mode<synchronous>, transform_indices = @transform_3, window_bounds = array<i64: 32, 32>}, {pipeline_mode = #tpu.pipeline_mode<synchronous>, transform_indices = @transform_4, window_bounds = array<i64: 1, 32>}, {pipeline_mode = #tpu.pipeline_mode<synchronous>, transform_indices = @transform_5, window_bounds = array<i64: 32, 32>}, {pipeline_mode = #tpu.pipeline_mode<synchronous>, transform_indices = @transform_6, window_bounds = array<i64: 1, 32>}, {pipeline_mode = #tpu.pipeline_mode<synchronous>, transform_indices = @transform_7, window_bounds = array<i64: 16, 32>}, {pipeline_mode = #tpu.pipeline_mode<synchronous>, transform_indices = @transform_8, window_bounds = array<i64: 1, 32>}, {transform_indices = @transform_9, window_bounds = array<i64: 2, 1, 128>}]} {
    %c0 = arith.constant 0 : index
    %c0_0 = arith.constant 0 : index
    %c0_1 = arith.constant 0 : index
    %0 = vector.load %arg1[%c0, %c0_0, %c0_1] : memref<2x8x32xf32, #tpu.memory_space<vmem>>, vector<2x8x32xf32>
    %1 = vector.shape_cast %0 : vector<2x8x32xf32> to vector<16x32xf32>
    %2 = arith.truncf %1 : vector<16x32xf32> to vector<16x32xbf16>
    %c0_2 = arith.constant 0 : index
    %c0_3 = arith.constant 0 : index
    %c0_4 = arith.constant 0 : index
    %3 = vector.load %arg2[%c0_2, %c0_3, %c0_4] : memref<2x4x16xf32, #tpu.memory_space<vmem>>, vector<2x4x16xf32>
    %4 = vector.shape_cast %3 : vector<2x4x16xf32> to vector<8x16xf32>
    %5 = arith.truncf %4 : vector<8x16xf32> to vector<8x16xbf16>
    %c0_5 = arith.constant 0 : index
    %c0_6 = arith.constant 0 : index
    %6 = vector.load %arg4[%c0_5, %c0_6] : memref<32x32xbf16, #tpu.memory_space<vmem>>, vector<32x32xbf16>
    %cst = arith.constant dense<0.000000e+00> : vector<16x32xf32>
    %7 = tpu.matmul %2, %6, %cst {dimension_numbers = #tpu.dot_dimension_numbers<[1], [0], [0], [1], [0, 0, 1, 1], [], []>} : vector<16x32xbf16>, vector<32x32xbf16>, vector<16x32xf32> -> vector<16x32xf32>
    %c0_7 = arith.constant 0 : index
    %c0_8 = arith.constant 0 : index
    %8 = vector.load %arg5[%c0_7, %c0_8] : memref<1x32xf32, #tpu.memory_space<vmem>>, vector<1x32xf32>
    %9 = vector.broadcast %8 : vector<1x32xf32> to vector<16x32xf32>
    %10 = arith.addf %7, %9 : vector<16x32xf32>
    %c0_9 = arith.constant 0 : index
    %c0_10 = arith.constant 0 : index
    %11 = vector.load %arg6[%c0_9, %c0_10] : memref<32x32xbf16, #tpu.memory_space<vmem>>, vector<32x32xbf16>
    %cst_11 = arith.constant dense<0.000000e+00> : vector<16x32xf32>
    %12 = tpu.matmul %2, %11, %cst_11 {dimension_numbers = #tpu.dot_dimension_numbers<[1], [0], [0], [1], [0, 0, 1, 1], [], []>} : vector<16x32xbf16>, vector<32x32xbf16>, vector<16x32xf32> -> vector<16x32xf32>
    %c0_12 = arith.constant 0 : index
    %c0_13 = arith.constant 0 : index
    %13 = vector.load %arg7[%c0_12, %c0_13] : memref<1x32xf32, #tpu.memory_space<vmem>>, vector<1x32xf32>
    %14 = vector.broadcast %13 : vector<1x32xf32> to vector<16x32xf32>
    %15 = arith.addf %12, %14 : vector<16x32xf32>
    %c0_14 = arith.constant 0 : index
    %c0_15 = arith.constant 0 : index
    %16 = vector.load %arg8[%c0_14, %c0_15] : memref<16x32xbf16, #tpu.memory_space<vmem>>, vector<16x32xbf16>
    %cst_16 = arith.constant dense<0.000000e+00> : vector<8x32xf32>
    %17 = tpu.matmul %5, %16, %cst_16 {dimension_numbers = #tpu.dot_dimension_numbers<[1], [0], [0], [1], [0, 0, 1, 1], [], []>} : vector<8x16xbf16>, vector<16x32xbf16>, vector<8x32xf32> -> vector<8x32xf32>
    %c0_17 = arith.constant 0 : index
    %c0_18 = arith.constant 0 : index
    %18 = vector.load %arg9[%c0_17, %c0_18] : memref<1x32xf32, #tpu.memory_space<vmem>>, vector<1x32xf32>
    %19 = vector.broadcast %18 : vector<1x32xf32> to vector<8x32xf32>
    %20 = arith.addf %17, %19 : vector<8x32xf32>
    %21 = vector.shape_cast %10 : vector<16x32xf32> to vector<2x8x32xf32>
    %22 = arith.truncf %21 : vector<2x8x32xf32> to vector<2x8x32xbf16>
    %23 = vector.shape_cast %15 : vector<16x32xf32> to vector<2x8x32xf32>
    %24 = arith.truncf %23 : vector<2x8x32xf32> to vector<2x8x32xbf16>
    %25 = vector.shape_cast %20 : vector<8x32xf32> to vector<2x4x32xf32>
    %26 = arith.truncf %25 : vector<2x4x32xf32> to vector<2x4x32xbf16>
    %c0_19 = arith.constant 0 : index
    %c0_20 = arith.constant 0 : index
    %c0_21 = arith.constant 0 : index
    %27 = vector.load %arg3[%c0_19, %c0_20, %c0_21] : memref<2x1x8xf32, #tpu.memory_space<vmem>>, vector<2x1x8xf32>
    %28 = vector.extract_strided_slice %26 {offsets = [0, 0, 0], sizes = [2, 4, 8], strides = [1, 1, 1]} : vector<2x4x32xbf16> to vector<2x4x8xbf16>
    %29 = vector.extract_strided_slice %22 {offsets = [0, 0, 0], sizes = [2, 8, 8], strides = [1, 1, 1]} : vector<2x8x32xbf16> to vector<2x8x8xbf16>
    "tpu.trace_start"() <{level = 10 : i32, message = "bqd,bsd->bqs"}> : () -> ()
    %cst_22 = arith.constant dense<0.000000e+00> : vector<2x4x8xf32>
    %30 = tpu.matmul %28, %29, %cst_22 {dimension_numbers = #tpu.dot_dimension_numbers<[2], [2], [1], [1], [0, 0, 0, 1, 1, 1], [0], [0]>} : vector<2x4x8xbf16>, vector<2x8x8xbf16>, vector<2x4x8xf32> -> vector<2x4x8xf32>
    "tpu.trace_stop"() : () -> ()
    %cst_23 = arith.constant -5.000000e+01 : f32
    %31 = vector.broadcast %cst_23 : f32 to vector<2x4x8xf32>
    %32 = arith.subf %30, %31 : vector<2x4x8xf32>
    %33 = math.exp %32 : vector<2x4x8xf32>
    %cst_24 = arith.constant -5.100000e+01 : f32
    %34 = vector.broadcast %cst_24 : f32 to vector<2x4x8xf32>
    %35 = arith.addf %34, %33 : vector<2x4x8xf32>
    %cst_25 = arith.constant 5.000000e+01 : f32
    %36 = vector.broadcast %cst_25 : f32 to vector<2x4x8xf32>
    %37 = arith.subf %36, %30 : vector<2x4x8xf32>
    %38 = math.exp %37 : vector<2x4x8xf32>
    %cst_26 = arith.constant 5.100000e+01 : f32
    %39 = vector.broadcast %cst_26 : f32 to vector<2x4x8xf32>
    %40 = arith.subf %39, %38 : vector<2x4x8xf32>
    %cst_27 = arith.constant -5.000000e+01 : f32
    %41 = vector.broadcast %cst_27 : f32 to vector<2x4x8xf32>
    %42 = arith.cmpf olt, %30, %41 : vector<2x4x8xf32>
    %cst_28 = arith.constant 5.000000e+01 : f32
    %43 = vector.broadcast %cst_28 : f32 to vector<2x4x8xf32>
    %44 = arith.cmpf ogt, %30, %43 : vector<2x4x8xf32>
    %45 = arith.select %44, %40, %30 : vector<2x4x8xi1>, vector<2x4x8xf32>
    %46 = arith.select %42, %35, %45 : vector<2x4x8xi1>, vector<2x4x8xf32>
    %47 = math.exp %46 : vector<2x4x8xf32>
    %48 = vector.broadcast %27 : vector<2x1x8xf32> to vector<2x4x8xf32>
    %49 = arith.mulf %47, %48 : vector<2x4x8xf32>
    %cst_29 = arith.constant dense<0.000000e+00> : vector<2x4xf32>
    %50 = vector.multi_reduction <add>, %49, %cst_29 [2] : vector<2x4x8xf32> to vector<2x4xf32>
    %51 = vector.shape_cast %50 : vector<2x4xf32> to vector<2x4x1xf32>
    %52 = tpu.reciprocal %51 {approx = true} : vector<2x4x1xf32> -> vector<2x4x1xf32>
    %53 = vector.broadcast %52 : vector<2x4x1xf32> to vector<2x4x8xf32>
    %54 = arith.mulf %49, %53 : vector<2x4x8xf32>
    %55 = arith.truncf %54 : vector<2x4x8xf32> to vector<2x4x8xbf16>
    %56 = vector.extract_strided_slice %24 {offsets = [0, 0, 0], sizes = [2, 8, 8], strides = [1, 1, 1]} : vector<2x8x32xbf16> to vector<2x8x8xbf16>
    "tpu.trace_start"() <{level = 10 : i32, message = "bqs,bsd->bqd"}> : () -> ()
    %cst_30 = arith.constant dense<0.000000e+00> : vector<2x4x8xf32>
    %57 = tpu.matmul %55, %56, %cst_30 {dimension_numbers = #tpu.dot_dimension_numbers<[2], [1], [1], [2], [0, 0, 0, 1, 1, 2], [0], [0]>} : vector<2x4x8xbf16>, vector<2x8x8xbf16>, vector<2x4x8xf32> -> vector<2x4x8xf32>
    "tpu.trace_stop"() : () -> ()
    %58 = vector.extract_strided_slice %26 {offsets = [0, 0, 8], sizes = [2, 4, 8], strides = [1, 1, 1]} : vector<2x4x32xbf16> to vector<2x4x8xbf16>
    %59 = vector.extract_strided_slice %22 {offsets = [0, 0, 8], sizes = [2, 8, 8], strides = [1, 1, 1]} : vector<2x8x32xbf16> to vector<2x8x8xbf16>
    "tpu.trace_start"() <{level = 10 : i32, message = "bqd,bsd->bqs"}> : () -> ()
    %cst_31 = arith.constant dense<0.000000e+00> : vector<2x4x8xf32>
    %60 = tpu.matmul %58, %59, %cst_31 {dimension_numbers = #tpu.dot_dimension_numbers<[2], [2], [1], [1], [0, 0, 0, 1, 1, 1], [0], [0]>} : vector<2x4x8xbf16>, vector<2x8x8xbf16>, vector<2x4x8xf32> -> vector<2x4x8xf32>
    "tpu.trace_stop"() : () -> ()
    %cst_32 = arith.constant -5.000000e+01 : f32
    %61 = vector.broadcast %cst_32 : f32 to vector<2x4x8xf32>
    %62 = arith.subf %60, %61 : vector<2x4x8xf32>
    %63 = math.exp %62 : vector<2x4x8xf32>
    %cst_33 = arith.constant -5.100000e+01 : f32
    %64 = vector.broadcast %cst_33 : f32 to vector<2x4x8xf32>
    %65 = arith.addf %64, %63 : vector<2x4x8xf32>
    %cst_34 = arith.constant 5.000000e+01 : f32
    %66 = vector.broadcast %cst_34 : f32 to vector<2x4x8xf32>
    %67 = arith.subf %66, %60 : vector<2x4x8xf32>
    %68 = math.exp %67 : vector<2x4x8xf32>
    %cst_35 = arith.constant 5.100000e+01 : f32
    %69 = vector.broadcast %cst_35 : f32 to vector<2x4x8xf32>
    %70 = arith.subf %69, %68 : vector<2x4x8xf32>
    %cst_36 = arith.constant -5.000000e+01 : f32
    %71 = vector.broadcast %cst_36 : f32 to vector<2x4x8xf32>
    %72 = arith.cmpf olt, %60, %71 : vector<2x4x8xf32>
    %cst_37 = arith.constant 5.000000e+01 : f32
    %73 = vector.broadcast %cst_37 : f32 to vector<2x4x8xf32>
    %74 = arith.cmpf ogt, %60, %73 : vector<2x4x8xf32>
    %75 = arith.select %74, %70, %60 : vector<2x4x8xi1>, vector<2x4x8xf32>
    %76 = arith.select %72, %65, %75 : vector<2x4x8xi1>, vector<2x4x8xf32>
    %77 = math.exp %76 : vector<2x4x8xf32>
    %78 = vector.broadcast %27 : vector<2x1x8xf32> to vector<2x4x8xf32>
    %79 = arith.mulf %77, %78 : vector<2x4x8xf32>
    %cst_38 = arith.constant dense<0.000000e+00> : vector<2x4xf32>
    %80 = vector.multi_reduction <add>, %79, %cst_38 [2] : vector<2x4x8xf32> to vector<2x4xf32>
    %81 = vector.shape_cast %80 : vector<2x4xf32> to vector<2x4x1xf32>
    %82 = tpu.reciprocal %81 {approx = true} : vector<2x4x1xf32> -> vector<2x4x1xf32>
    %83 = vector.broadcast %82 : vector<2x4x1xf32> to vector<2x4x8xf32>
    %84 = arith.mulf %79, %83 : vector<2x4x8xf32>
    %85 = arith.truncf %84 : vector<2x4x8xf32> to vector<2x4x8xbf16>
    %86 = vector.extract_strided_slice %24 {offsets = [0, 0, 8], sizes = [2, 8, 8], strides = [1, 1, 1]} : vector<2x8x32xbf16> to vector<2x8x8xbf16>
    "tpu.trace_start"() <{level = 10 : i32, message = "bqs,bsd->bqd"}> : () -> ()
    %cst_39 = arith.constant dense<0.000000e+00> : vector<2x4x8xf32>
    %87 = tpu.matmul %85, %86, %cst_39 {dimension_numbers = #tpu.dot_dimension_numbers<[2], [1], [1], [2], [0, 0, 0, 1, 1, 2], [0], [0]>} : vector<2x4x8xbf16>, vector<2x8x8xbf16>, vector<2x4x8xf32> -> vector<2x4x8xf32>
    "tpu.trace_stop"() : () -> ()
    %88 = vector.extract_strided_slice %26 {offsets = [0, 0, 16], sizes = [2, 4, 8], strides = [1, 1, 1]} : vector<2x4x32xbf16> to vector<2x4x8xbf16>
    %89 = vector.extract_strided_slice %22 {offsets = [0, 0, 16], sizes = [2, 8, 8], strides = [1, 1, 1]} : vector<2x8x32xbf16> to vector<2x8x8xbf16>
    "tpu.trace_start"() <{level = 10 : i32, message = "bqd,bsd->bqs"}> : () -> ()
    %cst_40 = arith.constant dense<0.000000e+00> : vector<2x4x8xf32>
    %90 = tpu.matmul %88, %89, %cst_40 {dimension_numbers = #tpu.dot_dimension_numbers<[2], [2], [1], [1], [0, 0, 0, 1, 1, 1], [0], [0]>} : vector<2x4x8xbf16>, vector<2x8x8xbf16>, vector<2x4x8xf32> -> vector<2x4x8xf32>
    "tpu.trace_stop"() : () -> ()
    %cst_41 = arith.constant -5.000000e+01 : f32
    %91 = vector.broadcast %cst_41 : f32 to vector<2x4x8xf32>
    %92 = arith.subf %90, %91 : vector<2x4x8xf32>
    %93 = math.exp %92 : vector<2x4x8xf32>
    %cst_42 = arith.constant -5.100000e+01 : f32
    %94 = vector.broadcast %cst_42 : f32 to vector<2x4x8xf32>
    %95 = arith.addf %94, %93 : vector<2x4x8xf32>
    %cst_43 = arith.constant 5.000000e+01 : f32
    %96 = vector.broadcast %cst_43 : f32 to vector<2x4x8xf32>
    %97 = arith.subf %96, %90 : vector<2x4x8xf32>
    %98 = math.exp %97 : vector<2x4x8xf32>
    %cst_44 = arith.constant 5.100000e+01 : f32
    %99 = vector.broadcast %cst_44 : f32 to vector<2x4x8xf32>
    %100 = arith.subf %99, %98 : vector<2x4x8xf32>
    %cst_45 = arith.constant -5.000000e+01 : f32
    %101 = vector.broadcast %cst_45 : f32 to vector<2x4x8xf32>
    %102 = arith.cmpf olt, %90, %101 : vector<2x4x8xf32>
    %cst_46 = arith.constant 5.000000e+01 : f32
    %103 = vector.broadcast %cst_46 : f32 to vector<2x4x8xf32>
    %104 = arith.cmpf ogt, %90, %103 : vector<2x4x8xf32>
    %105 = arith.select %104, %100, %90 : vector<2x4x8xi1>, vector<2x4x8xf32>
    %106 = arith.select %102, %95, %105 : vector<2x4x8xi1>, vector<2x4x8xf32>
    %107 = math.exp %106 : vector<2x4x8xf32>
    %108 = vector.broadcast %27 : vector<2x1x8xf32> to vector<2x4x8xf32>
    %109 = arith.mulf %107, %108 : vector<2x4x8xf32>
    %cst_47 = arith.constant dense<0.000000e+00> : vector<2x4xf32>
    %110 = vector.multi_reduction <add>, %109, %cst_47 [2] : vector<2x4x8xf32> to vector<2x4xf32>
    %111 = vector.shape_cast %110 : vector<2x4xf32> to vector<2x4x1xf32>
    %112 = tpu.reciprocal %111 {approx = true} : vector<2x4x1xf32> -> vector<2x4x1xf32>
    %113 = vector.broadcast %112 : vector<2x4x1xf32> to vector<2x4x8xf32>
    %114 = arith.mulf %109, %113 : vector<2x4x8xf32>
    %115 = arith.truncf %114 : vector<2x4x8xf32> to vector<2x4x8xbf16>
    %116 = vector.extract_strided_slice %24 {offsets = [0, 0, 16], sizes = [2, 8, 8], strides = [1, 1, 1]} : vector<2x8x32xbf16> to vector<2x8x8xbf16>
    "tpu.trace_start"() <{level = 10 : i32, message = "bqs,bsd->bqd"}> : () -> ()
    %cst_48 = arith.constant dense<0.000000e+00> : vector<2x4x8xf32>
    %117 = tpu.matmul %115, %116, %cst_48 {dimension_numbers = #tpu.dot_dimension_numbers<[2], [1], [1], [2], [0, 0, 0, 1, 1, 2], [0], [0]>} : vector<2x4x8xbf16>, vector<2x8x8xbf16>, vector<2x4x8xf32> -> vector<2x4x8xf32>
    "tpu.trace_stop"() : () -> ()
    %118 = vector.extract_strided_slice %26 {offsets = [0, 0, 24], sizes = [2, 4, 8], strides = [1, 1, 1]} : vector<2x4x32xbf16> to vector<2x4x8xbf16>
    %119 = vector.extract_strided_slice %22 {offsets = [0, 0, 24], sizes = [2, 8, 8], strides = [1, 1, 1]} : vector<2x8x32xbf16> to vector<2x8x8xbf16>
    "tpu.trace_start"() <{level = 10 : i32, message = "bqd,bsd->bqs"}> : () -> ()
    %cst_49 = arith.constant dense<0.000000e+00> : vector<2x4x8xf32>
    %120 = tpu.matmul %118, %119, %cst_49 {dimension_numbers = #tpu.dot_dimension_numbers<[2], [2], [1], [1], [0, 0, 0, 1, 1, 1], [0], [0]>} : vector<2x4x8xbf16>, vector<2x8x8xbf16>, vector<2x4x8xf32> -> vector<2x4x8xf32>
    "tpu.trace_stop"() : () -> ()
    %cst_50 = arith.constant -5.000000e+01 : f32
    %121 = vector.broadcast %cst_50 : f32 to vector<2x4x8xf32>
    %122 = arith.subf %120, %121 : vector<2x4x8xf32>
    %123 = math.exp %122 : vector<2x4x8xf32>
    %cst_51 = arith.constant -5.100000e+01 : f32
    %124 = vector.broadcast %cst_51 : f32 to vector<2x4x8xf32>
    %125 = arith.addf %124, %123 : vector<2x4x8xf32>
    %cst_52 = arith.constant 5.000000e+01 : f32
    %126 = vector.broadcast %cst_52 : f32 to vector<2x4x8xf32>
    %127 = arith.subf %126, %120 : vector<2x4x8xf32>
    %128 = math.exp %127 : vector<2x4x8xf32>
    %cst_53 = arith.constant 5.100000e+01 : f32
    %129 = vector.broadcast %cst_53 : f32 to vector<2x4x8xf32>
    %130 = arith.subf %129, %128 : vector<2x4x8xf32>
    %cst_54 = arith.constant -5.000000e+01 : f32
    %131 = vector.broadcast %cst_54 : f32 to vector<2x4x8xf32>
    %132 = arith.cmpf olt, %120, %131 : vector<2x4x8xf32>
    %cst_55 = arith.constant 5.000000e+01 : f32
    %133 = vector.broadcast %cst_55 : f32 to vector<2x4x8xf32>
    %134 = arith.cmpf ogt, %120, %133 : vector<2x4x8xf32>
    %135 = arith.select %134, %130, %120 : vector<2x4x8xi1>, vector<2x4x8xf32>
    %136 = arith.select %132, %125, %135 : vector<2x4x8xi1>, vector<2x4x8xf32>
    %137 = math.exp %136 : vector<2x4x8xf32>
    %138 = vector.broadcast %27 : vector<2x1x8xf32> to vector<2x4x8xf32>
    %139 = arith.mulf %137, %138 : vector<2x4x8xf32>
    %cst_56 = arith.constant dense<0.000000e+00> : vector<2x4xf32>
    %140 = vector.multi_reduction <add>, %139, %cst_56 [2] : vector<2x4x8xf32> to vector<2x4xf32>
    %141 = vector.shape_cast %140 : vector<2x4xf32> to vector<2x4x1xf32>
    %142 = tpu.reciprocal %141 {approx = true} : vector<2x4x1xf32> -> vector<2x4x1xf32>
    %143 = vector.broadcast %142 : vector<2x4x1xf32> to vector<2x4x8xf32>
    %144 = arith.mulf %139, %143 : vector<2x4x8xf32>
    %145 = arith.truncf %144 : vector<2x4x8xf32> to vector<2x4x8xbf16>
    %146 = vector.extract_strided_slice %24 {offsets = [0, 0, 24], sizes = [2, 8, 8], strides = [1, 1, 1]} : vector<2x8x32xbf16> to vector<2x8x8xbf16>
    "tpu.trace_start"() <{level = 10 : i32, message = "bqs,bsd->bqd"}> : () -> ()
    %cst_57 = arith.constant dense<0.000000e+00> : vector<2x4x8xf32>
    %147 = tpu.matmul %145, %146, %cst_57 {dimension_numbers = #tpu.dot_dimension_numbers<[2], [1], [1], [2], [0, 0, 0, 1, 1, 2], [0], [0]>} : vector<2x4x8xbf16>, vector<2x8x8xbf16>, vector<2x4x8xf32> -> vector<2x4x8xf32>
    "tpu.trace_stop"() : () -> ()
    %148 = tpu.concatenate %57, %87, %117, %147 in 2 : vector<2x4x8xf32>, vector<2x4x8xf32>, vector<2x4x8xf32>, vector<2x4x8xf32> -> vector<2x4x32xf32>
    %149 = vector.shape_cast %148 : vector<2x4x32xf32> to vector<2x1x128xf32>
    %c0_58 = arith.constant 0 : index
    %c0_59 = arith.constant 0 : index
    %c0_60 = arith.constant 0 : index
    %150 = vector.load %arg10[%c0_58, %c0_59, %c0_60] : memref<2x1x128xf32, #tpu.memory_space<vmem>>, vector<2x1x128xf32>
    tpu.vector_store %arg10[%c0_58, %c0_59, %c0_60], %149 {strides = array<i32>} : memref<2x1x128xf32, #tpu.memory_space<vmem>>, vector<2x1x128xf32>,
    return
  }
  func.func @transform_0(%arg0: i32) -> (i32, i32, i32) {
    %c0_i32 = arith.constant 0 : i32
    %c0_i32_0 = arith.constant 0 : i32
    %c0_i32_1 = arith.constant 0 : i32
    return %arg0, %c0_i32, %c0_i32_0 : i32, i32, i32
  }
  func.func @transform_1(%arg0: i32) -> (i32, i32, i32) {
    %c0_i32 = arith.constant 0 : i32
    %c0_i32_0 = arith.constant 0 : i32
    %c0_i32_1 = arith.constant 0 : i32
    return %arg0, %c0_i32, %c0_i32_0 : i32, i32, i32
  }
  func.func @transform_2(%arg0: i32) -> (i32, i32, i32) {
    %c0_i32 = arith.constant 0 : i32
    %c0_i32_0 = arith.constant 0 : i32
    %c0_i32_1 = arith.constant 0 : i32
    return %arg0, %c0_i32, %c0_i32_0 : i32, i32, i32
  }
  func.func @transform_3(%arg0: i32) -> (i32, i32) {
    %c0_i32 = arith.constant 0 : i32
    %c0_i32_0 = arith.constant 0 : i32
    %c0_i32_1 = arith.constant 0 : i32
    return %c0_i32, %c0_i32_0 : i32, i32
  }
  func.func @transform_4(%arg0: i32) -> (i32, i32) {
    %c0_i32 = arith.constant 0 : i32
    %c0_i32_0 = arith.constant 0 : i32
    %c0_i32_1 = arith.constant 0 : i32
    return %c0_i32, %c0_i32_0 : i32, i32
  }
  func.func @transform_5(%arg0: i32) -> (i32, i32) {
    %c0_i32 = arith.constant 0 : i32
    %c0_i32_0 = arith.constant 0 : i32
    %c0_i32_1 = arith.constant 0 : i32
    return %c0_i32, %c0_i32_0 : i32, i32
  }
  func.func @transform_6(%arg0: i32) -> (i32, i32) {
    %c0_i32 = arith.constant 0 : i32
    %c0_i32_0 = arith.constant 0 : i32
    %c0_i32_1 = arith.constant 0 : i32
    return %c0_i32, %c0_i32_0 : i32, i32
  }
  func.func @transform_7(%arg0: i32) -> (i32, i32) {
    %c0_i32 = arith.constant 0 : i32
    %c0_i32_0 = arith.constant 0 : i32
    %c0_i32_1 = arith.constant 0 : i32
    return %c0_i32, %c0_i32_0 : i32, i32
  }
  func.func @transform_8(%arg0: i32) -> (i32, i32) {
    %c0_i32 = arith.constant 0 : i32
    %c0_i32_0 = arith.constant 0 : i32
    %c0_i32_1 = arith.constant 0 : i32
    return %c0_i32, %c0_i32_0 : i32, i32
  }
  func.func @transform_9(%arg0: i32) -> (i32, i32, i32) {
    %c0_i32 = arith.constant 0 : i32
    %c0_i32_0 = arith.constant 0 : i32
    %c0_i32_1 = arith.constant 0 : i32
    return %arg0, %c0_i32, %c0_i32_0 : i32, i32, i32
  }
}

module attributes {stable_mosaic.version = 11 : i64} {
  func.func @_mha_kernel_loop(%arg0: i32, %arg1: memref<2x8x32xf32, #tpu.memory_space<vmem>>, %arg2: memref<2x4x16xf32, #tpu.memory_space<vmem>>, %arg3: memref<2x1x8xf32, #tpu.memory_space<vmem>>, %arg4: memref<32x32xbf16, #tpu.memory_space<vmem>>, %arg5: memref<1x32xf32, #tpu.memory_space<vmem>>, %arg6: memref<32x32xbf16, #tpu.memory_space<vmem>>, %arg7: memref<1x32xf32, #tpu.memory_space<vmem>>, %arg8: memref<16x32xbf16, #tpu.memory_space<vmem>>, %arg9: memref<1x32xf32, #tpu.memory_space<vmem>>, %arg10: memref<2x4x32xf32, #tpu.memory_space<vmem>>) attributes {dimension_semantics = [#tpu.dimension_semantics<parallel>], iteration_bounds = array<i64: 1>, scalar_prefetch = 0 : i64, scratch_operands = 0 : i64, tpu.core_type = #tpu.core_type<tc>, window_params = [{transform_indices = @transform_0, window_bounds = array<i64: 2, 8, 32>}, {transform_indices = @transform_1, window_bounds = array<i64: 2, 4, 16>}, {transform_indices = @transform_2, window_bounds = array<i64: 2, 1, 8>}, {pipeline_mode = #tpu.pipeline_mode<synchronous>, transform_indices = @transform_3, window_bounds = array<i64: 32, 32>}, {pipeline_mode = #tpu.pipeline_mode<synchronous>, transform_indices = @transform_4, window_bounds = array<i64: 1, 32>}, {pipeline_mode = #tpu.pipeline_mode<synchronous>, transform_indices = @transform_5, window_bounds = array<i64: 32, 32>}, {pipeline_mode = #tpu.pipeline_mode<synchronous>, transform_indices = @transform_6, window_bounds = array<i64: 1, 32>}, {pipeline_mode = #tpu.pipeline_mode<synchronous>, transform_indices = @transform_7, window_bounds = array<i64: 16, 32>}, {pipeline_mode = #tpu.pipeline_mode<synchronous>, transform_indices = @transform_8, window_bounds = array<i64: 1, 32>}, {transform_indices = @transform_9, window_bounds = array<i64: 2, 4, 32>}]} {
    %c0 = arith.constant 0 : index
    %c0_0 = arith.constant 0 : index
    %c0_1 = arith.constant 0 : index
    %0 = vector.load %arg1[%c0, %c0_0, %c0_1] : memref<2x8x32xf32, #tpu.memory_space<vmem>>, vector<2x8x32xf32>
    %1 = vector.shape_cast %0 : vector<2x8x32xf32> to vector<16x32xf32>
    %2 = arith.truncf %1 : vector<16x32xf32> to vector<16x32xbf16>
    %c0_2 = arith.constant 0 : index
    %c0_3 = arith.constant 0 : index
    %c0_4 = arith.constant 0 : index
    %3 = vector.load %arg2[%c0_2, %c0_3, %c0_4] : memref<2x4x16xf32, #tpu.memory_space<vmem>>, vector<2x4x16xf32>
    %4 = vector.shape_cast %3 : vector<2x4x16xf32> to vector<8x16xf32>
    %5 = arith.truncf %4 : vector<8x16xf32> to vector<8x16xbf16>
    %c0_5 = arith.constant 0 : index
    %c0_6 = arith.constant 0 : index
    %6 = vector.load %arg4[%c0_5, %c0_6] : memref<32x32xbf16, #tpu.memory_space<vmem>>, vector<32x32xbf16>
    %cst = arith.constant dense<0.000000e+00> : vector<16x32xf32>
    %7 = tpu.matmul %2, %6, %cst {dimension_numbers = #tpu.dot_dimension_numbers<[1], [0], [0], [1], [0, 0, 1, 1], [], []>} : vector<16x32xbf16>, vector<32x32xbf16>, vector<16x32xf32> -> vector<16x32xf32>
    %c0_7 = arith.constant 0 : index
    %c0_8 = arith.constant 0 : index
    %8 = vector.load %arg5[%c0_7, %c0_8] : memref<1x32xf32, #tpu.memory_space<vmem>>, vector<1x32xf32>
    %9 = vector.broadcast %8 : vector<1x32xf32> to vector<16x32xf32>
    %10 = arith.addf %7, %9 : vector<16x32xf32>
    %c0_9 = arith.constant 0 : index
    %c0_10 = arith.constant 0 : index
    %11 = vector.load %arg6[%c0_9, %c0_10] : memref<32x32xbf16, #tpu.memory_space<vmem>>, vector<32x32xbf16>
    %cst_11 = arith.constant dense<0.000000e+00> : vector<16x32xf32>
    %12 = tpu.matmul %2, %11, %cst_11 {dimension_numbers = #tpu.dot_dimension_numbers<[1], [0], [0], [1], [0, 0, 1, 1], [], []>} : vector<16x32xbf16>, vector<32x32xbf16>, vector<16x32xf32> -> vector<16x32xf32>
    %c0_12 = arith.constant 0 : index
    %c0_13 = arith.constant 0 : index
    %13 = vector.load %arg7[%c0_12, %c0_13] : memref<1x32xf32, #tpu.memory_space<vmem>>, vector<1x32xf32>
    %14 = vector.broadcast %13 : vector<1x32xf32> to vector<16x32xf32>
    %15 = arith.addf %12, %14 : vector<16x32xf32>
    %c0_14 = arith.constant 0 : index
    %c0_15 = arith.constant 0 : index
    %16 = vector.load %arg8[%c0_14, %c0_15] : memref<16x32xbf16, #tpu.memory_space<vmem>>, vector<16x32xbf16>
    %cst_16 = arith.constant dense<0.000000e+00> : vector<8x32xf32>
    %17 = tpu.matmul %5, %16, %cst_16 {dimension_numbers = #tpu.dot_dimension_numbers<[1], [0], [0], [1], [0, 0, 1, 1], [], []>} : vector<8x16xbf16>, vector<16x32xbf16>, vector<8x32xf32> -> vector<8x32xf32>
    %c0_17 = arith.constant 0 : index
    %c0_18 = arith.constant 0 : index
    %18 = vector.load %arg9[%c0_17, %c0_18] : memref<1x32xf32, #tpu.memory_space<vmem>>, vector<1x32xf32>
    %19 = vector.broadcast %18 : vector<1x32xf32> to vector<8x32xf32>
    %20 = arith.addf %17, %19 : vector<8x32xf32>
    %21 = vector.shape_cast %10 : vector<16x32xf32> to vector<2x8x32xf32>
    %22 = arith.truncf %21 : vector<2x8x32xf32> to vector<2x8x32xbf16>
    %23 = vector.shape_cast %15 : vector<16x32xf32> to vector<2x8x32xf32>
    %24 = arith.truncf %23 : vector<2x8x32xf32> to vector<2x8x32xbf16>
    %25 = vector.shape_cast %20 : vector<8x32xf32> to vector<2x4x32xf32>
    %26 = arith.truncf %25 : vector<2x4x32xf32> to vector<2x4x32xbf16>
    %c0_19 = arith.constant 0 : index
    %c0_20 = arith.constant 0 : index
    %c0_21 = arith.constant 0 : index
    %27 = vector.load %arg3[%c0_19, %c0_20, %c0_21] : memref<2x1x8xf32, #tpu.memory_space<vmem>>, vector<2x1x8xf32>
    %28 = vector.extract_strided_slice %26 {offsets = [0, 0, 0], sizes = [2, 4, 8], strides = [1, 1, 1]} : vector<2x4x32xbf16> to vector<2x4x8xbf16>
    %29 = vector.extract_strided_slice %22 {offsets = [0, 0, 0], sizes = [2, 8, 8], strides = [1, 1, 1]} : vector<2x8x32xbf16> to vector<2x8x8xbf16>
    "tpu.trace_start"() <{level = 10 : i32, message = "bqd,bsd->bqs"}> : () -> ()
    %cst_22 = arith.constant dense<0.000000e+00> : vector<2x4x8xf32>
    %30 = tpu.matmul %28, %29, %cst_22 {dimension_numbers = #tpu.dot_dimension_numbers<[2], [2], [1], [1], [0, 0, 0, 1, 1, 1], [0], [0]>} : vector<2x4x8xbf16>, vector<2x8x8xbf16>, vector<2x4x8xf32> -> vector<2x4x8xf32>
    "tpu.trace_stop"() : () -> ()
    %cst_23 = arith.constant -5.000000e+01 : f32
    %31 = vector.broadcast %cst_23 : f32 to vector<2x4x8xf32>
    %32 = arith.subf %30, %31 : vector<2x4x8xf32>
    %33 = math.exp %32 : vector<2x4x8xf32>
    %cst_24 = arith.constant -5.100000e+01 : f32
    %34 = vector.broadcast %cst_24 : f32 to vector<2x4x8xf32>
    %35 = arith.addf %34, %33 : vector<2x4x8xf32>
    %cst_25 = arith.constant 5.000000e+01 : f32
    %36 = vector.broadcast %cst_25 : f32 to vector<2x4x8xf32>
    %37 = arith.subf %36, %30 : vector<2x4x8xf32>
    %38 = math.exp %37 : vector<2x4x8xf32>
    %cst_26 = arith.constant 5.100000e+01 : f32
    %39 = vector.broadcast %cst_26 : f32 to vector<2x4x8xf32>
    %40 = arith.subf %39, %38 : vector<2x4x8xf32>
    %cst_27 = arith.constant -5.000000e+01 : f32
    %41 = vector.broadcast %cst_27 : f32 to vector<2x4x8xf32>
    %42 = arith.cmpf olt, %30, %41 : vector<2x4x8xf32>
    %cst_28 = arith.constant 5.000000e+01 : f32
    %43 = vector.broadcast %cst_28 : f32 to vector<2x4x8xf32>
    %44 = arith.cmpf ogt, %30, %43 : vector<2x4x8xf32>
    %45 = arith.select %44, %40, %30 : vector<2x4x8xi1>, vector<2x4x8xf32>
    %46 = arith.select %42, %35, %45 : vector<2x4x8xi1>, vector<2x4x8xf32>
    %47 = math.exp %46 : vector<2x4x8xf32>
    %48 = vector.broadcast %27 : vector<2x1x8xf32> to vector<2x4x8xf32>
    %49 = arith.mulf %47, %48 : vector<2x4x8xf32>
    %cst_29 = arith.constant dense<0.000000e+00> : vector<2x4xf32>
    %50 = vector.multi_reduction <add>, %49, %cst_29 [2] : vector<2x4x8xf32> to vector<2x4xf32>
    %51 = vector.shape_cast %50 : vector<2x4xf32> to vector<2x4x1xf32>
    %52 = tpu.reciprocal %51 {approx = true} : vector<2x4x1xf32> -> vector<2x4x1xf32>
    %53 = vector.broadcast %52 : vector<2x4x1xf32> to vector<2x4x8xf32>
    %54 = arith.mulf %49, %53 : vector<2x4x8xf32>
    %55 = arith.truncf %54 : vector<2x4x8xf32> to vector<2x4x8xbf16>
    %56 = vector.extract_strided_slice %24 {offsets = [0, 0, 0], sizes = [2, 8, 8], strides = [1, 1, 1]} : vector<2x8x32xbf16> to vector<2x8x8xbf16>
    "tpu.trace_start"() <{level = 10 : i32, message = "bqs,bsd->bqd"}> : () -> ()
    %cst_30 = arith.constant dense<0.000000e+00> : vector<2x4x8xf32>
    %57 = tpu.matmul %55, %56, %cst_30 {dimension_numbers = #tpu.dot_dimension_numbers<[2], [1], [1], [2], [0, 0, 0, 1, 1, 2], [0], [0]>} : vector<2x4x8xbf16>, vector<2x8x8xbf16>, vector<2x4x8xf32> -> vector<2x4x8xf32>
    "tpu.trace_stop"() : () -> ()
    %58 = vector.extract_strided_slice %26 {offsets = [0, 0, 8], sizes = [2, 4, 8], strides = [1, 1, 1]} : vector<2x4x32xbf16> to vector<2x4x8xbf16>
    %59 = vector.extract_strided_slice %22 {offsets = [0, 0, 8], sizes = [2, 8, 8], strides = [1, 1, 1]} : vector<2x8x32xbf16> to vector<2x8x8xbf16>
    "tpu.trace_start"() <{level = 10 : i32, message = "bqd,bsd->bqs"}> : () -> ()
    %cst_31 = arith.constant dense<0.000000e+00> : vector<2x4x8xf32>
    %60 = tpu.matmul %58, %59, %cst_31 {dimension_numbers = #tpu.dot_dimension_numbers<[2], [2], [1], [1], [0, 0, 0, 1, 1, 1], [0], [0]>} : vector<2x4x8xbf16>, vector<2x8x8xbf16>, vector<2x4x8xf32> -> vector<2x4x8xf32>
    "tpu.trace_stop"() : () -> ()
    %cst_32 = arith.constant -5.000000e+01 : f32
    %61 = vector.broadcast %cst_32 : f32 to vector<2x4x8xf32>
    %62 = arith.subf %60, %61 : vector<2x4x8xf32>
    %63 = math.exp %62 : vector<2x4x8xf32>
    %cst_33 = arith.constant -5.100000e+01 : f32
    %64 = vector.broadcast %cst_33 : f32 to vector<2x4x8xf32>
    %65 = arith.addf %64, %63 : vector<2x4x8xf32>
    %cst_34 = arith.constant 5.000000e+01 : f32
    %66 = vector.broadcast %cst_34 : f32 to vector<2x4x8xf32>
    %67 = arith.subf %66, %60 : vector<2x4x8xf32>
    %68 = math.exp %67 : vector<2x4x8xf32>
    %cst_35 = arith.constant 5.100000e+01 : f32
    %69 = vector.broadcast %cst_35 : f32 to vector<2x4x8xf32>
    %70 = arith.subf %69, %68 : vector<2x4x8xf32>
    %cst_36 = arith.constant -5.000000e+01 : f32
    %71 = vector.broadcast %cst_36 : f32 to vector<2x4x8xf32>
    %72 = arith.cmpf olt, %60, %71 : vector<2x4x8xf32>
    %cst_37 = arith.constant 5.000000e+01 : f32
    %73 = vector.broadcast %cst_37 : f32 to vector<2x4x8xf32>
    %74 = arith.cmpf ogt, %60, %73 : vector<2x4x8xf32>
    %75 = arith.select %74, %70, %60 : vector<2x4x8xi1>, vector<2x4x8xf32>
    %76 = arith.select %72, %65, %75 : vector<2x4x8xi1>, vector<2x4x8xf32>
    %77 = math.exp %76 : vector<2x4x8xf32>
    %78 = vector.broadcast %27 : vector<2x1x8xf32> to vector<2x4x8xf32>
    %79 = arith.mulf %77, %78 : vector<2x4x8xf32>
    %cst_38 = arith.constant dense<0.000000e+00> : vector<2x4xf32>
    %80 = vector.multi_reduction <add>, %79, %cst_38 [2] : vector<2x4x8xf32> to vector<2x4xf32>
    %81 = vector.shape_cast %80 : vector<2x4xf32> to vector<2x4x1xf32>
    %82 = tpu.reciprocal %81 {approx = true} : vector<2x4x1xf32> -> vector<2x4x1xf32>
    %83 = vector.broadcast %82 : vector<2x4x1xf32> to vector<2x4x8xf32>
    %84 = arith.mulf %79, %83 : vector<2x4x8xf32>
    %85 = arith.truncf %84 : vector<2x4x8xf32> to vector<2x4x8xbf16>
    %86 = vector.extract_strided_slice %24 {offsets = [0, 0, 8], sizes = [2, 8, 8], strides = [1, 1, 1]} : vector<2x8x32xbf16> to vector<2x8x8xbf16>
    "tpu.trace_start"() <{level = 10 : i32, message = "bqs,bsd->bqd"}> : () -> ()
    %cst_39 = arith.constant dense<0.000000e+00> : vector<2x4x8xf32>
    %87 = tpu.matmul %85, %86, %cst_39 {dimension_numbers = #tpu.dot_dimension_numbers<[2], [1], [1], [2], [0, 0, 0, 1, 1, 2], [0], [0]>} : vector<2x4x8xbf16>, vector<2x8x8xbf16>, vector<2x4x8xf32> -> vector<2x4x8xf32>
    "tpu.trace_stop"() : () -> ()
    %88 = vector.extract_strided_slice %26 {offsets = [0, 0, 16], sizes = [2, 4, 8], strides = [1, 1, 1]} : vector<2x4x32xbf16> to vector<2x4x8xbf16>
    %89 = vector.extract_strided_slice %22 {offsets = [0, 0, 16], sizes = [2, 8, 8], strides = [1, 1, 1]} : vector<2x8x32xbf16> to vector<2x8x8xbf16>
    "tpu.trace_start"() <{level = 10 : i32, message = "bqd,bsd->bqs"}> : () -> ()
    %cst_40 = arith.constant dense<0.000000e+00> : vector<2x4x8xf32>
    %90 = tpu.matmul %88, %89, %cst_40 {dimension_numbers = #tpu.dot_dimension_numbers<[2], [2], [1], [1], [0, 0, 0, 1, 1, 1], [0], [0]>} : vector<2x4x8xbf16>, vector<2x8x8xbf16>, vector<2x4x8xf32> -> vector<2x4x8xf32>
    "tpu.trace_stop"() : () -> ()
    %cst_41 = arith.constant -5.000000e+01 : f32
    %91 = vector.broadcast %cst_41 : f32 to vector<2x4x8xf32>
    %92 = arith.subf %90, %91 : vector<2x4x8xf32>
    %93 = math.exp %92 : vector<2x4x8xf32>
    %cst_42 = arith.constant -5.100000e+01 : f32
    %94 = vector.broadcast %cst_42 : f32 to vector<2x4x8xf32>
    %95 = arith.addf %94, %93 : vector<2x4x8xf32>
    %cst_43 = arith.constant 5.000000e+01 : f32
    %96 = vector.broadcast %cst_43 : f32 to vector<2x4x8xf32>
    %97 = arith.subf %96, %90 : vector<2x4x8xf32>
    %98 = math.exp %97 : vector<2x4x8xf32>
    %cst_44 = arith.constant 5.100000e+01 : f32
    %99 = vector.broadcast %cst_44 : f32 to vector<2x4x8xf32>
    %100 = arith.subf %99, %98 : vector<2x4x8xf32>
    %cst_45 = arith.constant -5.000000e+01 : f32
    %101 = vector.broadcast %cst_45 : f32 to vector<2x4x8xf32>
    %102 = arith.cmpf olt, %90, %101 : vector<2x4x8xf32>
    %cst_46 = arith.constant 5.000000e+01 : f32
    %103 = vector.broadcast %cst_46 : f32 to vector<2x4x8xf32>
    %104 = arith.cmpf ogt, %90, %103 : vector<2x4x8xf32>
    %105 = arith.select %104, %100, %90 : vector<2x4x8xi1>, vector<2x4x8xf32>
    %106 = arith.select %102, %95, %105 : vector<2x4x8xi1>, vector<2x4x8xf32>
    %107 = math.exp %106 : vector<2x4x8xf32>
    %108 = vector.broadcast %27 : vector<2x1x8xf32> to vector<2x4x8xf32>
    %109 = arith.mulf %107, %108 : vector<2x4x8xf32>
    %cst_47 = arith.constant dense<0.000000e+00> : vector<2x4xf32>
    %110 = vector.multi_reduction <add>, %109, %cst_47 [2] : vector<2x4x8xf32> to vector<2x4xf32>
    %111 = vector.shape_cast %110 : vector<2x4xf32> to vector<2x4x1xf32>
    %112 = tpu.reciprocal %111 {approx = true} : vector<2x4x1xf32> -> vector<2x4x1xf32>
    %113 = vector.broadcast %112 : vector<2x4x1xf32> to vector<2x4x8xf32>
    %114 = arith.mulf %109, %113 : vector<2x4x8xf32>
    %115 = arith.truncf %114 : vector<2x4x8xf32> to vector<2x4x8xbf16>
    %116 = vector.extract_strided_slice %24 {offsets = [0, 0, 16], sizes = [2, 8, 8], strides = [1, 1, 1]} : vector<2x8x32xbf16> to vector<2x8x8xbf16>
    "tpu.trace_start"() <{level = 10 : i32, message = "bqs,bsd->bqd"}> : () -> ()
    %cst_48 = arith.constant dense<0.000000e+00> : vector<2x4x8xf32>
    %117 = tpu.matmul %115, %116, %cst_48 {dimension_numbers = #tpu.dot_dimension_numbers<[2], [1], [1], [2], [0, 0, 0, 1, 1, 2], [0], [0]>} : vector<2x4x8xbf16>, vector<2x8x8xbf16>, vector<2x4x8xf32> -> vector<2x4x8xf32>
    "tpu.trace_stop"() : () -> ()
    %118 = vector.extract_strided_slice %26 {offsets = [0, 0, 24], sizes = [2, 4, 8], strides = [1, 1, 1]} : vector<2x4x32xbf16> to vector<2x4x8xbf16>
    %119 = vector.extract_strided_slice %22 {offsets = [0, 0, 24], sizes = [2, 8, 8], strides = [1, 1, 1]} : vector<2x8x32xbf16> to vector<2x8x8xbf16>
    "tpu.trace_start"() <{level = 10 : i32, message = "bqd,bsd->bqs"}> : () -> ()
    %cst_49 = arith.constant dense<0.000000e+00> : vector<2x4x8xf32>
    %120 = tpu.matmul %118, %119, %cst_49 {dimension_numbers = #tpu.dot_dimension_numbers<[2], [2], [1], [1], [0, 0, 0, 1, 1, 1], [0], [0]>} : vector<2x4x8xbf16>, vector<2x8x8xbf16>, vector<2x4x8xf32> -> vector<2x4x8xf32>
    "tpu.trace_stop"() : () -> ()
    %cst_50 = arith.constant -5.000000e+01 : f32
    %121 = vector.broadcast %cst_50 : f32 to vector<2x4x8xf32>
    %122 = arith.subf %120, %121 : vector<2x4x8xf32>
    %123 = math.exp %122 : vector<2x4x8xf32>
    %cst_51 = arith.constant -5.100000e+01 : f32
    %124 = vector.broadcast %cst_51 : f32 to vector<2x4x8xf32>
    %125 = arith.addf %124, %123 : vector<2x4x8xf32>
    %cst_52 = arith.constant 5.000000e+01 : f32
    %126 = vector.broadcast %cst_52 : f32 to vector<2x4x8xf32>
    %127 = arith.subf %126, %120 : vector<2x4x8xf32>
    %128 = math.exp %127 : vector<2x4x8xf32>
    %cst_53 = arith.constant 5.100000e+01 : f32
    %129 = vector.broadcast %cst_53 : f32 to vector<2x4x8xf32>
    %130 = arith.subf %129, %128 : vector<2x4x8xf32>
    %cst_54 = arith.constant -5.000000e+01 : f32
    %131 = vector.broadcast %cst_54 : f32 to vector<2x4x8xf32>
    %132 = arith.cmpf olt, %120, %131 : vector<2x4x8xf32>
    %cst_55 = arith.constant 5.000000e+01 : f32
    %133 = vector.broadcast %cst_55 : f32 to vector<2x4x8xf32>
    %134 = arith.cmpf ogt, %120, %133 : vector<2x4x8xf32>
    %135 = arith.select %134, %130, %120 : vector<2x4x8xi1>, vector<2x4x8xf32>
    %136 = arith.select %132, %125, %135 : vector<2x4x8xi1>, vector<2x4x8xf32>
    %137 = math.exp %136 : vector<2x4x8xf32>
    %138 = vector.broadcast %27 : vector<2x1x8xf32> to vector<2x4x8xf32>
    %139 = arith.mulf %137, %138 : vector<2x4x8xf32>
    %cst_56 = arith.constant dense<0.000000e+00> : vector<2x4xf32>
    %140 = vector.multi_reduction <add>, %139, %cst_56 [2] : vector<2x4x8xf32> to vector<2x4xf32>
    %141 = vector.shape_cast %140 : vector<2x4xf32> to vector<2x4x1xf32>
    %142 = tpu.reciprocal %141 {approx = true} : vector<2x4x1xf32> -> vector<2x4x1xf32>
    %143 = vector.broadcast %142 : vector<2x4x1xf32> to vector<2x4x8xf32>
    %144 = arith.mulf %139, %143 : vector<2x4x8xf32>
    %145 = arith.truncf %144 : vector<2x4x8xf32> to vector<2x4x8xbf16>
    %146 = vector.extract_strided_slice %24 {offsets = [0, 0, 24], sizes = [2, 8, 8], strides = [1, 1, 1]} : vector<2x8x32xbf16> to vector<2x8x8xbf16>
    "tpu.trace_start"() <{level = 10 : i32, message = "bqs,bsd->bqd"}> : () -> ()
    %cst_57 = arith.constant dense<0.000000e+00> : vector<2x4x8xf32>
    %147 = tpu.matmul %145, %146, %cst_57 {dimension_numbers = #tpu.dot_dimension_numbers<[2], [1], [1], [2], [0, 0, 0, 1, 1, 2], [0], [0]>} : vector<2x4x8xbf16>, vector<2x8x8xbf16>, vector<2x4x8xf32> -> vector<2x4x8xf32>
    "tpu.trace_stop"() : () -> ()
    %148 = tpu.concatenate %57, %87, %117, %147 in 2 : vector<2x4x8xf32>, vector<2x4x8xf32>, vector<2x4x8xf32>, vector<2x4x8xf32> -> vector<2x4x32xf32>
    %c0_58 = arith.constant 0 : index
    %c0_59 = arith.constant 0 : index
    %c0_60 = arith.constant 0 : index
    %149 = vector.load %arg10[%c0_58, %c0_59, %c0_60] : memref<2x4x32xf32, #tpu.memory_space<vmem>>, vector<2x4x32xf32>
    tpu.vector_store %arg10[%c0_58, %c0_59, %c0_60], %148 {strides = array<i32>} : memref<2x4x32xf32, #tpu.memory_space<vmem>>, vector<2x4x32xf32>,
    return
  }
  func.func @transform_0(%arg0: i32) -> (i32, i32, i32) {
    %c0_i32 = arith.constant 0 : i32
    %c0_i32_0 = arith.constant 0 : i32
    %c0_i32_1 = arith.constant 0 : i32
    return %arg0, %c0_i32, %c0_i32_0 : i32, i32, i32
  }
  func.func @transform_1(%arg0: i32) -> (i32, i32, i32) {
    %c0_i32 = arith.constant 0 : i32
    %c0_i32_0 = arith.constant 0 : i32
    %c0_i32_1 = arith.constant 0 : i32
    return %arg0, %c0_i32, %c0_i32_0 : i32, i32, i32
  }
  func.func @transform_2(%arg0: i32) -> (i32, i32, i32) {
    %c0_i32 = arith.constant 0 : i32
    %c0_i32_0 = arith.constant 0 : i32
    %c0_i32_1 = arith.constant 0 : i32
    return %arg0, %c0_i32, %c0_i32_0 : i32, i32, i32
  }
  func.func @transform_3(%arg0: i32) -> (i32, i32) {
    %c0_i32 = arith.constant 0 : i32
    %c0_i32_0 = arith.constant 0 : i32
    %c0_i32_1 = arith.constant 0 : i32
    return %c0_i32, %c0_i32_0 : i32, i32
  }
  func.func @transform_4(%arg0: i32) -> (i32, i32) {
    %c0_i32 = arith.constant 0 : i32
    %c0_i32_0 = arith.constant 0 : i32
    %c0_i32_1 = arith.constant 0 : i32
    return %c0_i32, %c0_i32_0 : i32, i32
  }
  func.func @transform_5(%arg0: i32) -> (i32, i32) {
    %c0_i32 = arith.constant 0 : i32
    %c0_i32_0 = arith.constant 0 : i32
    %c0_i32_1 = arith.constant 0 : i32
    return %c0_i32, %c0_i32_0 : i32, i32
  }
  func.func @transform_6(%arg0: i32) -> (i32, i32) {
    %c0_i32 = arith.constant 0 : i32
    %c0_i32_0 = arith.constant 0 : i32
    %c0_i32_1 = arith.constant 0 : i32
    return %c0_i32, %c0_i32_0 : i32, i32
  }
  func.func @transform_7(%arg0: i32) -> (i32, i32) {
    %c0_i32 = arith.constant 0 : i32
    %c0_i32_0 = arith.constant 0 : i32
    %c0_i32_1 = arith.constant 0 : i32
    return %c0_i32, %c0_i32_0 : i32, i32
  }
  func.func @transform_8(%arg0: i32) -> (i32, i32) {
    %c0_i32 = arith.constant 0 : i32
    %c0_i32_0 = arith.constant 0 : i32
    %c0_i32_1 = arith.constant 0 : i32
    return %c0_i32, %c0_i32_0 : i32, i32
  }
  func.func @transform_9(%arg0: i32) -> (i32, i32, i32) {
    %c0_i32 = arith.constant 0 : i32
    %c0_i32_0 = arith.constant 0 : i32
    %c0_i32_1 = arith.constant 0 : i32
    return %arg0, %c0_i32, %c0_i32_0 : i32, i32, i32
  }
}

</mosaic_0001>

<bundles_post_ra>
// kernel: tpu_custom_call.1
= control target key start
LH: loop header
LB: loop body
LE: loop exit
PB: predicated region body
PF: predicated region fallthrough
CT: control target
= control target key end

     0   :  { %14 = vsyncpa [#allocation3], 0  ;;  %s2096_s0 = inlined_call_operand.hbm [shape: f32[2,8,32], index: 0, kind: input, shape index: {}]   ;;  %s2097_s1 = inlined_call_operand.hbm [shape: f32[2,4,16], index: 1, kind: input, shape index: {}]   ;;  %s2098_s2 = inlined_call_operand.vmem [shape: f32[2,1,8], index: 2, kind: input, shape index: {}]   ;;  %s2099_s3 = inlined_call_operand.hbm [shape: bf16[32,32], index: 3, kind: input, shape index: {}]   ;;  %s2100_s4 = inlined_call_operand.vmem [shape: f32[1,32], index: 4, kind: input, shape index: {}]   ;;  %s2101_s5 = inlined_call_operand.hbm [shape: bf16[32,32], index: 5, kind: input, shape index: {}]   ;;  %s2102_s6 = inlined_call_operand.vmem [shape: f32[1,32], index: 6, kind: input, shape index: {}]   ;;  %s2103_s7 = inlined_call_operand.vmem [shape: bf16[16,32], index: 7, kind: input, shape index: {}]   ;;  %s2104_s8 = inlined_call_operand.vmem [shape: f32[1,32], index: 8, kind: input, shape index: {}]   ;;  %s2105_s9 = inlined_call_operand.hbm [shape: f32[2,1,128], index: 9, kind: output, shape index: {}]  }
   0x1   :  { %15 = vsyncpa [#allocation6], 0 }
   0x2   :  { %16 = vsyncpa [#allocation9], 0 }
   0x3   :  { %17 = vsyncpa [#allocation4], 0  ;;  %s1788_s30 = smov [#allocation5]  }
   0x4   :  { %s35_s10 = sshll.u32 %s1788_s30, 4  ;;  %s36_s10 = int_to_ptr.vmem [resolvable:$true] %s35_s10 }
   0x5   :  { %s1688_s11 = scalar_lea.vmem %s36_s10, 128  ;;  %p1693_p1 = scmp.lt.s32.totalorder %s36_s10, %s36_s10 }
   0x6   :  { %p1689_p0 = scmp.ne.s32.totalorder %s36_s10, %s1688_s11  ;;  %p1694_p2 = scmp.lt.s32.totalorder %s1688_s11, %s1688_s11 }
   0x8   :  { %p1695_p3 = por %p1694_p2, %p1693_p1 }
   0xa   :  { %p1696_p4 = pnand %p1695_p3, %p1689_p0 }
   0xc   :  { %1699 = shalt.err (!%p1696_p4)
}
   0xd   :  { %s1789_s12 = smov 64   ;;  %s1790_s13 = smov 4  }
   0xe   :  { %41 = dma.hbm_to_vmem [thread:$0]  %s2097_s1, 128, %s36_s10, [#allocation6], %s1789_s12, %s1789_s12, %s1790_s13  }
   0xf   :  { %s1791_s16 = smov [#allocation2]  }
  0x10   :  { %s23_s17 = sshll.u32 %s1791_s16, 4  ;;  %s24_s17 = int_to_ptr.vmem [resolvable:$true] %s23_s17 }
  0x11   :  { %s1708_s18 = scalar_lea.vmem %s24_s17, 256  ;;  %p1713_p6 = scmp.lt.s32.totalorder %s24_s17, %s24_s17 }
  0x12   :  { %p1709_p5 = scmp.ne.s32.totalorder %s24_s17, %s1708_s18  ;;  %p1714_p7 = scmp.lt.s32.totalorder %s1708_s18, %s1708_s18 }
  0x14   :  { %p1715_p8 = por %p1714_p7, %p1713_p6 }
  0x16   :  { %p1716_p9 = pnand %p1715_p8, %p1709_p5 }
  0x18   :  { %1719 = shalt.err (!%p1716_p9)
}
  0x19   :  { %s1792_s19 = smov 128   ;;  %s1793_s20 = smov 8  }
  0x1a   :  { %29 = dma.hbm_to_vmem [thread:$0]  %s2096_s0, 256, %s24_s17, [#allocation3], %s1792_s19, %s1792_s19, %s1793_s20  }
  0x1b   :  { %s1794_s23 = smov [#allocation7]   ;;  %s1795_s1 = smov [#allocation8]  }
  0x1c   :  { %s49_s24 = sshll.u32 %s1794_s23, 4  ;;  %s63_s25 = sshll.u32 %s1795_s1, 4  ;;  %s50_s24 = int_to_ptr.vmem [resolvable:$true] %s49_s24  ;;  %s64_s25 = int_to_ptr.vmem [resolvable:$true] %s63_s25 }
  0x1d   :  { %s1728_s26 = scalar_lea.vmem %s50_s24, 256  ;;  %p1733_p11 = scmp.lt.s32.totalorder %s50_s24, %s50_s24 }
  0x1e   :  { %p1729_p10 = scmp.ne.s32.totalorder %s50_s24, %s1728_s26  ;;  %p1734_p12 = scmp.lt.s32.totalorder %s1728_s26, %s1728_s26 }
  0x20   :  { %p1735_p13 = por %p1734_p12, %p1733_p11 }
  0x22   :  { %p1736_p0 = pnand %p1735_p13, %p1729_p10 }
  0x24   :  { %1739 = shalt.err (!%p1736_p0)
}
  0x25   :  { %55 = dma.hbm_to_vmem [thread:$0]  %s2099_s3, 256, %s50_s24, [#allocation6], %s1789_s12, %s1789_s12, %s1790_s13  }
  0x26   :  { %s1748_s0 = scalar_lea.vmem %s64_s25, 256  ;;  %p1753_p2 = scmp.lt.s32.totalorder %s64_s25, %s64_s25 }
  0x27   :  { %p1749_p1 = scmp.ne.s32.totalorder %s64_s25, %s1748_s0  ;;  %p1754_p3 = scmp.lt.s32.totalorder %s1748_s0, %s1748_s0 }
  0x29   :  { %p1755_p4 = por %p1754_p3, %p1753_p2 }
  0x2b   :  { %p1756_p5 = pnand %p1755_p4, %p1749_p1 }
  0x2d   :  { %1759 = shalt.err (!%p1756_p5)
}
  0x2e   :  { %69 = dma.hbm_to_vmem [thread:$0]  %s2101_s5, 256, %s64_s25, [#allocation9], %s1789_s12, %s1789_s12, %s1790_s13  }
  0x2f   :  { %1780 = dma.done.wait [#allocation3], 256  }
  0x30   :  { %1781 = vsyncadd [#allocation3], 4294967040 }
  0x31   :  { %1782 = dma.done.wait [#allocation6], 384  }
  0x32   :  { %1783 = vsyncadd [#allocation6], 4294966912 }
  0x33   :  { %1784 = dma.done.wait [#allocation9], 256  }
  0x34   :  { %1785 = vsyncadd [#allocation9], 4294967040  ;;  %v1796_v0 = vmov 0.0   ;;  %vm1797_vm0 = vmmov 0   ;;  %v1610_v1 = vld [vmem:[#allocation7 + $0x8] sm:$0xff]   ;;  %v1611_v2 = vld [vmem:[#allocation7] sm:$0xff]  }
  0x35   :  { %1471 = vmatprep.subr.bf16.mxu0 %v1796_v0  ;;  %1475 = vmatprep.mubr.msk.bf16.mxu0 %vm1797_vm0, %v1796_v0  ;;  %v89_v3 = vld [vmem:[#allocation2] sm:$0xff]  ;;  %v90_v4 = vld [vmem:[#allocation2 + $0x8] sm:$0xff]  ;;  %v1614_v6 = vld [vmem:[#allocation8 + $0x8] sm:$0xff]   ;;  %vm122_vm1 = vcmask 261120   ;;  %vm246_vm2 = vcmask 130048   ;;  %vm301_vm3 = vcmask 64512  }
  0x36   :  { %1479 = vmatprep.subr.bf16.mxu1 %v1796_v0  ;;  %1483 = vmatprep.mubr.msk.bf16.mxu1 %vm1797_vm0, %v1796_v0  ;;  %v91_v5 = vpack.c.bf16 %v90_v4, %v89_v3  ;;  %v1612_v7 = vld [vmem:[%s2103_s7] sm:$0xff]   ;;  %v1615_v8 = vld [vmem:[#allocation8] sm:$0xff]   ;;  %v1613_v9 = vld [vmem:[#allocation5] sm:$0xff]   ;;  %s1798_s14 = smov 120   ;;  %vm452_vm4 = vcmask 1043456   ;;  %vm436_vm9 = vcmask 60416  }
  0x37   :  { %1472 = vmatpush3.bf16.msra.mxu0 %v1610_v1  ;;  %1480 = vmatpush3.bf16.msra.mxu1 %v1614_v6  ;;  %v98_v10 = vpack.c.bf16 %v1613_v9, %v1613_v9  ;;  %v1394_v11 = vld [vmem:[%s2100_s4] ss:$0 sm:$0xff]  ;;  %s1800_s18 = smov 104   ;;  %s1801_s19 = smov 16  }
  0x38   :  { %1473 = vmatprep.subr.bf16.mxu0 %v1796_v0  ;;  %1481 = vmatprep.subr.bf16.mxu1 %v1796_v0  ;;  %v1398_v16 = vld [vmem:[%s2102_s6] ss:$0 sm:$0xff]  ;;  %s1805_s21 = smov 32   ;;  %s1806_s22 = smov 96  }
  0x39   :  { %v1402_v22 = vld [vmem:[%s2104_s8] ss:$0 sm:$0xff]  ;;  %s1807_s23 = smov [#allocation10]  }
  0x3a   :  { %v1956_v9 = vld [vmem:[%s2098_s2] ss:$0 sm:$0xff]  ;;  %s1380_s24 = sshll.u32 %s1807_s23, 4  ;;  %s1381_s24 = int_to_ptr.vmem [resolvable:$true] %s1380_s24 }
  0x3b   :  { %1474 = vmatpush3.bf16.msra.mxu0 %v1611_v2  ;;  %1482 = vmatpush3.bf16.msra.mxu1 %v1615_v8  ;;  %p1765_p7 = scmp.lt.s32.totalorder %s1381_s24, %s1381_s24 }
  0x3c   :  { %1487 = vmatprep.subr.bf16.mxu0 %v1796_v0  ;;  %1493 = vmatprep.subr.bf16.mxu1 %v1796_v0 }
  0x3e   :  { %1476 = vmatmul.mubr.msk.bf16.vlgmr.msra.gmra.mxu0 %vm122_vm1, %v91_v5  ;;  %1484 = vmatmul.mubr.msk.bf16.vlgmr.msra.gmra.mxu1 %vm122_vm1, %v91_v5 }
  0x3f   :  { %1488 = vmatpush3.bf16.msra.mxu0 %v1612_v7  ;;  %1489 = vmatprep.mubr.msk.bf16.mxu0 %vm1797_vm0, %v1796_v0 }
  0x40   :  { %1499 = vmatprep.subr.bf16.mxu0 %v1796_v0  ;;  %1495 = vmatprep.mubr.msk.bf16.mxu1 %vm1797_vm0, %v1796_v0 }
  0x46   :  { %1490 = vmatmul.mubr.msk.bf16.vlgmr.msra.gmra.mxu0 %vm246_vm2, %v98_v10 }
  0x47   :  { %1501 = vmatprep.mubr.msk.bf16.mxu0 %vm1797_vm0, %v1796_v0 }
  0xfe   :  { %v160_v12 = vpop.f32.mrf.mxu0  ;;  %v224_v20 = vpop.f32.mrf.mxu1 }
  0xff   :  { %v161_v13 = vadd.f32 %v1394_v11, %v160_v12  ;;  %v225_v23 = vadd.f32 %v1398_v16, %v224_v20  ;;  %v1962_v12 = vld [vmem:[%s2098_s2 + $0x1] ss:$0 sm:$0xff]  ;;  %s1799_s2 = smov 112  }
 0x100   :  { %v1477_v14 = vpop.f32.mrf.mxu0  ;;  %v1485_v25 = vpop.f32.mrf.mxu1 }
 0x101   :  { %v1907_v15 = vpack.c.bf16 %v161_v13, %v161_v13  ;;  %v1922_v27 = vpack.c.bf16 %v225_v23, %v225_v23 }
 0x102   :  { %v163_v17 = vpop.f32.mrf.mxu0  ;;  %v227_v30 = vpop.f32.mrf.mxu1 }
 0x103   :  { %v164_v18 = vadd.f32 %v1394_v11, %v163_v17  ;;  %546 = vrot.lane.b32.xlu1 %v1907_v15, %s1798_s14  ;;  %v306_v19 = vsel %vm301_vm3, %v1907_v15, 0  ;;  %v228_v32 = vadd.f32 %v1398_v16, %v227_v30  ;;  %v454_v36 = vsel %vm452_vm4, %v1922_v27, 0 }
 0x104   :  { %v1478_v21 = vpop.f32.mrf.mxu0  ;;  %1494 = vmatpush3.bf16.xpose.msra.mxu1 %v306_v19  ;;  %v1486_v35 = vpop.f32.mrf.mxu1 }
 0x105   :  { %v1919_v24 = vpack.c.bf16 %v164_v18, %v164_v18  ;;  %1505 = vmatprep.subr.bf16.mxu1 %v1796_v0  ;;  %v1933_v38 = vpack.c.bf16 %v228_v32, %v228_v32 }
 0x106   :  { %v284_v26 = vpop.f32.mrf.mxu0 }
 0x107   :  { %v285_v28 = vadd.f32 %v1402_v22, %v284_v26  ;;  %598 = vrot.lane.b32.xlu1 %v1919_v24, %s1798_s14  ;;  %v352_v29 = vsel %vm301_vm3, %v1919_v24, 0  ;;  %v500_v41 = vsel %vm452_vm4, %v1933_v38, 0 }
 0x108   :  { %v1491_v31 = vpop.f32.mrf.mxu0  ;;  %1500 = vmatpush3.bf16.xpose.msra.mxu0 %v352_v29 }
 0x109   :  { %v295_v33 = vcombine.high %v285_v28, %v285_v28  ;;  %v1928_v34 = vpack.c.bf16 %v285_v28, %v285_v28  ;;  %1511 = vmatprep.subr.bf16.mxu0 %v1796_v0 }
 0x10a   :  { %v287_v37 = vpop.f32.mrf.mxu0 }
 0x10b   :  { %v1935_v39 = vpack.c.bf16 %v295_v33, %v295_v33  ;;  %1496 = vmatmul.mubr.msk.bf16.vlgmr.msra.gmra.mxu1 %vm301_vm3, %v1928_v34 }
 0x10c   :  { %v1492_v40 = vpop.f32.mrf.mxu0  ;;  %1506 = vmatpush3.bf16.msra.mxu1 %v454_v36  ;;  %1507 = vmatprep.mubr.msk.bf16.mxu1 %vm1797_vm0, %v1796_v0 }
 0x10d   :  { %595 = vrot.lane.b32.xlu1 %v1935_v39, %s1798_s14  ;;  %1517 = vmatprep.subr.bf16.mxu1 %v1796_v0 }
 0x10f   :  { %1502 = vmatmul.mubr.msk.bf16.vlgmr.msra.gmra.mxu0 %vm301_vm3, %v1935_v39 }
 0x110   :  { %1512 = vmatpush3.bf16.msra.mxu0 %v500_v41  ;;  %1513 = vmatprep.mubr.msk.bf16.mxu0 %vm1797_vm0, %v1796_v0 }
 0x111   :  { %689 = vrot.lane.b32.xlu1 %v1922_v27, %s1798_s14  ;;  %1523 = vmatprep.subr.bf16.mxu0 %v1796_v0 }
 0x175   :  { %v547_v20 = vpop.permute.xlu1 %546 }
 0x176   :  { %v552_v28 = vsel %vm301_vm3, %v547_v20, 0 }
 0x179   :  { %v599_v23 = vpop.permute.xlu1 %598 }
 0x17a   :  { %v604_v32 = vsel %vm301_vm3, %v599_v23, 0 }
 0x17f   :  { %v596_v30 = vpop.permute.xlu1 %595 }
 0x183   :  { %v690_v33 = vpop.permute.xlu1 %689 }
 0x184   :  { %v695_v36 = vsel %vm452_vm4, %v690_v33, 0 }
 0x1cb   :  { %v342_v42 = vpop.f32.mrf.mxu1 }
 0x1cc   :  { %v1407_v43 = vadd.f32 50.0, %v342_v42  ;;  %v402_v44 = vsub.f32 50.0, %v342_v42  ;;  %vm412_vm5 = vcmp.gt.f32.partialorder %v342_v42, 50.0  ;;  %vm410_vm6 = vcmp.lt.f32.partialorder %v342_v42, -50.0 }
 0x1cd   :  { %v1497_v45 = vpop.f32.mrf.mxu1 }
 0x1ce   :  { %v396_v46 = vmul.f32 1.442695, %v1407_v43  ;;  %v404_v47 = vmul.f32 1.442695, %v402_v44 }
 0x1cf   :  { %v345_v48 = vpop.f32.mrf.mxu1  ;;  %v388_v49 = vpop.f32.mrf.mxu0 }
 0x1d0   :  { %1616 = vpow2.f32 %v396_v46  ;;  %v1408_v50 = vadd.f32 50.0, %v388_v49  ;;  %v403_v51 = vsub.f32 50.0, %v388_v49  ;;  %vm413_vm7 = vcmp.gt.f32.partialorder %v388_v49, 50.0 }
 0x1d1   :  { %1618 = vpow2.f32 %v404_v47  ;;  %v1498_v52 = vpop.f32.mrf.mxu1  ;;  %v1503_v53 = vpop.f32.mrf.mxu0  ;;  %vm411_vm8 = vcmp.lt.f32.partialorder %v388_v49, -50.0 }
 0x1d2   :  { %v398_v54 = vmul.f32 1.442695, %v1408_v50  ;;  %v406_v55 = vmul.f32 1.442695, %v403_v51 }
 0x1d3   :  { %v391_v56 = vpop.f32.mrf.mxu0 }
 0x1d4   :  { %1620 = vpow2.f32 %v398_v54 }
 0x1d5   :  { %1622 = vpow2.f32 %v406_v55  ;;  %v1504_v57 = vpop.f32.mrf.mxu0 }
 0x1dd   :  { %v1617_v58 = vpop.eup %1616 }
 0x1de   :  { %v1619_v59 = vpop.eup %1618  ;;  %v400_v60 = vadd.f32 -51.0, %v1617_v58 }
 0x1df   :  { %v408_v61 = vsub.f32 51.0, %v1619_v59 }
 0x1e1   :  { %v1621_v62 = vpop.eup %1620  ;;  %v414_v63 = vsel %vm412_vm5, %v408_v61, %v342_v42 }
 0x1e2   :  { %v1623_v1 = vpop.eup %1622  ;;  %v416_v2 = vsel %vm410_vm6, %v400_v60, %v414_v63  ;;  %v401_v3 = vadd.f32 -51.0, %v1621_v62 }
 0x1e3   :  { %v418_v4 = vmul.f32 1.442695, %v416_v2  ;;  %v409_v5 = vsub.f32 51.0, %v1623_v1 }
 0x1e5   :  { %1624 = vpow2.f32 %v418_v4  ;;  %v415_v6 = vsel %vm413_vm7, %v409_v5, %v388_v49 }
 0x1e6   :  { %v417_v7 = vsel %vm411_vm8, %v401_v3, %v415_v6 }
 0x1e7   :  { %v420_v8 = vmul.f32 1.442695, %v417_v7 }
 0x1e9   :  { %1626 = vpow2.f32 %v420_v8 }
 0x1f2   :  { %v1625_v10 = vpop.eup %1624 }
 0x1f3   :  { %v434_v11 = vmul.f32 %v1625_v10, %v1956_v9 }
 0x1f5   :  { %v437_v13 = vsel %vm436_vm9, %v434_v11, 0.0 }
 0x1f6   :  { %v1627_v14 = vpop.eup %1626  ;;  %438 = vadd.xlane.f32.xlu0 %v437_v13 }
 0x1f7   :  { %v435_v16 = vmul.f32 %v1627_v14, %v1962_v12 }
 0x1f9   :  { %v440_v17 = vsel %vm436_vm9, %v435_v16, 0.0 }
 0x1fa   :  { %441 = vadd.xlane.f32.xlu0 %v440_v17 }
 0x210   :  { %543 = vrot.lane.b32.xlu0 %v1928_v34, %s1798_s14 }
 0x27f   :  { %v439_v18 = vpop.xlane.xlu0 %438 }
 0x280   :  { %1628 = vrcp.f32 %v439_v18 }
 0x283   :  { %v442_v19 = vpop.xlane.xlu0 %441 }
 0x284   :  { %1630 = vrcp.f32 %v442_v19 }
 0x287   :  { %v544_v35 = vpop.permute.xlu0 %543 }
 0x28d   :  { %v1629_v21 = vpop.eup %1628 }
 0x28e   :  { %v445_v22 = vmul.f32 %v1629_v21, %v434_v11 }
 0x290   :  { %v447_v25 = vpack.c.bf16 %v445_v22, %v445_v22 }
 0x291   :  { %v1631_v26 = vpop.eup %1630 }
 0x292   :  { %1508 = vmatmul.mubr.msk.bf16.vlgmr.msra.gmra.mxu1 %vm301_vm3, %v447_v25  ;;  %v446_v29 = vmul.f32 %v1631_v26, %v435_v16 }
 0x293   :  { %1518 = vmatpush3.bf16.xpose.msra.mxu1 %v552_v28  ;;  %1519 = vmatprep.mubr.msk.bf16.mxu1 %vm1797_vm0, %v1796_v0 }
 0x294   :  { %v448_v31 = vpack.c.bf16 %v446_v29, %v446_v29  ;;  %1529 = vmatprep.subr.bf16.mxu1 %v1796_v0 }
 0x296   :  { %1514 = vmatmul.mubr.msk.bf16.vlgmr.msra.gmra.mxu0 %vm301_vm3, %v448_v31 }
 0x297   :  { %1524 = vmatpush3.bf16.xpose.msra.mxu0 %v604_v32  ;;  %1525 = vmatprep.mubr.msk.bf16.mxu0 %vm1797_vm0, %v1796_v0 }
 0x298   :  { %1535 = vmatprep.subr.bf16.mxu0 %v1796_v0 }
 0x29a   :  { %1520 = vmatmul.mubr.msk.bf16.vlgmr.msra.gmra.mxu1 %vm301_vm3, %v544_v35 }
 0x29b   :  { %1530 = vmatpush3.bf16.msra.mxu1 %v695_v36  ;;  %1531 = vmatprep.mubr.msk.bf16.mxu1 %vm1797_vm0, %v1796_v0 }
 0x29c   :  { %1541 = vmatprep.subr.bf16.mxu1 %v1796_v0 }
 0x29e   :  { %1526 = vmatmul.mubr.msk.bf16.vlgmr.msra.gmra.mxu0 %vm301_vm3, %v596_v30 }
 0x29f   :  { %1537 = vmatprep.mubr.msk.bf16.mxu0 %vm1797_vm0, %v1796_v0 }
 0x352   :  { %v1987_v37 = vpop.f32.mrf.mxu1 }
 0x354   :  { %v1509_v40 = vpop.f32.mrf.mxu1 }
 0x356   :  { %v493_v41 = vpop.f32.mrf.mxu1  ;;  %v1989_v42 = vpop.f32.mrf.mxu0 }
 0x358   :  { %v1510_v43 = vpop.f32.mrf.mxu1  ;;  %v1515_v44 = vpop.f32.mrf.mxu0 }
 0x35a   :  { %v539_v45 = vpop.f32.mrf.mxu0  ;;  %v588_v46 = vpop.f32.mrf.mxu1 }
 0x35b   :  { %v1415_v47 = vadd.f32 50.0, %v588_v46  ;;  %v654_v48 = vsub.f32 50.0, %v588_v46  ;;  %vm664_vm10 = vcmp.gt.f32.partialorder %v588_v46, 50.0  ;;  %vm662_vm11 = vcmp.lt.f32.partialorder %v588_v46, -50.0 }
 0x35c   :  { %v1516_v49 = vpop.f32.mrf.mxu0  ;;  %v1521_v50 = vpop.f32.mrf.mxu1 }
 0x35d   :  { %v648_v51 = vmul.f32 1.442695, %v1415_v47  ;;  %v656_v52 = vmul.f32 1.442695, %v654_v48 }
 0x35e   :  { %v591_v53 = vpop.f32.mrf.mxu1  ;;  %v640_v54 = vpop.f32.mrf.mxu0 }
 0x35f   :  { %1632 = vpow2.f32 %v648_v51  ;;  %v1416_v55 = vadd.f32 50.0, %v640_v54  ;;  %v655_v56 = vsub.f32 50.0, %v640_v54  ;;  %vm665_vm12 = vcmp.gt.f32.partialorder %v640_v54, 50.0 }
 0x360   :  { %1634 = vpow2.f32 %v656_v52  ;;  %v1522_v57 = vpop.f32.mrf.mxu1  ;;  %v1527_v58 = vpop.f32.mrf.mxu0  ;;  %vm663_vm13 = vcmp.lt.f32.partialorder %v640_v54, -50.0 }
 0x361   :  { %v650_v59 = vmul.f32 1.442695, %v1416_v55  ;;  %v658_v60 = vmul.f32 1.442695, %v655_v56 }
 0x362   :  { %v643_v61 = vpop.f32.mrf.mxu0 }
 0x363   :  { %1636 = vpow2.f32 %v650_v59 }
 0x364   :  { %1638 = vpow2.f32 %v658_v60  ;;  %v1528_v62 = vpop.f32.mrf.mxu0 }
 0x36c   :  { %v1633_v63 = vpop.eup %1632 }
 0x36d   :  { %v1635_v1 = vpop.eup %1634  ;;  %v652_v2 = vadd.f32 -51.0, %v1633_v63 }
 0x36e   :  { %v660_v3 = vsub.f32 51.0, %v1635_v1 }
 0x370   :  { %v1637_v4 = vpop.eup %1636  ;;  %v666_v5 = vsel %vm664_vm10, %v660_v3, %v588_v46 }
 0x371   :  { %v1639_v6 = vpop.eup %1638  ;;  %v668_v7 = vsel %vm662_vm11, %v652_v2, %v666_v5  ;;  %v653_v8 = vadd.f32 -51.0, %v1637_v4 }
 0x372   :  { %v670_v10 = vmul.f32 1.442695, %v668_v7  ;;  %v661_v11 = vsub.f32 51.0, %v1639_v6 }
 0x374   :  { %1640 = vpow2.f32 %v670_v10  ;;  %v667_v13 = vsel %vm665_vm12, %v661_v11, %v640_v54 }
 0x375   :  { %v669_v14 = vsel %vm663_vm13, %v653_v8, %v667_v13 }
 0x376   :  { %v672_v16 = vmul.f32 1.442695, %v669_v14 }
 0x378   :  { %1642 = vpow2.f32 %v672_v16 }
 0x381   :  { %v1641_v17 = vpop.eup %1640 }
 0x382   :  { %v674_v18 = vmul.f32 %v1641_v17, %v1956_v9 }
 0x384   :  { %v676_v19 = vsel %vm436_vm9, %v674_v18, 0.0 }
 0x385   :  { %v1643_v20 = vpop.eup %1642  ;;  %677 = vadd.xlane.f32.xlu1 %v676_v19 }
 0x386   :  { %v675_v21 = vmul.f32 %v1643_v20, %v1962_v12 }
 0x388   :  { %v679_v22 = vsel %vm436_vm9, %v675_v21, 0.0 }
 0x389   :  { %680 = vadd.xlane.f32.xlu0 %v679_v22 }
 0x396   :  { %788 = vrot.lane.b32.xlu1 %v1907_v15, %s1799_s2 }
 0x39a   :  { %838 = vrot.lane.b32.xlu1 %v1919_v24, %s1799_s2 }
 0x39e   :  { %786 = vrot.lane.b32.xlu1 %v1928_v34, %s1799_s2 }
 0x39f   :  { %738 = vrot.lane.b32.xlu0 %v1933_v38, %s1798_s14 }
 0x3a2   :  { %836 = vrot.lane.b32.xlu1 %v1935_v39, %s1799_s2 }
 0x3a3   :  { %928 = vrot.lane.b32.xlu0 %v1922_v27, %s1799_s2 }
 0x3a6   :  { %976 = vrot.lane.b32.xlu1 %v1933_v38, %s1799_s2 }
 0x40e   :  { %v678_v23 = vpop.xlane.xlu1 %677 }
 0x40f   :  { %1644 = vrcp.f32 %v678_v23 }
 0x412   :  { %v789_v25 = vpop.permute.xlu1 %788  ;;  %v681_v26 = vpop.xlane.xlu0 %680 }
 0x413   :  { %1646 = vrcp.f32 %v681_v26  ;;  %v794_v40 = vsel %vm301_vm3, %v789_v25, 0 }
 0x416   :  { %v739_v28 = vpop.permute.xlu0 %738  ;;  %v839_v30 = vpop.permute.xlu1 %838 }
 0x417   :  { %v744_v29 = vsel %vm452_vm4, %v739_v28, 0  ;;  %v844_v45 = vsel %vm301_vm3, %v839_v30, 0 }
 0x418   :  { %1536 = vmatpush3.bf16.msra.mxu0 %v744_v29 }
 0x419   :  { %1547 = vmatprep.subr.bf16.mxu0 %v1796_v0 }
 0x41a   :  { %v787_v33 = vpop.permute.xlu1 %786  ;;  %v929_v46 = vpop.permute.xlu0 %928 }
 0x41b   :  { %v934_v47 = vsel %vm452_vm4, %v929_v46, 0 }
 0x41c   :  { %v1645_v31 = vpop.eup %1644 }
 0x41d   :  { %v684_v32 = vmul.f32 %v1645_v31, %v674_v18 }
 0x41e   :  { %v837_v44 = vpop.permute.xlu1 %836 }
 0x41f   :  { %v686_v35 = vpack.c.bf16 %v684_v32, %v684_v32 }
 0x420   :  { %v1647_v36 = vpop.eup %1646 }
 0x421   :  { %1532 = vmatmul.mubr.msk.bf16.vlgmr.msra.gmra.mxu1 %vm301_vm3, %v686_v35  ;;  %v685_v41 = vmul.f32 %v1647_v36, %v675_v21 }
 0x422   :  { %1542 = vmatpush3.bf16.xpose.msra.mxu1 %v794_v40  ;;  %1543 = vmatprep.mubr.msk.bf16.mxu1 %vm1797_vm0, %v1796_v0  ;;  %v977_v48 = vpop.permute.xlu1 %976 }
 0x423   :  { %v687_v43 = vpack.c.bf16 %v685_v41, %v685_v41  ;;  %1553 = vmatprep.subr.bf16.mxu1 %v1796_v0  ;;  %v982_v49 = vsel %vm452_vm4, %v977_v48, 0 }
 0x425   :  { %1538 = vmatmul.mubr.msk.bf16.vlgmr.msra.gmra.mxu0 %vm301_vm3, %v687_v43 }
 0x426   :  { %1548 = vmatpush3.bf16.xpose.msra.mxu0 %v844_v45  ;;  %1549 = vmatprep.mubr.msk.bf16.mxu0 %vm1797_vm0, %v1796_v0 }
 0x427   :  { %1559 = vmatprep.subr.bf16.mxu0 %v1796_v0 }
 0x429   :  { %1544 = vmatmul.mubr.msk.bf16.vlgmr.msra.gmra.mxu1 %vm301_vm3, %v787_v33 }
 0x42a   :  { %1554 = vmatpush3.bf16.msra.mxu1 %v934_v47  ;;  %1555 = vmatprep.mubr.msk.bf16.mxu1 %vm1797_vm0, %v1796_v0 }
 0x42b   :  { %1565 = vmatprep.subr.bf16.mxu1 %v1796_v0 }
 0x42d   :  { %1550 = vmatmul.mubr.msk.bf16.vlgmr.msra.gmra.mxu0 %vm301_vm3, %v837_v44 }
 0x42e   :  { %1560 = vmatpush3.bf16.msra.mxu0 %v982_v49  ;;  %1561 = vmatprep.mubr.msk.bf16.mxu0 %vm1797_vm0, %v1796_v0 }
 0x42f   :  { %1571 = vmatprep.subr.bf16.mxu0 %v1796_v0 }
 0x4e1   :  { %v2025_v50 = vpop.f32.mrf.mxu1 }
 0x4e3   :  { %v1533_v51 = vpop.f32.mrf.mxu1 }
 0x4e5   :  { %v734_v52 = vpop.f32.mrf.mxu1  ;;  %v2027_v53 = vpop.f32.mrf.mxu0 }
 0x4e7   :  { %v1534_v54 = vpop.f32.mrf.mxu1  ;;  %v1539_v55 = vpop.f32.mrf.mxu0 }
 0x4e9   :  { %v783_v56 = vpop.f32.mrf.mxu0  ;;  %v830_v57 = vpop.f32.mrf.mxu1 }
 0x4ea   :  { %v1421_v58 = vadd.f32 50.0, %v830_v57  ;;  %v894_v59 = vsub.f32 50.0, %v830_v57  ;;  %vm904_vm14 = vcmp.gt.f32.partialorder %v830_v57, 50.0  ;;  %vm902_vm15 = vcmp.lt.f32.partialorder %v830_v57, -50.0 }
 0x4eb   :  { %v1540_v60 = vpop.f32.mrf.mxu0  ;;  %v1545_v61 = vpop.f32.mrf.mxu1 }
 0x4ec   :  { %v888_v62 = vmul.f32 1.442695, %v1421_v58  ;;  %v896_v63 = vmul.f32 1.442695, %v894_v59 }
 0x4ed   :  { %v833_v1 = vpop.f32.mrf.mxu1  ;;  %v880_v2 = vpop.f32.mrf.mxu0 }
 0x4ee   :  { %1648 = vpow2.f32 %v888_v62  ;;  %v1422_v3 = vadd.f32 50.0, %v880_v2  ;;  %v895_v4 = vsub.f32 50.0, %v880_v2  ;;  %vm905_vm5 = vcmp.gt.f32.partialorder %v880_v2, 50.0 }
 0x4ef   :  { %1650 = vpow2.f32 %v896_v63  ;;  %v1546_v5 = vpop.f32.mrf.mxu1  ;;  %v1551_v6 = vpop.f32.mrf.mxu0  ;;  %vm903_vm6 = vcmp.lt.f32.partialorder %v880_v2, -50.0 }
 0x4f0   :  { %v890_v7 = vmul.f32 1.442695, %v1422_v3  ;;  %v898_v8 = vmul.f32 1.442695, %v895_v4 }
 0x4f1   :  { %v883_v10 = vpop.f32.mrf.mxu0 }
 0x4f2   :  { %1652 = vpow2.f32 %v890_v7 }
 0x4f3   :  { %1654 = vpow2.f32 %v898_v8  ;;  %v1552_v11 = vpop.f32.mrf.mxu0 }
 0x4fb   :  { %v1649_v13 = vpop.eup %1648 }
 0x4fc   :  { %v1651_v14 = vpop.eup %1650  ;;  %v892_v16 = vadd.f32 -51.0, %v1649_v13 }
 0x4fd   :  { %v900_v17 = vsub.f32 51.0, %v1651_v14 }
 0x4ff   :  { %v1653_v18 = vpop.eup %1652  ;;  %v906_v19 = vsel %vm904_vm14, %v900_v17, %v830_v57 }
 0x500   :  { %v1655_v20 = vpop.eup %1654  ;;  %v908_v21 = vsel %vm902_vm15, %v892_v16, %v906_v19  ;;  %v893_v22 = vadd.f32 -51.0, %v1653_v18 }
 0x501   :  { %v910_v23 = vmul.f32 1.442695, %v908_v21  ;;  %v901_v25 = vsub.f32 51.0, %v1655_v20 }
 0x503   :  { %1656 = vpow2.f32 %v910_v23  ;;  %v907_v26 = vsel %vm905_vm5, %v901_v25, %v880_v2 }
 0x504   :  { %v909_v28 = vsel %vm903_vm6, %v893_v22, %v907_v26 }
 0x505   :  { %v912_v29 = vmul.f32 1.442695, %v909_v28 }
 0x507   :  { %1658 = vpow2.f32 %v912_v29 }
 0x510   :  { %v1657_v30 = vpop.eup %1656 }
 0x511   :  { %v914_v31 = vmul.f32 %v1657_v30, %v1956_v9 }
 0x513   :  { %v916_v32 = vsel %vm436_vm9, %v914_v31, 0.0 }
 0x514   :  { %v1659_v33 = vpop.eup %1658  ;;  %917 = vadd.xlane.f32.xlu1 %v916_v32 }
 0x515   :  { %v915_v35 = vmul.f32 %v1659_v33, %v1962_v12 }
 0x517   :  { %v919_v36 = vsel %vm436_vm9, %v915_v35, 0.0 }
 0x518   :  { %920 = vadd.xlane.f32.xlu0 %v919_v36 }
 0x525   :  { %1026 = vrot.lane.b32.xlu1 %v1907_v15, %s1800_s18 }
 0x529   :  { %1024 = vrot.lane.b32.xlu1 %v1928_v34, %s1800_s18 }
 0x52e   :  { %1076 = vrot.lane.b32.xlu0 %v1919_v24, %s1800_s18 }
 0x532   :  { %1074 = vrot.lane.b32.xlu0 %v1935_v39, %s1800_s18 }
 0x59d   :  { %v918_v40 = vpop.xlane.xlu1 %917 }
 0x59e   :  { %1660 = vrcp.f32 %v918_v40 }
 0x5a1   :  { %v921_v41 = vpop.xlane.xlu0 %920  ;;  %v1027_v45 = vpop.permute.xlu1 %1026 }
 0x5a2   :  { %1662 = vrcp.f32 %v921_v41  ;;  %v1032_v15 = vsel %vm301_vm3, %v1027_v45, 0 }
 0x5a5   :  { %v1077_v48 = vpop.permute.xlu0 %1076  ;;  %v1025_v49 = vpop.permute.xlu1 %1024 }
 0x5a6   :  { %v1082_v39 = vsel %vm301_vm3, %v1077_v48, 0 }
 0x5a9   :  { %v1075_v51 = vpop.permute.xlu0 %1074 }
 0x5ab   :  { %v1661_v43 = vpop.eup %1660 }
 0x5ac   :  { %v924_v44 = vmul.f32 %v1661_v43, %v914_v31 }
 0x5ae   :  { %v926_v46 = vpack.c.bf16 %v924_v44, %v924_v44 }
 0x5af   :  { %v1663_v47 = vpop.eup %1662 }
 0x5b0   :  { %1556 = vmatmul.mubr.msk.bf16.vlgmr.msra.gmra.mxu1 %vm301_vm3, %v926_v46  ;;  %v925_v34 = vmul.f32 %v1663_v47, %v915_v35 }
 0x5b1   :  { %1566 = vmatpush3.bf16.xpose.msra.mxu1 %v1032_v15  ;;  %1567 = vmatprep.mubr.msk.bf16.mxu1 %vm1797_vm0, %v1796_v0 }
 0x5b2   :  { %v927_v24 = vpack.c.bf16 %v925_v34, %v925_v34  ;;  %1577 = vmatprep.subr.bf16.mxu1 %v1796_v0 }
 0x5b4   :  { %1562 = vmatmul.mubr.msk.bf16.vlgmr.msra.gmra.mxu0 %vm301_vm3, %v927_v24 }
 0x5b5   :  { %1572 = vmatpush3.bf16.xpose.msra.mxu0 %v1082_v39  ;;  %1573 = vmatprep.mubr.msk.bf16.mxu0 %vm1797_vm0, %v1796_v0 }
 0x5b6   :  { %1583 = vmatprep.subr.bf16.mxu0 %v1796_v0 }
 0x5b8   :  { %1568 = vmatmul.mubr.msk.bf16.vlgmr.msra.gmra.mxu1 %vm301_vm3, %v1025_v49 }
 0x5b9   :  { %1579 = vmatprep.mubr.msk.bf16.mxu1 %vm1797_vm0, %v1796_v0 }
 0x5bc   :  { %1574 = vmatmul.mubr.msk.bf16.vlgmr.msra.gmra.mxu0 %vm301_vm3, %v1075_v51 }
 0x5bd   :  { %1585 = vmatprep.mubr.msk.bf16.mxu0 %vm1797_vm0, %v1796_v0 }
 0x670   :  { %v970_v52 = vpop.f32.mrf.mxu1 }
 0x672   :  { %v1557_v54 = vpop.f32.mrf.mxu1 }
 0x674   :  { %v973_v55 = vpop.f32.mrf.mxu1  ;;  %v1018_v56 = vpop.f32.mrf.mxu0 }
 0x676   :  { %v1558_v57 = vpop.f32.mrf.mxu1  ;;  %v1563_v58 = vpop.f32.mrf.mxu0 }
 0x677   :  { %v1803_v57 = vmov 1983009808  }
 0x678   :  { %v1021_v59 = vpop.f32.mrf.mxu0  ;;  %v1068_v60 = vpop.f32.mrf.mxu1  ;;  %v1293_v58 = vunpack.c.l.s4 %v1803_v57 }
 0x679   :  { %v1427_v61 = vadd.f32 50.0, %v1068_v60  ;;  %v1132_v62 = vsub.f32 50.0, %v1068_v60  ;;  %vm1142_vm0 = vcmp.gt.f32.partialorder %v1068_v60, 50.0  ;;  %vm1140_vm7 = vcmp.lt.f32.partialorder %v1068_v60, -50.0 }
 0x67a   :  { %v1564_v63 = vpop.f32.mrf.mxu0  ;;  %v1569_v1 = vpop.f32.mrf.mxu1  ;;  %v1295_v59 = vlaneseq }
 0x67b   :  { %v1126_v2 = vmul.f32 1.442695, %v1427_v61  ;;  %v1134_v3 = vmul.f32 1.442695, %v1132_v62  ;;  %v1294_v63 = vunpack.c.0.s8 %v1293_v58 }
 0x67c   :  { %v1071_v4 = vpop.f32.mrf.mxu1  ;;  %v1118_v5 = vpop.f32.mrf.mxu0  ;;  %v1296_v1 = vshrl.u32 %v1295_v59, 7 }
 0x67d   :  { %1664 = vpow2.f32 %v1126_v2  ;;  %v1428_v6 = vadd.f32 50.0, %v1118_v5  ;;  %v1133_v7 = vsub.f32 50.0, %v1118_v5  ;;  %vm1143_vm8 = vcmp.gt.f32.partialorder %v1118_v5, 50.0 }
 0x67e   :  { %1666 = vpow2.f32 %v1134_v3  ;;  %v1570_v8 = vpop.f32.mrf.mxu1  ;;  %v1575_v10 = vpop.f32.mrf.mxu0  ;;  %vm1141_vm10 = vcmp.lt.f32.partialorder %v1118_v5, -50.0  ;;  %v1297_v4 = vsub.s32 %v1294_v63, %v1296_v1 }
 0x67f   :  { %v1128_v11 = vmul.f32 1.442695, %v1428_v6  ;;  %v1136_v13 = vmul.f32 1.442695, %v1133_v7 }
 0x680   :  { %v1121_v14 = vpop.f32.mrf.mxu0 }
 0x681   :  { %1668 = vpow2.f32 %v1128_v11 }
 0x682   :  { %1670 = vpow2.f32 %v1136_v13  ;;  %v1576_v16 = vpop.f32.mrf.mxu0 }
 0x68a   :  { %v1665_v17 = vpop.eup %1664 }
 0x68b   :  { %v1667_v18 = vpop.eup %1666  ;;  %v1130_v19 = vadd.f32 -51.0, %v1665_v17 }
 0x68c   :  { %v1138_v20 = vsub.f32 51.0, %v1667_v18 }
 0x68e   :  { %v1669_v21 = vpop.eup %1668  ;;  %v1144_v22 = vsel %vm1142_vm0, %v1138_v20, %v1068_v60  ;;  %v1804_v60 = vmov 1934713408  }
 0x68f   :  { %v1671_v23 = vpop.eup %1670  ;;  %v1146_v25 = vsel %vm1140_vm7, %v1130_v19, %v1144_v22  ;;  %v1131_v26 = vadd.f32 -51.0, %v1669_v21  ;;  %v1301_v61 = vunpack.c.l.s4 %v1804_v60 }
 0x690   :  { %v1148_v28 = vmul.f32 1.442695, %v1146_v25  ;;  %v1139_v29 = vsub.f32 51.0, %v1671_v23 }
 0x691   :  { %v1302_v3 = vunpack.c.0.s8 %v1301_v61 }
 0x692   :  { %1672 = vpow2.f32 %v1148_v28  ;;  %v1145_v30 = vsel %vm1143_vm8, %v1139_v29, %v1118_v5 }
 0x693   :  { %v1147_v31 = vsel %vm1141_vm10, %v1131_v26, %v1145_v30  ;;  %v1305_v8 = vsub.s32 %v1302_v3, %v1296_v1 }
 0x694   :  { %v1150_v32 = vmul.f32 1.442695, %v1147_v31 }
 0x696   :  { %1674 = vpow2.f32 %v1150_v32 }
 0x69f   :  { %v1673_v33 = vpop.eup %1672 }
 0x6a0   :  { %v1152_v35 = vmul.f32 %v1673_v33, %v1956_v9 }
 0x6a2   :  { %v1154_v36 = vsel %vm436_vm9, %v1152_v35, 0.0 }
 0x6a3   :  { %v1675_v40 = vpop.eup %1674  ;;  %1155 = vadd.xlane.f32.xlu1 %v1154_v36 }
 0x6a4   :  { %v1153_v41 = vmul.f32 %v1675_v40, %v1962_v12 }
 0x6a6   :  { %v1157_v43 = vsel %vm436_vm9, %v1153_v41, 0.0 }
 0x6a7   :  { %1158 = vadd.xlane.f32.xlu0 %v1157_v43 }
 0x6b4   :  { %1214 = vrot.lane.b32.xlu1 %v1933_v38, %s1800_s18 }
 0x6b8   :  { %1264 = vrot.lane.b32.xlu1 %v2025_v50, %s1793_s20 }
 0x6bc   :  { %1272 = vrot.lane.b32.xlu1 %v970_v52, %s1801_s19 }
 0x6bd   :  { %1166 = vrot.lane.b32.xlu0 %v1922_v27, %s1800_s18 }
 0x6c1   :  { %1266 = vrot.lane.b32.xlu0 %v2027_v53, %s1793_s20  ;;  %s1802_s20 = smov 24  }
 0x6c5   :  { %1274 = vrot.lane.b32.xlu0 %v1018_v56, %s1801_s19 }
 0x72c   :  { %v1156_v9 = vpop.xlane.xlu1 %1155 }
 0x72d   :  { %1676 = vrcp.f32 %v1156_v9 }
 0x730   :  { %v1215_v12 = vpop.permute.xlu1 %1214  ;;  %v1159_v44 = vpop.xlane.xlu0 %1158 }
 0x731   :  { %v1220_v38 = vsel %vm452_vm4, %v1215_v12, 0  ;;  %1678 = vrcp.f32 %v1159_v44 }
 0x732   :  { %1584 = vmatpush3.bf16.msra.mxu0 %v1220_v38 }
 0x734   :  { %v1167_v50 = vpop.permute.xlu0 %1166  ;;  %v1265_v56 = vpop.permute.xlu1 %1264 }
 0x735   :  { %v1172_v45 = vsel %vm452_vm4, %v1167_v50, 0  ;;  %vm1290_vm4 = vcmask 195584   ;;  %v1286_v5 = vsel %vm301_vm3, %v1987_v37, %v1265_v56 }
 0x736   :  { %1578 = vmatpush3.bf16.msra.mxu1 %v1172_v45 }
 0x738   :  { %v1267_v62 = vpop.permute.xlu0 %1266  ;;  %v1273_v2 = vpop.permute.xlu1 %1272 }
 0x739   :  { %v1288_v6 = vsel %vm246_vm2, %v1286_v5, %v1273_v2  ;;  %v1287_v14 = vsel %vm301_vm3, %v1989_v42, %v1267_v62 }
 0x73a   :  { %v1677_v46 = vpop.eup %1676 }
 0x73b   :  { %v1162_v47 = vmul.f32 %v1677_v46, %v1152_v35 }
 0x73c   :  { %v1275_v7 = vpop.permute.xlu0 %1274 }
 0x73d   :  { %v1164_v27 = vpack.c.bf16 %v1162_v47, %v1162_v47  ;;  %v1289_v16 = vsel %vm246_vm2, %v1287_v14, %v1275_v7  ;;  %vm1367_vm2 = vcmask 523264  }
 0x73e   :  { %v1679_v15 = vpop.eup %1678 }
 0x73f   :  { %1580 = vmatmul.mubr.msk.bf16.vlgmr.msra.gmra.mxu1 %vm301_vm3, %v1164_v27  ;;  %v1163_v53 = vmul.f32 %v1679_v15, %v1153_v41 }
 0x741   :  { %v1165_v34 = vpack.c.bf16 %v1163_v53, %v1163_v53 }
 0x743   :  { %1586 = vmatmul.mubr.msk.bf16.vlgmr.msra.gmra.mxu0 %vm301_vm3, %v1165_v34  ;;  %vm1370_vm3 = vcmask 785408  }
 0x7ff   :  { %v1208_v48 = vpop.f32.mrf.mxu1 }
 0x800   :  { %1280 = vrot.lane.b32.xlu1 %v1208_v48, %s1802_s20 }
 0x801   :  { %v1581_v24 = vpop.f32.mrf.mxu1 }
 0x803   :  { %v1211_v39 = vpop.f32.mrf.mxu1  ;;  %v1256_v49 = vpop.f32.mrf.mxu0 }
 0x804   :  { %1282 = vrot.lane.b32.xlu0 %v1256_v49, %s1802_s20 }
 0x805   :  { %v1582_v51 = vpop.f32.mrf.mxu1  ;;  %v1587_v52 = vpop.f32.mrf.mxu0 }
 0x807   :  { %v1259_v54 = vpop.f32.mrf.mxu0 }
 0x809   :  { %v1588_v55 = vpop.f32.mrf.mxu0 }
 0x872   :  { %v1281_v10 = vpop.permute.xlu1 %1280 }
 0x873   :  { %v1291_v11 = vsel %vm1290_vm4, %v1288_v6, %v1281_v10 }
 0x874   :  { %v1298_v13 = vrot.slane %v1291_v11, %v1297_v4 }
 0x876   :  { %v1306_v17 = vrot.slane %v1298_v13, %v1305_v8  ;;  %v1283_v18 = vpop.permute.xlu0 %1282  ;;  %v1299_v37 = vcombine.high %v1298_v13, %v1796_v0 }
 0x877   :  { %v1316_v19 = vsel %vm1290_vm4, %v1289_v16, %v1283_v18 }
 0x878   :  { %v1323_v20 = vrot.slane %v1316_v19, %v1297_v4  ;;  %v1314_v21 = vcombine.high %v1306_v17, %v1796_v0  ;;  %v1313_v23 = vrot.slane %v1299_v37, %v1305_v8 }
 0x87a   :  { %v1331_v22 = vrot.slane %v1323_v20, %v1305_v8  ;;  %1343 = vrot.lane.b32.xlu1 %v1314_v21, %s1805_s21  ;;  %v1324_v26 = vcombine.high %v1323_v20, %v1796_v0  ;;  %v1315_v42 = vcombine.high %v1313_v23, %v1796_v0 }
 0x87c   :  { %v1339_v25 = vcombine.high %v1331_v22, %v1796_v0  ;;  %v1338_v28 = vrot.slane %v1324_v26, %v1305_v8 }
 0x87e   :  { %1351 = vrot.lane.b32.xlu1 %v1313_v23, %s1789_s12  ;;  %1345 = vrot.lane.b32.xlu0 %v1339_v25, %s1805_s21  ;;  %v1340_v29 = vcombine.high %v1338_v28, %v1796_v0 }
 0x882   :  { %1359 = vrot.lane.b32.xlu1 %v1315_v42, %s1806_s22  ;;  %1353 = vrot.lane.b32.xlu0 %v1338_v28, %s1789_s12  ;;  %s1760_s12 = scalar_lea.vmem %s1381_s24, 32 }
 0x883   :  { %p1761_p6 = scmp.ne.s32.totalorder %s1381_s24, %s1760_s12  ;;  %p1766_p8 = scmp.lt.s32.totalorder %s1760_s12, %s1760_s12 }
 0x885   :  { %p1767_p9 = por %p1766_p8, %p1765_p7 }
 0x886   :  { %1361 = vrot.lane.b32.xlu0 %v1340_v29, %s1806_s22 }
 0x887   :  { %p1768_p10 = pnand %p1767_p9, %p1761_p6 }
 0x8ec   :  { %v1344_v30 = vpop.permute.xlu1 %1343 }
 0x8ed   :  { %v1365_v33 = vsel %vm122_vm1, %v1306_v17, %v1344_v30 }
 0x8f0   :  { %v1352_v31 = vpop.permute.xlu1 %1351  ;;  %v1346_v32 = vpop.permute.xlu0 %1345 }
 0x8f1   :  { %v1368_v35 = vsel %vm1367_vm2, %v1365_v33, %v1352_v31  ;;  %v1366_v43 = vsel %vm122_vm1, %v1331_v22, %v1346_v32 }
 0x8f4   :  { %v1360_v36 = vpop.permute.xlu1 %1359  ;;  %v1354_v40 = vpop.permute.xlu0 %1353 }
 0x8f5   :  { %v1371_v41 = vsel %vm1370_vm3, %v1368_v35, %v1360_v36  ;;  %v1369_v9 = vsel %vm1367_vm2, %v1366_v43, %v1354_v40 }
 0x8f6   :  { %1373 = vst [vmem:[#allocation10] sm:$0x1] %v1371_v41 }
 0x8f8   :  { %v1362_v12 = vpop.permute.xlu0 %1361 }
 0x8f9   :  { %v1372_v0 = vsel %vm1370_vm3, %v1369_v9, %v1362_v12 }
 0x8fa   :  { %1374 = vst [vmem:[#allocation10 + $0x1] sm:$0x1] %v1372_v0 }
 0x8fb   :  { %1771 = shalt.err (!%p1768_p10)
}
 0x8fc   :  { %s1808_s1 = smov 1  }
 0x8fd   :  { %1386 = dma.vmem_to_hbm [thread:$0]  %s1381_s24, 32, %s2105_s9, [#allocation4], %s1801_s19, %s1801_s19, %s1808_s1  }
 0x8fe   :  { %1786 = dma.done.wait [#allocation4], 32  }
 0x8ff   :  { %1787 = vsyncadd [#allocation4], 4294967264 }
 0x900   :  { %1390 = vsyncpa [#allocation3], 1 }
 0x901   :  { %1391 = vsyncpa [#allocation6], 1 }
 0x902   :  { %1392 = vsyncpa [#allocation9], 1 }
 0x903   :  { %1393 = vsyncpa [#allocation4], 1 }

// kernel: tpu_custom_call.1
= control target key start
LH: loop header
LB: loop body
LE: loop exit
PB: predicated region body
PF: predicated region fallthrough
CT: control target
= control target key end

     0   :  { %14 = vsyncpa [#allocation3], 0  ;;  %s2096_s0 = inlined_call_operand.hbm [shape: f32[2,8,32], index: 0, kind: input, shape index: {}]   ;;  %s2097_s1 = inlined_call_operand.hbm [shape: f32[2,4,16], index: 1, kind: input, shape index: {}]   ;;  %s2098_s2 = inlined_call_operand.vmem [shape: f32[2,1,8], index: 2, kind: input, shape index: {}]   ;;  %s2099_s3 = inlined_call_operand.hbm [shape: bf16[32,32], index: 3, kind: input, shape index: {}]   ;;  %s2100_s4 = inlined_call_operand.vmem [shape: f32[1,32], index: 4, kind: input, shape index: {}]   ;;  %s2101_s5 = inlined_call_operand.hbm [shape: bf16[32,32], index: 5, kind: input, shape index: {}]   ;;  %s2102_s6 = inlined_call_operand.vmem [shape: f32[1,32], index: 6, kind: input, shape index: {}]   ;;  %s2103_s7 = inlined_call_operand.vmem [shape: bf16[16,32], index: 7, kind: input, shape index: {}]   ;;  %s2104_s8 = inlined_call_operand.vmem [shape: f32[1,32], index: 8, kind: input, shape index: {}]   ;;  %s2105_s9 = inlined_call_operand.hbm [shape: f32[2,1,128], index: 9, kind: output, shape index: {}]  }
   0x1   :  { %15 = vsyncpa [#allocation6], 0 }
   0x2   :  { %16 = vsyncpa [#allocation9], 0 }
   0x3   :  { %17 = vsyncpa [#allocation4], 0  ;;  %s1788_s30 = smov [#allocation5]  }
   0x4   :  { %s35_s10 = sshll.u32 %s1788_s30, 4  ;;  %s36_s10 = int_to_ptr.vmem [resolvable:$true] %s35_s10 }
   0x5   :  { %s1688_s11 = scalar_lea.vmem %s36_s10, 128  ;;  %p1693_p1 = scmp.lt.s32.totalorder %s36_s10, %s36_s10 }
   0x6   :  { %p1689_p0 = scmp.ne.s32.totalorder %s36_s10, %s1688_s11  ;;  %p1694_p2 = scmp.lt.s32.totalorder %s1688_s11, %s1688_s11 }
   0x8   :  { %p1695_p3 = por %p1694_p2, %p1693_p1 }
   0xa   :  { %p1696_p4 = pnand %p1695_p3, %p1689_p0 }
   0xc   :  { %1699 = shalt.err (!%p1696_p4)
}
   0xd   :  { %s1789_s12 = smov 64   ;;  %s1790_s13 = smov 4  }
   0xe   :  { %41 = dma.hbm_to_vmem [thread:$0]  %s2097_s1, 128, %s36_s10, [#allocation6], %s1789_s12, %s1789_s12, %s1790_s13  }
   0xf   :  { %s1791_s16 = smov [#allocation2]  }
  0x10   :  { %s23_s17 = sshll.u32 %s1791_s16, 4  ;;  %s24_s17 = int_to_ptr.vmem [resolvable:$true] %s23_s17 }
  0x11   :  { %s1708_s18 = scalar_lea.vmem %s24_s17, 256  ;;  %p1713_p6 = scmp.lt.s32.totalorder %s24_s17, %s24_s17 }
  0x12   :  { %p1709_p5 = scmp.ne.s32.totalorder %s24_s17, %s1708_s18  ;;  %p1714_p7 = scmp.lt.s32.totalorder %s1708_s18, %s1708_s18 }
  0x14   :  { %p1715_p8 = por %p1714_p7, %p1713_p6 }
  0x16   :  { %p1716_p9 = pnand %p1715_p8, %p1709_p5 }
  0x18   :  { %1719 = shalt.err (!%p1716_p9)
}
  0x19   :  { %s1792_s19 = smov 128   ;;  %s1793_s20 = smov 8  }
  0x1a   :  { %29 = dma.hbm_to_vmem [thread:$0]  %s2096_s0, 256, %s24_s17, [#allocation3], %s1792_s19, %s1792_s19, %s1793_s20  }
  0x1b   :  { %s1794_s23 = smov [#allocation7]   ;;  %s1795_s1 = smov [#allocation8]  }
  0x1c   :  { %s49_s24 = sshll.u32 %s1794_s23, 4  ;;  %s63_s25 = sshll.u32 %s1795_s1, 4  ;;  %s50_s24 = int_to_ptr.vmem [resolvable:$true] %s49_s24  ;;  %s64_s25 = int_to_ptr.vmem [resolvable:$true] %s63_s25 }
  0x1d   :  { %s1728_s26 = scalar_lea.vmem %s50_s24, 256  ;;  %p1733_p11 = scmp.lt.s32.totalorder %s50_s24, %s50_s24 }
  0x1e   :  { %p1729_p10 = scmp.ne.s32.totalorder %s50_s24, %s1728_s26  ;;  %p1734_p12 = scmp.lt.s32.totalorder %s1728_s26, %s1728_s26 }
  0x20   :  { %p1735_p13 = por %p1734_p12, %p1733_p11 }
  0x22   :  { %p1736_p0 = pnand %p1735_p13, %p1729_p10 }
  0x24   :  { %1739 = shalt.err (!%p1736_p0)
}
  0x25   :  { %55 = dma.hbm_to_vmem [thread:$0]  %s2099_s3, 256, %s50_s24, [#allocation6], %s1789_s12, %s1789_s12, %s1790_s13  }
  0x26   :  { %s1748_s0 = scalar_lea.vmem %s64_s25, 256  ;;  %p1753_p2 = scmp.lt.s32.totalorder %s64_s25, %s64_s25 }
  0x27   :  { %p1749_p1 = scmp.ne.s32.totalorder %s64_s25, %s1748_s0  ;;  %p1754_p3 = scmp.lt.s32.totalorder %s1748_s0, %s1748_s0 }
  0x29   :  { %p1755_p4 = por %p1754_p3, %p1753_p2 }
  0x2b   :  { %p1756_p5 = pnand %p1755_p4, %p1749_p1 }
  0x2d   :  { %1759 = shalt.err (!%p1756_p5)
}
  0x2e   :  { %69 = dma.hbm_to_vmem [thread:$0]  %s2101_s5, 256, %s64_s25, [#allocation9], %s1789_s12, %s1789_s12, %s1790_s13  }
  0x2f   :  { %1780 = dma.done.wait [#allocation3], 256  }
  0x30   :  { %1781 = vsyncadd [#allocation3], 4294967040 }
  0x31   :  { %1782 = dma.done.wait [#allocation6], 384  }
  0x32   :  { %1783 = vsyncadd [#allocation6], 4294966912 }
  0x33   :  { %1784 = dma.done.wait [#allocation9], 256  }
  0x34   :  { %1785 = vsyncadd [#allocation9], 4294967040  ;;  %v1796_v0 = vmov 0.0   ;;  %vm1797_vm0 = vmmov 0   ;;  %v1610_v1 = vld [vmem:[#allocation7 + $0x8] sm:$0xff]   ;;  %v1611_v2 = vld [vmem:[#allocation7] sm:$0xff]  }
  0x35   :  { %1471 = vmatprep.subr.bf16.mxu0 %v1796_v0  ;;  %1475 = vmatprep.mubr.msk.bf16.mxu0 %vm1797_vm0, %v1796_v0  ;;  %v89_v3 = vld [vmem:[#allocation2] sm:$0xff]  ;;  %v90_v4 = vld [vmem:[#allocation2 + $0x8] sm:$0xff]  ;;  %v1614_v6 = vld [vmem:[#allocation8 + $0x8] sm:$0xff]   ;;  %vm122_vm1 = vcmask 261120   ;;  %vm246_vm2 = vcmask 130048   ;;  %vm301_vm3 = vcmask 64512  }
  0x36   :  { %1479 = vmatprep.subr.bf16.mxu1 %v1796_v0  ;;  %1483 = vmatprep.mubr.msk.bf16.mxu1 %vm1797_vm0, %v1796_v0  ;;  %v91_v5 = vpack.c.bf16 %v90_v4, %v89_v3  ;;  %v1612_v7 = vld [vmem:[%s2103_s7] sm:$0xff]   ;;  %v1615_v8 = vld [vmem:[#allocation8] sm:$0xff]   ;;  %v1613_v9 = vld [vmem:[#allocation5] sm:$0xff]   ;;  %s1798_s14 = smov 120   ;;  %vm452_vm4 = vcmask 1043456   ;;  %vm436_vm9 = vcmask 60416  }
  0x37   :  { %1472 = vmatpush3.bf16.msra.mxu0 %v1610_v1  ;;  %1480 = vmatpush3.bf16.msra.mxu1 %v1614_v6  ;;  %v98_v10 = vpack.c.bf16 %v1613_v9, %v1613_v9  ;;  %v1394_v11 = vld [vmem:[%s2100_s4] ss:$0 sm:$0xff]  ;;  %s1800_s18 = smov 104   ;;  %s1801_s19 = smov 16  }
  0x38   :  { %1473 = vmatprep.subr.bf16.mxu0 %v1796_v0  ;;  %1481 = vmatprep.subr.bf16.mxu1 %v1796_v0  ;;  %v1398_v16 = vld [vmem:[%s2102_s6] ss:$0 sm:$0xff]  ;;  %s1805_s21 = smov 32   ;;  %s1806_s22 = smov 96  }
  0x39   :  { %v1402_v22 = vld [vmem:[%s2104_s8] ss:$0 sm:$0xff]  ;;  %s1807_s23 = smov [#allocation10]  }
  0x3a   :  { %v1956_v9 = vld [vmem:[%s2098_s2] ss:$0 sm:$0xff]  ;;  %s1380_s24 = sshll.u32 %s1807_s23, 4  ;;  %s1381_s24 = int_to_ptr.vmem [resolvable:$true] %s1380_s24 }
  0x3b   :  { %1474 = vmatpush3.bf16.msra.mxu0 %v1611_v2  ;;  %1482 = vmatpush3.bf16.msra.mxu1 %v1615_v8  ;;  %p1765_p7 = scmp.lt.s32.totalorder %s1381_s24, %s1381_s24 }
  0x3c   :  { %1487 = vmatprep.subr.bf16.mxu0 %v1796_v0  ;;  %1493 = vmatprep.subr.bf16.mxu1 %v1796_v0 }
  0x3e   :  { %1476 = vmatmul.mubr.msk.bf16.vlgmr.msra.gmra.mxu0 %vm122_vm1, %v91_v5  ;;  %1484 = vmatmul.mubr.msk.bf16.vlgmr.msra.gmra.mxu1 %vm122_vm1, %v91_v5 }
  0x3f   :  { %1488 = vmatpush3.bf16.msra.mxu0 %v1612_v7  ;;  %1489 = vmatprep.mubr.msk.bf16.mxu0 %vm1797_vm0, %v1796_v0 }
  0x40   :  { %1499 = vmatprep.subr.bf16.mxu0 %v1796_v0  ;;  %1495 = vmatprep.mubr.msk.bf16.mxu1 %vm1797_vm0, %v1796_v0 }
  0x46   :  { %1490 = vmatmul.mubr.msk.bf16.vlgmr.msra.gmra.mxu0 %vm246_vm2, %v98_v10 }
  0x47   :  { %1501 = vmatprep.mubr.msk.bf16.mxu0 %vm1797_vm0, %v1796_v0 }
  0xfe   :  { %v160_v12 = vpop.f32.mrf.mxu0  ;;  %v224_v20 = vpop.f32.mrf.mxu1 }
  0xff   :  { %v161_v13 = vadd.f32 %v1394_v11, %v160_v12  ;;  %v225_v23 = vadd.f32 %v1398_v16, %v224_v20  ;;  %v1962_v12 = vld [vmem:[%s2098_s2 + $0x1] ss:$0 sm:$0xff]  ;;  %s1799_s2 = smov 112  }
 0x100   :  { %v1477_v14 = vpop.f32.mrf.mxu0  ;;  %v1485_v25 = vpop.f32.mrf.mxu1 }
 0x101   :  { %v1907_v15 = vpack.c.bf16 %v161_v13, %v161_v13  ;;  %v1922_v27 = vpack.c.bf16 %v225_v23, %v225_v23 }
 0x102   :  { %v163_v17 = vpop.f32.mrf.mxu0  ;;  %v227_v30 = vpop.f32.mrf.mxu1 }
 0x103   :  { %v164_v18 = vadd.f32 %v1394_v11, %v163_v17  ;;  %546 = vrot.lane.b32.xlu1 %v1907_v15, %s1798_s14  ;;  %v306_v19 = vsel %vm301_vm3, %v1907_v15, 0  ;;  %v228_v32 = vadd.f32 %v1398_v16, %v227_v30  ;;  %v454_v36 = vsel %vm452_vm4, %v1922_v27, 0 }
 0x104   :  { %v1478_v21 = vpop.f32.mrf.mxu0  ;;  %1494 = vmatpush3.bf16.xpose.msra.mxu1 %v306_v19  ;;  %v1486_v35 = vpop.f32.mrf.mxu1 }
 0x105   :  { %v1919_v24 = vpack.c.bf16 %v164_v18, %v164_v18  ;;  %1505 = vmatprep.subr.bf16.mxu1 %v1796_v0  ;;  %v1933_v38 = vpack.c.bf16 %v228_v32, %v228_v32 }
 0x106   :  { %v284_v26 = vpop.f32.mrf.mxu0 }
 0x107   :  { %v285_v28 = vadd.f32 %v1402_v22, %v284_v26  ;;  %598 = vrot.lane.b32.xlu1 %v1919_v24, %s1798_s14  ;;  %v352_v29 = vsel %vm301_vm3, %v1919_v24, 0  ;;  %v500_v41 = vsel %vm452_vm4, %v1933_v38, 0 }
 0x108   :  { %v1491_v31 = vpop.f32.mrf.mxu0  ;;  %1500 = vmatpush3.bf16.xpose.msra.mxu0 %v352_v29 }
 0x109   :  { %v295_v33 = vcombine.high %v285_v28, %v285_v28  ;;  %v1928_v34 = vpack.c.bf16 %v285_v28, %v285_v28  ;;  %1511 = vmatprep.subr.bf16.mxu0 %v1796_v0 }
 0x10a   :  { %v287_v37 = vpop.f32.mrf.mxu0 }
 0x10b   :  { %v1935_v39 = vpack.c.bf16 %v295_v33, %v295_v33  ;;  %1496 = vmatmul.mubr.msk.bf16.vlgmr.msra.gmra.mxu1 %vm301_vm3, %v1928_v34 }
 0x10c   :  { %v1492_v40 = vpop.f32.mrf.mxu0  ;;  %1506 = vmatpush3.bf16.msra.mxu1 %v454_v36  ;;  %1507 = vmatprep.mubr.msk.bf16.mxu1 %vm1797_vm0, %v1796_v0 }
 0x10d   :  { %595 = vrot.lane.b32.xlu1 %v1935_v39, %s1798_s14  ;;  %1517 = vmatprep.subr.bf16.mxu1 %v1796_v0 }
 0x10f   :  { %1502 = vmatmul.mubr.msk.bf16.vlgmr.msra.gmra.mxu0 %vm301_vm3, %v1935_v39 }
 0x110   :  { %1512 = vmatpush3.bf16.msra.mxu0 %v500_v41  ;;  %1513 = vmatprep.mubr.msk.bf16.mxu0 %vm1797_vm0, %v1796_v0 }
 0x111   :  { %689 = vrot.lane.b32.xlu1 %v1922_v27, %s1798_s14  ;;  %1523 = vmatprep.subr.bf16.mxu0 %v1796_v0 }
 0x175   :  { %v547_v20 = vpop.permute.xlu1 %546 }
 0x176   :  { %v552_v28 = vsel %vm301_vm3, %v547_v20, 0 }
 0x179   :  { %v599_v23 = vpop.permute.xlu1 %598 }
 0x17a   :  { %v604_v32 = vsel %vm301_vm3, %v599_v23, 0 }
 0x17f   :  { %v596_v30 = vpop.permute.xlu1 %595 }
 0x183   :  { %v690_v33 = vpop.permute.xlu1 %689 }
 0x184   :  { %v695_v36 = vsel %vm452_vm4, %v690_v33, 0 }
 0x1cb   :  { %v342_v42 = vpop.f32.mrf.mxu1 }
 0x1cc   :  { %v1407_v43 = vadd.f32 50.0, %v342_v42  ;;  %v402_v44 = vsub.f32 50.0, %v342_v42  ;;  %vm412_vm5 = vcmp.gt.f32.partialorder %v342_v42, 50.0  ;;  %vm410_vm6 = vcmp.lt.f32.partialorder %v342_v42, -50.0 }
 0x1cd   :  { %v1497_v45 = vpop.f32.mrf.mxu1 }
 0x1ce   :  { %v396_v46 = vmul.f32 1.442695, %v1407_v43  ;;  %v404_v47 = vmul.f32 1.442695, %v402_v44 }
 0x1cf   :  { %v345_v48 = vpop.f32.mrf.mxu1  ;;  %v388_v49 = vpop.f32.mrf.mxu0 }
 0x1d0   :  { %1616 = vpow2.f32 %v396_v46  ;;  %v1408_v50 = vadd.f32 50.0, %v388_v49  ;;  %v403_v51 = vsub.f32 50.0, %v388_v49  ;;  %vm413_vm7 = vcmp.gt.f32.partialorder %v388_v49, 50.0 }
 0x1d1   :  { %1618 = vpow2.f32 %v404_v47  ;;  %v1498_v52 = vpop.f32.mrf.mxu1  ;;  %v1503_v53 = vpop.f32.mrf.mxu0  ;;  %vm411_vm8 = vcmp.lt.f32.partialorder %v388_v49, -50.0 }
 0x1d2   :  { %v398_v54 = vmul.f32 1.442695, %v1408_v50  ;;  %v406_v55 = vmul.f32 1.442695, %v403_v51 }
 0x1d3   :  { %v391_v56 = vpop.f32.mrf.mxu0 }
 0x1d4   :  { %1620 = vpow2.f32 %v398_v54 }
 0x1d5   :  { %1622 = vpow2.f32 %v406_v55  ;;  %v1504_v57 = vpop.f32.mrf.mxu0 }
 0x1dd   :  { %v1617_v58 = vpop.eup %1616 }
 0x1de   :  { %v1619_v59 = vpop.eup %1618  ;;  %v400_v60 = vadd.f32 -51.0, %v1617_v58 }
 0x1df   :  { %v408_v61 = vsub.f32 51.0, %v1619_v59 }
 0x1e1   :  { %v1621_v62 = vpop.eup %1620  ;;  %v414_v63 = vsel %vm412_vm5, %v408_v61, %v342_v42 }
 0x1e2   :  { %v1623_v1 = vpop.eup %1622  ;;  %v416_v2 = vsel %vm410_vm6, %v400_v60, %v414_v63  ;;  %v401_v3 = vadd.f32 -51.0, %v1621_v62 }
 0x1e3   :  { %v418_v4 = vmul.f32 1.442695, %v416_v2  ;;  %v409_v5 = vsub.f32 51.0, %v1623_v1 }
 0x1e5   :  { %1624 = vpow2.f32 %v418_v4  ;;  %v415_v6 = vsel %vm413_vm7, %v409_v5, %v388_v49 }
 0x1e6   :  { %v417_v7 = vsel %vm411_vm8, %v401_v3, %v415_v6 }
 0x1e7   :  { %v420_v8 = vmul.f32 1.442695, %v417_v7 }
 0x1e9   :  { %1626 = vpow2.f32 %v420_v8 }
 0x1f2   :  { %v1625_v10 = vpop.eup %1624 }
 0x1f3   :  { %v434_v11 = vmul.f32 %v1625_v10, %v1956_v9 }
 0x1f5   :  { %v437_v13 = vsel %vm436_vm9, %v434_v11, 0.0 }
 0x1f6   :  { %v1627_v14 = vpop.eup %1626  ;;  %438 = vadd.xlane.f32.xlu0 %v437_v13 }
 0x1f7   :  { %v435_v16 = vmul.f32 %v1627_v14, %v1962_v12 }
 0x1f9   :  { %v440_v17 = vsel %vm436_vm9, %v435_v16, 0.0 }
 0x1fa   :  { %441 = vadd.xlane.f32.xlu0 %v440_v17 }
 0x210   :  { %543 = vrot.lane.b32.xlu0 %v1928_v34, %s1798_s14 }
 0x27f   :  { %v439_v18 = vpop.xlane.xlu0 %438 }
 0x280   :  { %1628 = vrcp.f32 %v439_v18 }
 0x283   :  { %v442_v19 = vpop.xlane.xlu0 %441 }
 0x284   :  { %1630 = vrcp.f32 %v442_v19 }
 0x287   :  { %v544_v35 = vpop.permute.xlu0 %543 }
 0x28d   :  { %v1629_v21 = vpop.eup %1628 }
 0x28e   :  { %v445_v22 = vmul.f32 %v1629_v21, %v434_v11 }
 0x290   :  { %v447_v25 = vpack.c.bf16 %v445_v22, %v445_v22 }
 0x291   :  { %v1631_v26 = vpop.eup %1630 }
 0x292   :  { %1508 = vmatmul.mubr.msk.bf16.vlgmr.msra.gmra.mxu1 %vm301_vm3, %v447_v25  ;;  %v446_v29 = vmul.f32 %v1631_v26, %v435_v16 }
 0x293   :  { %1518 = vmatpush3.bf16.xpose.msra.mxu1 %v552_v28  ;;  %1519 = vmatprep.mubr.msk.bf16.mxu1 %vm1797_vm0, %v1796_v0 }
 0x294   :  { %v448_v31 = vpack.c.bf16 %v446_v29, %v446_v29  ;;  %1529 = vmatprep.subr.bf16.mxu1 %v1796_v0 }
 0x296   :  { %1514 = vmatmul.mubr.msk.bf16.vlgmr.msra.gmra.mxu0 %vm301_vm3, %v448_v31 }
 0x297   :  { %1524 = vmatpush3.bf16.xpose.msra.mxu0 %v604_v32  ;;  %1525 = vmatprep.mubr.msk.bf16.mxu0 %vm1797_vm0, %v1796_v0 }
 0x298   :  { %1535 = vmatprep.subr.bf16.mxu0 %v1796_v0 }
 0x29a   :  { %1520 = vmatmul.mubr.msk.bf16.vlgmr.msra.gmra.mxu1 %vm301_vm3, %v544_v35 }
 0x29b   :  { %1530 = vmatpush3.bf16.msra.mxu1 %v695_v36  ;;  %1531 = vmatprep.mubr.msk.bf16.mxu1 %vm1797_vm0, %v1796_v0 }
 0x29c   :  { %1541 = vmatprep.subr.bf16.mxu1 %v1796_v0 }
 0x29e   :  { %1526 = vmatmul.mubr.msk.bf16.vlgmr.msra.gmra.mxu0 %vm301_vm3, %v596_v30 }
 0x29f   :  { %1537 = vmatprep.mubr.msk.bf16.mxu0 %vm1797_vm0, %v1796_v0 }
 0x352   :  { %v1987_v37 = vpop.f32.mrf.mxu1 }
 0x354   :  { %v1509_v40 = vpop.f32.mrf.mxu1 }
 0x356   :  { %v493_v41 = vpop.f32.mrf.mxu1  ;;  %v1989_v42 = vpop.f32.mrf.mxu0 }
 0x358   :  { %v1510_v43 = vpop.f32.mrf.mxu1  ;;  %v1515_v44 = vpop.f32.mrf.mxu0 }
 0x35a   :  { %v539_v45 = vpop.f32.mrf.mxu0  ;;  %v588_v46 = vpop.f32.mrf.mxu1 }
 0x35b   :  { %v1415_v47 = vadd.f32 50.0, %v588_v46  ;;  %v654_v48 = vsub.f32 50.0, %v588_v46  ;;  %vm664_vm10 = vcmp.gt.f32.partialorder %v588_v46, 50.0  ;;  %vm662_vm11 = vcmp.lt.f32.partialorder %v588_v46, -50.0 }
 0x35c   :  { %v1516_v49 = vpop.f32.mrf.mxu0  ;;  %v1521_v50 = vpop.f32.mrf.mxu1 }
 0x35d   :  { %v648_v51 = vmul.f32 1.442695, %v1415_v47  ;;  %v656_v52 = vmul.f32 1.442695, %v654_v48 }
 0x35e   :  { %v591_v53 = vpop.f32.mrf.mxu1  ;;  %v640_v54 = vpop.f32.mrf.mxu0 }
 0x35f   :  { %1632 = vpow2.f32 %v648_v51  ;;  %v1416_v55 = vadd.f32 50.0, %v640_v54  ;;  %v655_v56 = vsub.f32 50.0, %v640_v54  ;;  %vm665_vm12 = vcmp.gt.f32.partialorder %v640_v54, 50.0 }
 0x360   :  { %1634 = vpow2.f32 %v656_v52  ;;  %v1522_v57 = vpop.f32.mrf.mxu1  ;;  %v1527_v58 = vpop.f32.mrf.mxu0  ;;  %vm663_vm13 = vcmp.lt.f32.partialorder %v640_v54, -50.0 }
 0x361   :  { %v650_v59 = vmul.f32 1.442695, %v1416_v55  ;;  %v658_v60 = vmul.f32 1.442695, %v655_v56 }
 0x362   :  { %v643_v61 = vpop.f32.mrf.mxu0 }
 0x363   :  { %1636 = vpow2.f32 %v650_v59 }
 0x364   :  { %1638 = vpow2.f32 %v658_v60  ;;  %v1528_v62 = vpop.f32.mrf.mxu0 }
 0x36c   :  { %v1633_v63 = vpop.eup %1632 }
 0x36d   :  { %v1635_v1 = vpop.eup %1634  ;;  %v652_v2 = vadd.f32 -51.0, %v1633_v63 }
 0x36e   :  { %v660_v3 = vsub.f32 51.0, %v1635_v1 }
 0x370   :  { %v1637_v4 = vpop.eup %1636  ;;  %v666_v5 = vsel %vm664_vm10, %v660_v3, %v588_v46 }
 0x371   :  { %v1639_v6 = vpop.eup %1638  ;;  %v668_v7 = vsel %vm662_vm11, %v652_v2, %v666_v5  ;;  %v653_v8 = vadd.f32 -51.0, %v1637_v4 }
 0x372   :  { %v670_v10 = vmul.f32 1.442695, %v668_v7  ;;  %v661_v11 = vsub.f32 51.0, %v1639_v6 }
 0x374   :  { %1640 = vpow2.f32 %v670_v10  ;;  %v667_v13 = vsel %vm665_vm12, %v661_v11, %v640_v54 }
 0x375   :  { %v669_v14 = vsel %vm663_vm13, %v653_v8, %v667_v13 }
 0x376   :  { %v672_v16 = vmul.f32 1.442695, %v669_v14 }
 0x378   :  { %1642 = vpow2.f32 %v672_v16 }
 0x381   :  { %v1641_v17 = vpop.eup %1640 }
 0x382   :  { %v674_v18 = vmul.f32 %v1641_v17, %v1956_v9 }
 0x384   :  { %v676_v19 = vsel %vm436_vm9, %v674_v18, 0.0 }
 0x385   :  { %v1643_v20 = vpop.eup %1642  ;;  %677 = vadd.xlane.f32.xlu1 %v676_v19 }
 0x386   :  { %v675_v21 = vmul.f32 %v1643_v20, %v1962_v12 }
 0x388   :  { %v679_v22 = vsel %vm436_vm9, %v675_v21, 0.0 }
 0x389   :  { %680 = vadd.xlane.f32.xlu0 %v679_v22 }
 0x396   :  { %788 = vrot.lane.b32.xlu1 %v1907_v15, %s1799_s2 }
 0x39a   :  { %838 = vrot.lane.b32.xlu1 %v1919_v24, %s1799_s2 }
 0x39e   :  { %786 = vrot.lane.b32.xlu1 %v1928_v34, %s1799_s2 }
 0x39f   :  { %738 = vrot.lane.b32.xlu0 %v1933_v38, %s1798_s14 }
 0x3a2   :  { %836 = vrot.lane.b32.xlu1 %v1935_v39, %s1799_s2 }
 0x3a3   :  { %928 = vrot.lane.b32.xlu0 %v1922_v27, %s1799_s2 }
 0x3a6   :  { %976 = vrot.lane.b32.xlu1 %v1933_v38, %s1799_s2 }
 0x40e   :  { %v678_v23 = vpop.xlane.xlu1 %677 }
 0x40f   :  { %1644 = vrcp.f32 %v678_v23 }
 0x412   :  { %v789_v25 = vpop.permute.xlu1 %788  ;;  %v681_v26 = vpop.xlane.xlu0 %680 }
 0x413   :  { %1646 = vrcp.f32 %v681_v26  ;;  %v794_v40 = vsel %vm301_vm3, %v789_v25, 0 }
 0x416   :  { %v739_v28 = vpop.permute.xlu0 %738  ;;  %v839_v30 = vpop.permute.xlu1 %838 }
 0x417   :  { %v744_v29 = vsel %vm452_vm4, %v739_v28, 0  ;;  %v844_v45 = vsel %vm301_vm3, %v839_v30, 0 }
 0x418   :  { %1536 = vmatpush3.bf16.msra.mxu0 %v744_v29 }
 0x419   :  { %1547 = vmatprep.subr.bf16.mxu0 %v1796_v0 }
 0x41a   :  { %v787_v33 = vpop.permute.xlu1 %786  ;;  %v929_v46 = vpop.permute.xlu0 %928 }
 0x41b   :  { %v934_v47 = vsel %vm452_vm4, %v929_v46, 0 }
 0x41c   :  { %v1645_v31 = vpop.eup %1644 }
 0x41d   :  { %v684_v32 = vmul.f32 %v1645_v31, %v674_v18 }
 0x41e   :  { %v837_v44 = vpop.permute.xlu1 %836 }
 0x41f   :  { %v686_v35 = vpack.c.bf16 %v684_v32, %v684_v32 }
 0x420   :  { %v1647_v36 = vpop.eup %1646 }
 0x421   :  { %1532 = vmatmul.mubr.msk.bf16.vlgmr.msra.gmra.mxu1 %vm301_vm3, %v686_v35  ;;  %v685_v41 = vmul.f32 %v1647_v36, %v675_v21 }
 0x422   :  { %1542 = vmatpush3.bf16.xpose.msra.mxu1 %v794_v40  ;;  %1543 = vmatprep.mubr.msk.bf16.mxu1 %vm1797_vm0, %v1796_v0  ;;  %v977_v48 = vpop.permute.xlu1 %976 }
 0x423   :  { %v687_v43 = vpack.c.bf16 %v685_v41, %v685_v41  ;;  %1553 = vmatprep.subr.bf16.mxu1 %v1796_v0  ;;  %v982_v49 = vsel %vm452_vm4, %v977_v48, 0 }
 0x425   :  { %1538 = vmatmul.mubr.msk.bf16.vlgmr.msra.gmra.mxu0 %vm301_vm3, %v687_v43 }
 0x426   :  { %1548 = vmatpush3.bf16.xpose.msra.mxu0 %v844_v45  ;;  %1549 = vmatprep.mubr.msk.bf16.mxu0 %vm1797_vm0, %v1796_v0 }
 0x427   :  { %1559 = vmatprep.subr.bf16.mxu0 %v1796_v0 }
 0x429   :  { %1544 = vmatmul.mubr.msk.bf16.vlgmr.msra.gmra.mxu1 %vm301_vm3, %v787_v33 }
 0x42a   :  { %1554 = vmatpush3.bf16.msra.mxu1 %v934_v47  ;;  %1555 = vmatprep.mubr.msk.bf16.mxu1 %vm1797_vm0, %v1796_v0 }
 0x42b   :  { %1565 = vmatprep.subr.bf16.mxu1 %v1796_v0 }
 0x42d   :  { %1550 = vmatmul.mubr.msk.bf16.vlgmr.msra.gmra.mxu0 %vm301_vm3, %v837_v44 }
 0x42e   :  { %1560 = vmatpush3.bf16.msra.mxu0 %v982_v49  ;;  %1561 = vmatprep.mubr.msk.bf16.mxu0 %vm1797_vm0, %v1796_v0 }
 0x42f   :  { %1571 = vmatprep.subr.bf16.mxu0 %v1796_v0 }
 0x4e1   :  { %v2025_v50 = vpop.f32.mrf.mxu1 }
 0x4e3   :  { %v1533_v51 = vpop.f32.mrf.mxu1 }
 0x4e5   :  { %v734_v52 = vpop.f32.mrf.mxu1  ;;  %v2027_v53 = vpop.f32.mrf.mxu0 }
 0x4e7   :  { %v1534_v54 = vpop.f32.mrf.mxu1  ;;  %v1539_v55 = vpop.f32.mrf.mxu0 }
 0x4e9   :  { %v783_v56 = vpop.f32.mrf.mxu0  ;;  %v830_v57 = vpop.f32.mrf.mxu1 }
 0x4ea   :  { %v1421_v58 = vadd.f32 50.0, %v830_v57  ;;  %v894_v59 = vsub.f32 50.0, %v830_v57  ;;  %vm904_vm14 = vcmp.gt.f32.partialorder %v830_v57, 50.0  ;;  %vm902_vm15 = vcmp.lt.f32.partialorder %v830_v57, -50.0 }
 0x4eb   :  { %v1540_v60 = vpop.f32.mrf.mxu0  ;;  %v1545_v61 = vpop.f32.mrf.mxu1 }
 0x4ec   :  { %v888_v62 = vmul.f32 1.442695, %v1421_v58  ;;  %v896_v63 = vmul.f32 1.442695, %v894_v59 }
 0x4ed   :  { %v833_v1 = vpop.f32.mrf.mxu1  ;;  %v880_v2 = vpop.f32.mrf.mxu0 }
 0x4ee   :  { %1648 = vpow2.f32 %v888_v62  ;;  %v1422_v3 = vadd.f32 50.0, %v880_v2  ;;  %v895_v4 = vsub.f32 50.0, %v880_v2  ;;  %vm905_vm5 = vcmp.gt.f32.partialorder %v880_v2, 50.0 }
 0x4ef   :  { %1650 = vpow2.f32 %v896_v63  ;;  %v1546_v5 = vpop.f32.mrf.mxu1  ;;  %v1551_v6 = vpop.f32.mrf.mxu0  ;;  %vm903_vm6 = vcmp.lt.f32.partialorder %v880_v2, -50.0 }
 0x4f0   :  { %v890_v7 = vmul.f32 1.442695, %v1422_v3  ;;  %v898_v8 = vmul.f32 1.442695, %v895_v4 }
 0x4f1   :  { %v883_v10 = vpop.f32.mrf.mxu0 }
 0x4f2   :  { %1652 = vpow2.f32 %v890_v7 }
 0x4f3   :  { %1654 = vpow2.f32 %v898_v8  ;;  %v1552_v11 = vpop.f32.mrf.mxu0 }
 0x4fb   :  { %v1649_v13 = vpop.eup %1648 }
 0x4fc   :  { %v1651_v14 = vpop.eup %1650  ;;  %v892_v16 = vadd.f32 -51.0, %v1649_v13 }
 0x4fd   :  { %v900_v17 = vsub.f32 51.0, %v1651_v14 }
 0x4ff   :  { %v1653_v18 = vpop.eup %1652  ;;  %v906_v19 = vsel %vm904_vm14, %v900_v17, %v830_v57 }
 0x500   :  { %v1655_v20 = vpop.eup %1654  ;;  %v908_v21 = vsel %vm902_vm15, %v892_v16, %v906_v19  ;;  %v893_v22 = vadd.f32 -51.0, %v1653_v18 }
 0x501   :  { %v910_v23 = vmul.f32 1.442695, %v908_v21  ;;  %v901_v25 = vsub.f32 51.0, %v1655_v20 }
 0x503   :  { %1656 = vpow2.f32 %v910_v23  ;;  %v907_v26 = vsel %vm905_vm5, %v901_v25, %v880_v2 }
 0x504   :  { %v909_v28 = vsel %vm903_vm6, %v893_v22, %v907_v26 }
 0x505   :  { %v912_v29 = vmul.f32 1.442695, %v909_v28 }
 0x507   :  { %1658 = vpow2.f32 %v912_v29 }
 0x510   :  { %v1657_v30 = vpop.eup %1656 }
 0x511   :  { %v914_v31 = vmul.f32 %v1657_v30, %v1956_v9 }
 0x513   :  { %v916_v32 = vsel %vm436_vm9, %v914_v31, 0.0 }
 0x514   :  { %v1659_v33 = vpop.eup %1658  ;;  %917 = vadd.xlane.f32.xlu1 %v916_v32 }
 0x515   :  { %v915_v35 = vmul.f32 %v1659_v33, %v1962_v12 }
 0x517   :  { %v919_v36 = vsel %vm436_vm9, %v915_v35, 0.0 }
 0x518   :  { %920 = vadd.xlane.f32.xlu0 %v919_v36 }
 0x525   :  { %1026 = vrot.lane.b32.xlu1 %v1907_v15, %s1800_s18 }
 0x529   :  { %1024 = vrot.lane.b32.xlu1 %v1928_v34, %s1800_s18 }
 0x52e   :  { %1076 = vrot.lane.b32.xlu0 %v1919_v24, %s1800_s18 }
 0x532   :  { %1074 = vrot.lane.b32.xlu0 %v1935_v39, %s1800_s18 }
 0x59d   :  { %v918_v40 = vpop.xlane.xlu1 %917 }
 0x59e   :  { %1660 = vrcp.f32 %v918_v40 }
 0x5a1   :  { %v921_v41 = vpop.xlane.xlu0 %920  ;;  %v1027_v45 = vpop.permute.xlu1 %1026 }
 0x5a2   :  { %1662 = vrcp.f32 %v921_v41  ;;  %v1032_v15 = vsel %vm301_vm3, %v1027_v45, 0 }
 0x5a5   :  { %v1077_v48 = vpop.permute.xlu0 %1076  ;;  %v1025_v49 = vpop.permute.xlu1 %1024 }
 0x5a6   :  { %v1082_v39 = vsel %vm301_vm3, %v1077_v48, 0 }
 0x5a9   :  { %v1075_v51 = vpop.permute.xlu0 %1074 }
 0x5ab   :  { %v1661_v43 = vpop.eup %1660 }
 0x5ac   :  { %v924_v44 = vmul.f32 %v1661_v43, %v914_v31 }
 0x5ae   :  { %v926_v46 = vpack.c.bf16 %v924_v44, %v924_v44 }
 0x5af   :  { %v1663_v47 = vpop.eup %1662 }
 0x5b0   :  { %1556 = vmatmul.mubr.msk.bf16.vlgmr.msra.gmra.mxu1 %vm301_vm3, %v926_v46  ;;  %v925_v34 = vmul.f32 %v1663_v47, %v915_v35 }
 0x5b1   :  { %1566 = vmatpush3.bf16.xpose.msra.mxu1 %v1032_v15  ;;  %1567 = vmatprep.mubr.msk.bf16.mxu1 %vm1797_vm0, %v1796_v0 }
 0x5b2   :  { %v927_v24 = vpack.c.bf16 %v925_v34, %v925_v34  ;;  %1577 = vmatprep.subr.bf16.mxu1 %v1796_v0 }
 0x5b4   :  { %1562 = vmatmul.mubr.msk.bf16.vlgmr.msra.gmra.mxu0 %vm301_vm3, %v927_v24 }
 0x5b5   :  { %1572 = vmatpush3.bf16.xpose.msra.mxu0 %v1082_v39  ;;  %1573 = vmatprep.mubr.msk.bf16.mxu0 %vm1797_vm0, %v1796_v0 }
 0x5b6   :  { %1583 = vmatprep.subr.bf16.mxu0 %v1796_v0 }
 0x5b8   :  { %1568 = vmatmul.mubr.msk.bf16.vlgmr.msra.gmra.mxu1 %vm301_vm3, %v1025_v49 }
 0x5b9   :  { %1579 = vmatprep.mubr.msk.bf16.mxu1 %vm1797_vm0, %v1796_v0 }
 0x5bc   :  { %1574 = vmatmul.mubr.msk.bf16.vlgmr.msra.gmra.mxu0 %vm301_vm3, %v1075_v51 }
 0x5bd   :  { %1585 = vmatprep.mubr.msk.bf16.mxu0 %vm1797_vm0, %v1796_v0 }
 0x670   :  { %v970_v52 = vpop.f32.mrf.mxu1 }
 0x672   :  { %v1557_v54 = vpop.f32.mrf.mxu1 }
 0x674   :  { %v973_v55 = vpop.f32.mrf.mxu1  ;;  %v1018_v56 = vpop.f32.mrf.mxu0 }
 0x676   :  { %v1558_v57 = vpop.f32.mrf.mxu1  ;;  %v1563_v58 = vpop.f32.mrf.mxu0 }
 0x677   :  { %v1803_v57 = vmov 1983009808  }
 0x678   :  { %v1021_v59 = vpop.f32.mrf.mxu0  ;;  %v1068_v60 = vpop.f32.mrf.mxu1  ;;  %v1293_v58 = vunpack.c.l.s4 %v1803_v57 }
 0x679   :  { %v1427_v61 = vadd.f32 50.0, %v1068_v60  ;;  %v1132_v62 = vsub.f32 50.0, %v1068_v60  ;;  %vm1142_vm0 = vcmp.gt.f32.partialorder %v1068_v60, 50.0  ;;  %vm1140_vm7 = vcmp.lt.f32.partialorder %v1068_v60, -50.0 }
 0x67a   :  { %v1564_v63 = vpop.f32.mrf.mxu0  ;;  %v1569_v1 = vpop.f32.mrf.mxu1  ;;  %v1295_v59 = vlaneseq }
 0x67b   :  { %v1126_v2 = vmul.f32 1.442695, %v1427_v61  ;;  %v1134_v3 = vmul.f32 1.442695, %v1132_v62  ;;  %v1294_v63 = vunpack.c.0.s8 %v1293_v58 }
 0x67c   :  { %v1071_v4 = vpop.f32.mrf.mxu1  ;;  %v1118_v5 = vpop.f32.mrf.mxu0  ;;  %v1296_v1 = vshrl.u32 %v1295_v59, 7 }
 0x67d   :  { %1664 = vpow2.f32 %v1126_v2  ;;  %v1428_v6 = vadd.f32 50.0, %v1118_v5  ;;  %v1133_v7 = vsub.f32 50.0, %v1118_v5  ;;  %vm1143_vm8 = vcmp.gt.f32.partialorder %v1118_v5, 50.0 }
 0x67e   :  { %1666 = vpow2.f32 %v1134_v3  ;;  %v1570_v8 = vpop.f32.mrf.mxu1  ;;  %v1575_v10 = vpop.f32.mrf.mxu0  ;;  %vm1141_vm10 = vcmp.lt.f32.partialorder %v1118_v5, -50.0  ;;  %v1297_v4 = vsub.s32 %v1294_v63, %v1296_v1 }
 0x67f   :  { %v1128_v11 = vmul.f32 1.442695, %v1428_v6  ;;  %v1136_v13 = vmul.f32 1.442695, %v1133_v7 }
 0x680   :  { %v1121_v14 = vpop.f32.mrf.mxu0 }
 0x681   :  { %1668 = vpow2.f32 %v1128_v11 }
 0x682   :  { %1670 = vpow2.f32 %v1136_v13  ;;  %v1576_v16 = vpop.f32.mrf.mxu0 }
 0x68a   :  { %v1665_v17 = vpop.eup %1664 }
 0x68b   :  { %v1667_v18 = vpop.eup %1666  ;;  %v1130_v19 = vadd.f32 -51.0, %v1665_v17 }
 0x68c   :  { %v1138_v20 = vsub.f32 51.0, %v1667_v18 }
 0x68e   :  { %v1669_v21 = vpop.eup %1668  ;;  %v1144_v22 = vsel %vm1142_vm0, %v1138_v20, %v1068_v60  ;;  %v1804_v60 = vmov 1934713408  }
 0x68f   :  { %v1671_v23 = vpop.eup %1670  ;;  %v1146_v25 = vsel %vm1140_vm7, %v1130_v19, %v1144_v22  ;;  %v1131_v26 = vadd.f32 -51.0, %v1669_v21  ;;  %v1301_v61 = vunpack.c.l.s4 %v1804_v60 }
 0x690   :  { %v1148_v28 = vmul.f32 1.442695, %v1146_v25  ;;  %v1139_v29 = vsub.f32 51.0, %v1671_v23 }
 0x691   :  { %v1302_v3 = vunpack.c.0.s8 %v1301_v61 }
 0x692   :  { %1672 = vpow2.f32 %v1148_v28  ;;  %v1145_v30 = vsel %vm1143_vm8, %v1139_v29, %v1118_v5 }
 0x693   :  { %v1147_v31 = vsel %vm1141_vm10, %v1131_v26, %v1145_v30  ;;  %v1305_v8 = vsub.s32 %v1302_v3, %v1296_v1 }
 0x694   :  { %v1150_v32 = vmul.f32 1.442695, %v1147_v31 }
 0x696   :  { %1674 = vpow2.f32 %v1150_v32 }
 0x69f   :  { %v1673_v33 = vpop.eup %1672 }
 0x6a0   :  { %v1152_v35 = vmul.f32 %v1673_v33, %v1956_v9 }
 0x6a2   :  { %v1154_v36 = vsel %vm436_vm9, %v1152_v35, 0.0 }
 0x6a3   :  { %v1675_v40 = vpop.eup %1674  ;;  %1155 = vadd.xlane.f32.xlu1 %v1154_v36 }
 0x6a4   :  { %v1153_v41 = vmul.f32 %v1675_v40, %v1962_v12 }
 0x6a6   :  { %v1157_v43 = vsel %vm436_vm9, %v1153_v41, 0.0 }
 0x6a7   :  { %1158 = vadd.xlane.f32.xlu0 %v1157_v43 }
 0x6b4   :  { %1214 = vrot.lane.b32.xlu1 %v1933_v38, %s1800_s18 }
 0x6b8   :  { %1264 = vrot.lane.b32.xlu1 %v2025_v50, %s1793_s20 }
 0x6bc   :  { %1272 = vrot.lane.b32.xlu1 %v970_v52, %s1801_s19 }
 0x6bd   :  { %1166 = vrot.lane.b32.xlu0 %v1922_v27, %s1800_s18 }
 0x6c1   :  { %1266 = vrot.lane.b32.xlu0 %v2027_v53, %s1793_s20  ;;  %s1802_s20 = smov 24  }
 0x6c5   :  { %1274 = vrot.lane.b32.xlu0 %v1018_v56, %s1801_s19 }
 0x72c   :  { %v1156_v9 = vpop.xlane.xlu1 %1155 }
 0x72d   :  { %1676 = vrcp.f32 %v1156_v9 }
 0x730   :  { %v1215_v12 = vpop.permute.xlu1 %1214  ;;  %v1159_v44 = vpop.xlane.xlu0 %1158 }
 0x731   :  { %v1220_v38 = vsel %vm452_vm4, %v1215_v12, 0  ;;  %1678 = vrcp.f32 %v1159_v44 }
 0x732   :  { %1584 = vmatpush3.bf16.msra.mxu0 %v1220_v38 }
 0x734   :  { %v1167_v50 = vpop.permute.xlu0 %1166  ;;  %v1265_v56 = vpop.permute.xlu1 %1264 }
 0x735   :  { %v1172_v45 = vsel %vm452_vm4, %v1167_v50, 0  ;;  %vm1290_vm4 = vcmask 195584   ;;  %v1286_v5 = vsel %vm301_vm3, %v1987_v37, %v1265_v56 }
 0x736   :  { %1578 = vmatpush3.bf16.msra.mxu1 %v1172_v45 }
 0x738   :  { %v1267_v62 = vpop.permute.xlu0 %1266  ;;  %v1273_v2 = vpop.permute.xlu1 %1272 }
 0x739   :  { %v1288_v6 = vsel %vm246_vm2, %v1286_v5, %v1273_v2  ;;  %v1287_v14 = vsel %vm301_vm3, %v1989_v42, %v1267_v62 }
 0x73a   :  { %v1677_v46 = vpop.eup %1676 }
 0x73b   :  { %v1162_v47 = vmul.f32 %v1677_v46, %v1152_v35 }
 0x73c   :  { %v1275_v7 = vpop.permute.xlu0 %1274 }
 0x73d   :  { %v1164_v27 = vpack.c.bf16 %v1162_v47, %v1162_v47  ;;  %v1289_v16 = vsel %vm246_vm2, %v1287_v14, %v1275_v7  ;;  %vm1367_vm2 = vcmask 523264  }
 0x73e   :  { %v1679_v15 = vpop.eup %1678 }
 0x73f   :  { %1580 = vmatmul.mubr.msk.bf16.vlgmr.msra.gmra.mxu1 %vm301_vm3, %v1164_v27  ;;  %v1163_v53 = vmul.f32 %v1679_v15, %v1153_v41 }
 0x741   :  { %v1165_v34 = vpack.c.bf16 %v1163_v53, %v1163_v53 }
 0x743   :  { %1586 = vmatmul.mubr.msk.bf16.vlgmr.msra.gmra.mxu0 %vm301_vm3, %v1165_v34  ;;  %vm1370_vm3 = vcmask 785408  }
 0x7ff   :  { %v1208_v48 = vpop.f32.mrf.mxu1 }
 0x800   :  { %1280 = vrot.lane.b32.xlu1 %v1208_v48, %s1802_s20 }
 0x801   :  { %v1581_v24 = vpop.f32.mrf.mxu1 }
 0x803   :  { %v1211_v39 = vpop.f32.mrf.mxu1  ;;  %v1256_v49 = vpop.f32.mrf.mxu0 }
 0x804   :  { %1282 = vrot.lane.b32.xlu0 %v1256_v49, %s1802_s20 }
 0x805   :  { %v1582_v51 = vpop.f32.mrf.mxu1  ;;  %v1587_v52 = vpop.f32.mrf.mxu0 }
 0x807   :  { %v1259_v54 = vpop.f32.mrf.mxu0 }
 0x809   :  { %v1588_v55 = vpop.f32.mrf.mxu0 }
 0x872   :  { %v1281_v10 = vpop.permute.xlu1 %1280 }
 0x873   :  { %v1291_v11 = vsel %vm1290_vm4, %v1288_v6, %v1281_v10 }
 0x874   :  { %v1298_v13 = vrot.slane %v1291_v11, %v1297_v4 }
 0x876   :  { %v1306_v17 = vrot.slane %v1298_v13, %v1305_v8  ;;  %v1283_v18 = vpop.permute.xlu0 %1282  ;;  %v1299_v37 = vcombine.high %v1298_v13, %v1796_v0 }
 0x877   :  { %v1316_v19 = vsel %vm1290_vm4, %v1289_v16, %v1283_v18 }
 0x878   :  { %v1323_v20 = vrot.slane %v1316_v19, %v1297_v4  ;;  %v1314_v21 = vcombine.high %v1306_v17, %v1796_v0  ;;  %v1313_v23 = vrot.slane %v1299_v37, %v1305_v8 }
 0x87a   :  { %v1331_v22 = vrot.slane %v1323_v20, %v1305_v8  ;;  %1343 = vrot.lane.b32.xlu1 %v1314_v21, %s1805_s21  ;;  %v1324_v26 = vcombine.high %v1323_v20, %v1796_v0  ;;  %v1315_v42 = vcombine.high %v1313_v23, %v1796_v0 }
 0x87c   :  { %v1339_v25 = vcombine.high %v1331_v22, %v1796_v0  ;;  %v1338_v28 = vrot.slane %v1324_v26, %v1305_v8 }
 0x87e   :  { %1351 = vrot.lane.b32.xlu1 %v1313_v23, %s1789_s12  ;;  %1345 = vrot.lane.b32.xlu0 %v1339_v25, %s1805_s21  ;;  %v1340_v29 = vcombine.high %v1338_v28, %v1796_v0 }
 0x882   :  { %1359 = vrot.lane.b32.xlu1 %v1315_v42, %s1806_s22  ;;  %1353 = vrot.lane.b32.xlu0 %v1338_v28, %s1789_s12  ;;  %s1760_s12 = scalar_lea.vmem %s1381_s24, 32 }
 0x883   :  { %p1761_p6 = scmp.ne.s32.totalorder %s1381_s24, %s1760_s12  ;;  %p1766_p8 = scmp.lt.s32.totalorder %s1760_s12, %s1760_s12 }
 0x885   :  { %p1767_p9 = por %p1766_p8, %p1765_p7 }
 0x886   :  { %1361 = vrot.lane.b32.xlu0 %v1340_v29, %s1806_s22 }
 0x887   :  { %p1768_p10 = pnand %p1767_p9, %p1761_p6 }
 0x8ec   :  { %v1344_v30 = vpop.permute.xlu1 %1343 }
 0x8ed   :  { %v1365_v33 = vsel %vm122_vm1, %v1306_v17, %v1344_v30 }
 0x8f0   :  { %v1352_v31 = vpop.permute.xlu1 %1351  ;;  %v1346_v32 = vpop.permute.xlu0 %1345 }
 0x8f1   :  { %v1368_v35 = vsel %vm1367_vm2, %v1365_v33, %v1352_v31  ;;  %v1366_v43 = vsel %vm122_vm1, %v1331_v22, %v1346_v32 }
 0x8f4   :  { %v1360_v36 = vpop.permute.xlu1 %1359  ;;  %v1354_v40 = vpop.permute.xlu0 %1353 }
 0x8f5   :  { %v1371_v41 = vsel %vm1370_vm3, %v1368_v35, %v1360_v36  ;;  %v1369_v9 = vsel %vm1367_vm2, %v1366_v43, %v1354_v40 }
 0x8f6   :  { %1373 = vst [vmem:[#allocation10] sm:$0x1] %v1371_v41 }
 0x8f8   :  { %v1362_v12 = vpop.permute.xlu0 %1361 }
 0x8f9   :  { %v1372_v0 = vsel %vm1370_vm3, %v1369_v9, %v1362_v12 }
 0x8fa   :  { %1374 = vst [vmem:[#allocation10 + $0x1] sm:$0x1] %v1372_v0 }
 0x8fb   :  { %1771 = shalt.err (!%p1768_p10)
}
 0x8fc   :  { %s1808_s1 = smov 1  }
 0x8fd   :  { %1386 = dma.vmem_to_hbm [thread:$0]  %s1381_s24, 32, %s2105_s9, [#allocation4], %s1801_s19, %s1801_s19, %s1808_s1  }
 0x8fe   :  { %1786 = dma.done.wait [#allocation4], 32  }
 0x8ff   :  { %1787 = vsyncadd [#allocation4], 4294967264 }
 0x900   :  { %1390 = vsyncpa [#allocation3], 1 }
 0x901   :  { %1391 = vsyncpa [#allocation6], 1 }
 0x902   :  { %1392 = vsyncpa [#allocation9], 1 }
 0x903   :  { %1393 = vsyncpa [#allocation4], 1 }

// kernel: tpu_custom_call.1
= control target key start
LH: loop header
LB: loop body
LE: loop exit
PB: predicated region body
PF: predicated region fallthrough
CT: control target
= control target key end

     0   :  { %14 = vsyncpa [#allocation3], 0  ;;  %s1994_s0 = inlined_call_operand.hbm [shape: f32[2,8,32], index: 0, kind: input, shape index: {}]   ;;  %s1995_s1 = inlined_call_operand.hbm [shape: f32[2,4,16], index: 1, kind: input, shape index: {}]   ;;  %s1996_s2 = inlined_call_operand.vmem [shape: f32[2,1,8], index: 2, kind: input, shape index: {}]   ;;  %s1997_s3 = inlined_call_operand.hbm [shape: bf16[32,32], index: 3, kind: input, shape index: {}]   ;;  %s1998_s4 = inlined_call_operand.vmem [shape: f32[1,32], index: 4, kind: input, shape index: {}]   ;;  %s1999_s5 = inlined_call_operand.hbm [shape: bf16[32,32], index: 5, kind: input, shape index: {}]   ;;  %s2000_s6 = inlined_call_operand.vmem [shape: f32[1,32], index: 6, kind: input, shape index: {}]   ;;  %s2001_s7 = inlined_call_operand.vmem [shape: bf16[16,32], index: 7, kind: input, shape index: {}]   ;;  %s2002_s8 = inlined_call_operand.vmem [shape: f32[1,32], index: 8, kind: input, shape index: {}]   ;;  %s2003_s9 = inlined_call_operand.hbm [shape: f32[2,4,32], index: 9, kind: output, shape index: {}]  }
   0x1   :  { %15 = vsyncpa [#allocation6], 0 }
   0x2   :  { %16 = vsyncpa [#allocation9], 0 }
   0x3   :  { %17 = vsyncpa [#allocation4], 0  ;;  %s1704_s30 = smov [#allocation5]  }
   0x4   :  { %s35_s10 = sshll.u32 %s1704_s30, 4  ;;  %s36_s10 = int_to_ptr.vmem [resolvable:$true] %s35_s10 }
   0x5   :  { %s1604_s11 = scalar_lea.vmem %s36_s10, 128  ;;  %p1609_p1 = scmp.lt.s32.totalorder %s36_s10, %s36_s10 }
   0x6   :  { %p1605_p0 = scmp.ne.s32.totalorder %s36_s10, %s1604_s11  ;;  %p1610_p2 = scmp.lt.s32.totalorder %s1604_s11, %s1604_s11 }
   0x8   :  { %p1611_p3 = por %p1610_p2, %p1609_p1 }
   0xa   :  { %p1612_p4 = pnand %p1611_p3, %p1605_p0 }
   0xc   :  { %1615 = shalt.err (!%p1612_p4)
}
   0xd   :  { %s1705_s12 = smov 64   ;;  %s1706_s13 = smov 4  }
   0xe   :  { %41 = dma.hbm_to_vmem [thread:$0]  %s1995_s1, 128, %s36_s10, [#allocation6], %s1705_s12, %s1705_s12, %s1706_s13  }
   0xf   :  { %s1707_s16 = smov [#allocation2]  }
  0x10   :  { %s23_s17 = sshll.u32 %s1707_s16, 4  ;;  %s24_s17 = int_to_ptr.vmem [resolvable:$true] %s23_s17 }
  0x11   :  { %s1624_s18 = scalar_lea.vmem %s24_s17, 256  ;;  %p1629_p6 = scmp.lt.s32.totalorder %s24_s17, %s24_s17 }
  0x12   :  { %p1625_p5 = scmp.ne.s32.totalorder %s24_s17, %s1624_s18  ;;  %p1630_p7 = scmp.lt.s32.totalorder %s1624_s18, %s1624_s18 }
  0x14   :  { %p1631_p8 = por %p1630_p7, %p1629_p6 }
  0x16   :  { %p1632_p9 = pnand %p1631_p8, %p1625_p5 }
  0x18   :  { %1635 = shalt.err (!%p1632_p9)
}
  0x19   :  { %s1708_s19 = smov 128   ;;  %s1709_s20 = smov 8  }
  0x1a   :  { %29 = dma.hbm_to_vmem [thread:$0]  %s1994_s0, 256, %s24_s17, [#allocation3], %s1708_s19, %s1708_s19, %s1709_s20  }
  0x1b   :  { %s1710_s23 = smov [#allocation7]   ;;  %s1711_s1 = smov [#allocation8]  }
  0x1c   :  { %s49_s24 = sshll.u32 %s1710_s23, 4  ;;  %s63_s25 = sshll.u32 %s1711_s1, 4  ;;  %s50_s24 = int_to_ptr.vmem [resolvable:$true] %s49_s24  ;;  %s64_s25 = int_to_ptr.vmem [resolvable:$true] %s63_s25 }
  0x1d   :  { %s1644_s26 = scalar_lea.vmem %s50_s24, 256  ;;  %p1649_p11 = scmp.lt.s32.totalorder %s50_s24, %s50_s24 }
  0x1e   :  { %p1645_p10 = scmp.ne.s32.totalorder %s50_s24, %s1644_s26  ;;  %p1650_p12 = scmp.lt.s32.totalorder %s1644_s26, %s1644_s26 }
  0x20   :  { %p1651_p13 = por %p1650_p12, %p1649_p11 }
  0x22   :  { %p1652_p0 = pnand %p1651_p13, %p1645_p10 }
  0x24   :  { %1655 = shalt.err (!%p1652_p0)
}
  0x25   :  { %55 = dma.hbm_to_vmem [thread:$0]  %s1997_s3, 256, %s50_s24, [#allocation6], %s1705_s12, %s1705_s12, %s1706_s13  }
  0x26   :  { %s1664_s0 = scalar_lea.vmem %s64_s25, 256  ;;  %p1669_p2 = scmp.lt.s32.totalorder %s64_s25, %s64_s25 }
  0x27   :  { %p1665_p1 = scmp.ne.s32.totalorder %s64_s25, %s1664_s0  ;;  %p1670_p3 = scmp.lt.s32.totalorder %s1664_s0, %s1664_s0 }
  0x29   :  { %p1671_p4 = por %p1670_p3, %p1669_p2 }
  0x2b   :  { %p1672_p5 = pnand %p1671_p4, %p1665_p1 }
  0x2d   :  { %1675 = shalt.err (!%p1672_p5)
}
  0x2e   :  { %69 = dma.hbm_to_vmem [thread:$0]  %s1999_s5, 256, %s64_s25, [#allocation9], %s1705_s12, %s1705_s12, %s1706_s13  }
  0x2f   :  { %1696 = dma.done.wait [#allocation3], 256  }
  0x30   :  { %1697 = vsyncadd [#allocation3], 4294967040 }
  0x31   :  { %1698 = dma.done.wait [#allocation6], 384  }
  0x32   :  { %1699 = vsyncadd [#allocation6], 4294966912 }
  0x33   :  { %1700 = dma.done.wait [#allocation9], 256  }
  0x34   :  { %1701 = vsyncadd [#allocation9], 4294967040  ;;  %v1712_v0 = vmov 0.0   ;;  %vm1713_vm0 = vmmov 0   ;;  %v1526_v1 = vld [vmem:[#allocation7 + $0x8] sm:$0xff]   ;;  %v1527_v2 = vld [vmem:[#allocation7] sm:$0xff]  }
  0x35   :  { %1392 = vmatprep.subr.bf16.mxu0 %v1712_v0  ;;  %1396 = vmatprep.mubr.msk.bf16.mxu0 %vm1713_vm0, %v1712_v0  ;;  %v89_v3 = vld [vmem:[#allocation2] sm:$0xff]  ;;  %v90_v4 = vld [vmem:[#allocation2 + $0x8] sm:$0xff]  ;;  %v1530_v6 = vld [vmem:[#allocation8 + $0x8] sm:$0xff]   ;;  %vm122_vm1 = vcmask 261120   ;;  %vm246_vm2 = vcmask 130048   ;;  %vm301_vm3 = vcmask 64512  }
  0x36   :  { %1400 = vmatprep.subr.bf16.mxu1 %v1712_v0  ;;  %1404 = vmatprep.mubr.msk.bf16.mxu1 %vm1713_vm0, %v1712_v0  ;;  %v91_v5 = vpack.c.bf16 %v90_v4, %v89_v3  ;;  %v1528_v7 = vld [vmem:[%s2001_s7] sm:$0xff]   ;;  %v1531_v8 = vld [vmem:[#allocation8] sm:$0xff]   ;;  %v1529_v9 = vld [vmem:[#allocation5] sm:$0xff]   ;;  %s1714_s15 = smov 120   ;;  %vm452_vm4 = vcmask 1043456   ;;  %vm436_vm9 = vcmask 60416  }
  0x37   :  { %1393 = vmatpush3.bf16.msra.mxu0 %v1526_v1  ;;  %1401 = vmatpush3.bf16.msra.mxu1 %v1530_v6  ;;  %v98_v10 = vpack.c.bf16 %v1529_v9, %v1529_v9  ;;  %v1315_v11 = vld [vmem:[%s1998_s4] ss:$0 sm:$0xff]  ;;  %s1716_s19 = smov 104   ;;  %s1717_s21 = smov 16  }
  0x38   :  { %1394 = vmatprep.subr.bf16.mxu0 %v1712_v0  ;;  %1402 = vmatprep.subr.bf16.mxu1 %v1712_v0  ;;  %v1319_v16 = vld [vmem:[%s2000_s6] ss:$0 sm:$0xff]  ;;  %s1719_s22 = smov [#allocation10]  }
  0x39   :  { %v1323_v22 = vld [vmem:[%s2002_s8] ss:$0 sm:$0xff]  ;;  %s1301_s23 = sshll.u32 %s1719_s22, 4  ;;  %s1302_s23 = int_to_ptr.vmem [resolvable:$true] %s1301_s23 }
  0x3a   :  { %v1865_v9 = vld [vmem:[%s1996_s2] ss:$0 sm:$0xff]  ;;  %s1676_s24 = scalar_lea.vmem %s1302_s23, 128  ;;  %p1681_p7 = scmp.lt.s32.totalorder %s1302_s23, %s1302_s23 }
  0x3b   :  { %1395 = vmatpush3.bf16.msra.mxu0 %v1527_v2  ;;  %1403 = vmatpush3.bf16.msra.mxu1 %v1531_v8  ;;  %p1677_p6 = scmp.ne.s32.totalorder %s1302_s23, %s1676_s24  ;;  %p1682_p8 = scmp.lt.s32.totalorder %s1676_s24, %s1676_s24 }
  0x3c   :  { %1408 = vmatprep.subr.bf16.mxu0 %v1712_v0  ;;  %1414 = vmatprep.subr.bf16.mxu1 %v1712_v0 }
  0x3d   :  { %p1683_p9 = por %p1682_p8, %p1681_p7 }
  0x3e   :  { %1397 = vmatmul.mubr.msk.bf16.vlgmr.msra.gmra.mxu0 %vm122_vm1, %v91_v5  ;;  %1405 = vmatmul.mubr.msk.bf16.vlgmr.msra.gmra.mxu1 %vm122_vm1, %v91_v5 }
  0x3f   :  { %1409 = vmatpush3.bf16.msra.mxu0 %v1528_v7  ;;  %1410 = vmatprep.mubr.msk.bf16.mxu0 %vm1713_vm0, %v1712_v0  ;;  %p1684_p10 = pnand %p1683_p9, %p1677_p6 }
  0x40   :  { %1420 = vmatprep.subr.bf16.mxu0 %v1712_v0  ;;  %1416 = vmatprep.mubr.msk.bf16.mxu1 %vm1713_vm0, %v1712_v0 }
  0x46   :  { %1411 = vmatmul.mubr.msk.bf16.vlgmr.msra.gmra.mxu0 %vm246_vm2, %v98_v10 }
  0x47   :  { %1422 = vmatprep.mubr.msk.bf16.mxu0 %vm1713_vm0, %v1712_v0 }
  0xfe   :  { %v160_v12 = vpop.f32.mrf.mxu0  ;;  %v224_v20 = vpop.f32.mrf.mxu1 }
  0xff   :  { %v161_v13 = vadd.f32 %v1315_v11, %v160_v12  ;;  %v225_v23 = vadd.f32 %v1319_v16, %v224_v20  ;;  %v1871_v12 = vld [vmem:[%s1996_s2 + $0x1] ss:$0 sm:$0xff]  ;;  %s1715_s2 = smov 112  }
 0x100   :  { %v1398_v14 = vpop.f32.mrf.mxu0  ;;  %v1406_v25 = vpop.f32.mrf.mxu1 }
 0x101   :  { %v1816_v15 = vpack.c.bf16 %v161_v13, %v161_v13  ;;  %v1831_v27 = vpack.c.bf16 %v225_v23, %v225_v23 }
 0x102   :  { %v163_v17 = vpop.f32.mrf.mxu0  ;;  %v227_v30 = vpop.f32.mrf.mxu1 }
 0x103   :  { %v164_v18 = vadd.f32 %v1315_v11, %v163_v17  ;;  %546 = vrot.lane.b32.xlu1 %v1816_v15, %s1714_s15  ;;  %v306_v19 = vsel %vm301_vm3, %v1816_v15, 0  ;;  %v228_v32 = vadd.f32 %v1319_v16, %v227_v30  ;;  %v454_v36 = vsel %vm452_vm4, %v1831_v27, 0 }
 0x104   :  { %v1399_v21 = vpop.f32.mrf.mxu0  ;;  %1415 = vmatpush3.bf16.xpose.msra.mxu1 %v306_v19  ;;  %v1407_v35 = vpop.f32.mrf.mxu1 }
 0x105   :  { %v1828_v24 = vpack.c.bf16 %v164_v18, %v164_v18  ;;  %1426 = vmatprep.subr.bf16.mxu1 %v1712_v0  ;;  %v1842_v38 = vpack.c.bf16 %v228_v32, %v228_v32 }
 0x106   :  { %v284_v26 = vpop.f32.mrf.mxu0 }
 0x107   :  { %v285_v28 = vadd.f32 %v1323_v22, %v284_v26  ;;  %598 = vrot.lane.b32.xlu1 %v1828_v24, %s1714_s15  ;;  %v352_v29 = vsel %vm301_vm3, %v1828_v24, 0  ;;  %v500_v41 = vsel %vm452_vm4, %v1842_v38, 0 }
 0x108   :  { %v1412_v31 = vpop.f32.mrf.mxu0  ;;  %1421 = vmatpush3.bf16.xpose.msra.mxu0 %v352_v29 }
 0x109   :  { %v295_v33 = vcombine.high %v285_v28, %v285_v28  ;;  %v1837_v34 = vpack.c.bf16 %v285_v28, %v285_v28  ;;  %1432 = vmatprep.subr.bf16.mxu0 %v1712_v0 }
 0x10a   :  { %v287_v37 = vpop.f32.mrf.mxu0 }
 0x10b   :  { %v1844_v39 = vpack.c.bf16 %v295_v33, %v295_v33  ;;  %1417 = vmatmul.mubr.msk.bf16.vlgmr.msra.gmra.mxu1 %vm301_vm3, %v1837_v34 }
 0x10c   :  { %v1413_v40 = vpop.f32.mrf.mxu0  ;;  %1427 = vmatpush3.bf16.msra.mxu1 %v454_v36  ;;  %1428 = vmatprep.mubr.msk.bf16.mxu1 %vm1713_vm0, %v1712_v0 }
 0x10d   :  { %595 = vrot.lane.b32.xlu1 %v1844_v39, %s1714_s15  ;;  %1438 = vmatprep.subr.bf16.mxu1 %v1712_v0 }
 0x10f   :  { %1423 = vmatmul.mubr.msk.bf16.vlgmr.msra.gmra.mxu0 %vm301_vm3, %v1844_v39 }
 0x110   :  { %1433 = vmatpush3.bf16.msra.mxu0 %v500_v41  ;;  %1434 = vmatprep.mubr.msk.bf16.mxu0 %vm1713_vm0, %v1712_v0 }
 0x111   :  { %689 = vrot.lane.b32.xlu1 %v1831_v27, %s1714_s15  ;;  %1444 = vmatprep.subr.bf16.mxu0 %v1712_v0 }
 0x175   :  { %v547_v20 = vpop.permute.xlu1 %546 }
 0x176   :  { %v552_v28 = vsel %vm301_vm3, %v547_v20, 0 }
 0x179   :  { %v599_v23 = vpop.permute.xlu1 %598 }
 0x17a   :  { %v604_v32 = vsel %vm301_vm3, %v599_v23, 0 }
 0x17f   :  { %v596_v30 = vpop.permute.xlu1 %595 }
 0x183   :  { %v690_v33 = vpop.permute.xlu1 %689 }
 0x184   :  { %v695_v36 = vsel %vm452_vm4, %v690_v33, 0 }
 0x1cb   :  { %v342_v42 = vpop.f32.mrf.mxu1 }
 0x1cc   :  { %v1328_v43 = vadd.f32 50.0, %v342_v42  ;;  %v402_v44 = vsub.f32 50.0, %v342_v42  ;;  %vm412_vm5 = vcmp.gt.f32.partialorder %v342_v42, 50.0  ;;  %vm410_vm6 = vcmp.lt.f32.partialorder %v342_v42, -50.0 }
 0x1cd   :  { %v1418_v45 = vpop.f32.mrf.mxu1 }
 0x1ce   :  { %v396_v46 = vmul.f32 1.442695, %v1328_v43  ;;  %v404_v47 = vmul.f32 1.442695, %v402_v44 }
 0x1cf   :  { %v345_v48 = vpop.f32.mrf.mxu1  ;;  %v388_v49 = vpop.f32.mrf.mxu0 }
 0x1d0   :  { %1532 = vpow2.f32 %v396_v46  ;;  %v1329_v50 = vadd.f32 50.0, %v388_v49  ;;  %v403_v51 = vsub.f32 50.0, %v388_v49  ;;  %vm413_vm7 = vcmp.gt.f32.partialorder %v388_v49, 50.0 }
 0x1d1   :  { %1534 = vpow2.f32 %v404_v47  ;;  %v1419_v52 = vpop.f32.mrf.mxu1  ;;  %v1424_v53 = vpop.f32.mrf.mxu0  ;;  %vm411_vm8 = vcmp.lt.f32.partialorder %v388_v49, -50.0 }
 0x1d2   :  { %v398_v54 = vmul.f32 1.442695, %v1329_v50  ;;  %v406_v55 = vmul.f32 1.442695, %v403_v51 }
 0x1d3   :  { %v391_v56 = vpop.f32.mrf.mxu0 }
 0x1d4   :  { %1536 = vpow2.f32 %v398_v54 }
 0x1d5   :  { %1538 = vpow2.f32 %v406_v55  ;;  %v1425_v57 = vpop.f32.mrf.mxu0 }
 0x1dd   :  { %v1533_v58 = vpop.eup %1532 }
 0x1de   :  { %v1535_v59 = vpop.eup %1534  ;;  %v400_v60 = vadd.f32 -51.0, %v1533_v58 }
 0x1df   :  { %v408_v61 = vsub.f32 51.0, %v1535_v59 }
 0x1e1   :  { %v1537_v62 = vpop.eup %1536  ;;  %v414_v63 = vsel %vm412_vm5, %v408_v61, %v342_v42 }
 0x1e2   :  { %v1539_v1 = vpop.eup %1538  ;;  %v416_v2 = vsel %vm410_vm6, %v400_v60, %v414_v63  ;;  %v401_v3 = vadd.f32 -51.0, %v1537_v62 }
 0x1e3   :  { %v418_v4 = vmul.f32 1.442695, %v416_v2  ;;  %v409_v5 = vsub.f32 51.0, %v1539_v1 }
 0x1e5   :  { %1540 = vpow2.f32 %v418_v4  ;;  %v415_v6 = vsel %vm413_vm7, %v409_v5, %v388_v49 }
 0x1e6   :  { %v417_v7 = vsel %vm411_vm8, %v401_v3, %v415_v6 }
 0x1e7   :  { %v420_v8 = vmul.f32 1.442695, %v417_v7 }
 0x1e9   :  { %1542 = vpow2.f32 %v420_v8 }
 0x1f2   :  { %v1541_v10 = vpop.eup %1540 }
 0x1f3   :  { %v434_v11 = vmul.f32 %v1541_v10, %v1865_v9 }
 0x1f5   :  { %v437_v13 = vsel %vm436_vm9, %v434_v11, 0.0 }
 0x1f6   :  { %v1543_v14 = vpop.eup %1542  ;;  %438 = vadd.xlane.f32.xlu0 %v437_v13 }
 0x1f7   :  { %v435_v16 = vmul.f32 %v1543_v14, %v1871_v12 }
 0x1f9   :  { %v440_v17 = vsel %vm436_vm9, %v435_v16, 0.0 }
 0x1fa   :  { %441 = vadd.xlane.f32.xlu0 %v440_v17 }
 0x210   :  { %543 = vrot.lane.b32.xlu0 %v1837_v34, %s1714_s15 }
 0x27f   :  { %v439_v18 = vpop.xlane.xlu0 %438 }
 0x280   :  { %1544 = vrcp.f32 %v439_v18 }
 0x283   :  { %v442_v19 = vpop.xlane.xlu0 %441 }
 0x284   :  { %1546 = vrcp.f32 %v442_v19 }
 0x287   :  { %v544_v35 = vpop.permute.xlu0 %543 }
 0x28d   :  { %v1545_v21 = vpop.eup %1544 }
 0x28e   :  { %v445_v22 = vmul.f32 %v1545_v21, %v434_v11 }
 0x290   :  { %v447_v25 = vpack.c.bf16 %v445_v22, %v445_v22 }
 0x291   :  { %v1547_v26 = vpop.eup %1546 }
 0x292   :  { %1429 = vmatmul.mubr.msk.bf16.vlgmr.msra.gmra.mxu1 %vm301_vm3, %v447_v25  ;;  %v446_v29 = vmul.f32 %v1547_v26, %v435_v16 }
 0x293   :  { %1439 = vmatpush3.bf16.xpose.msra.mxu1 %v552_v28  ;;  %1440 = vmatprep.mubr.msk.bf16.mxu1 %vm1713_vm0, %v1712_v0 }
 0x294   :  { %v448_v31 = vpack.c.bf16 %v446_v29, %v446_v29  ;;  %1450 = vmatprep.subr.bf16.mxu1 %v1712_v0 }
 0x296   :  { %1435 = vmatmul.mubr.msk.bf16.vlgmr.msra.gmra.mxu0 %vm301_vm3, %v448_v31 }
 0x297   :  { %1445 = vmatpush3.bf16.xpose.msra.mxu0 %v604_v32  ;;  %1446 = vmatprep.mubr.msk.bf16.mxu0 %vm1713_vm0, %v1712_v0 }
 0x298   :  { %1456 = vmatprep.subr.bf16.mxu0 %v1712_v0 }
 0x29a   :  { %1441 = vmatmul.mubr.msk.bf16.vlgmr.msra.gmra.mxu1 %vm301_vm3, %v544_v35 }
 0x29b   :  { %1451 = vmatpush3.bf16.msra.mxu1 %v695_v36  ;;  %1452 = vmatprep.mubr.msk.bf16.mxu1 %vm1713_vm0, %v1712_v0 }
 0x29c   :  { %1462 = vmatprep.subr.bf16.mxu1 %v1712_v0 }
 0x29e   :  { %1447 = vmatmul.mubr.msk.bf16.vlgmr.msra.gmra.mxu0 %vm301_vm3, %v596_v30 }
 0x29f   :  { %1458 = vmatprep.mubr.msk.bf16.mxu0 %vm1713_vm0, %v1712_v0 }
 0x352   :  { %v1896_v37 = vpop.f32.mrf.mxu1 }
 0x354   :  { %v1430_v40 = vpop.f32.mrf.mxu1 }
 0x356   :  { %v493_v41 = vpop.f32.mrf.mxu1  ;;  %v1898_v42 = vpop.f32.mrf.mxu0 }
 0x358   :  { %v1431_v43 = vpop.f32.mrf.mxu1  ;;  %v1436_v44 = vpop.f32.mrf.mxu0 }
 0x35a   :  { %v539_v45 = vpop.f32.mrf.mxu0  ;;  %v588_v46 = vpop.f32.mrf.mxu1 }
 0x35b   :  { %v1336_v47 = vadd.f32 50.0, %v588_v46  ;;  %v654_v48 = vsub.f32 50.0, %v588_v46  ;;  %vm664_vm10 = vcmp.gt.f32.partialorder %v588_v46, 50.0  ;;  %vm662_vm11 = vcmp.lt.f32.partialorder %v588_v46, -50.0 }
 0x35c   :  { %v1437_v49 = vpop.f32.mrf.mxu0  ;;  %v1442_v50 = vpop.f32.mrf.mxu1 }
 0x35d   :  { %v648_v51 = vmul.f32 1.442695, %v1336_v47  ;;  %v656_v52 = vmul.f32 1.442695, %v654_v48 }
 0x35e   :  { %v591_v53 = vpop.f32.mrf.mxu1  ;;  %v640_v54 = vpop.f32.mrf.mxu0 }
 0x35f   :  { %1548 = vpow2.f32 %v648_v51  ;;  %v1337_v55 = vadd.f32 50.0, %v640_v54  ;;  %v655_v56 = vsub.f32 50.0, %v640_v54  ;;  %vm665_vm12 = vcmp.gt.f32.partialorder %v640_v54, 50.0 }
 0x360   :  { %1550 = vpow2.f32 %v656_v52  ;;  %v1443_v57 = vpop.f32.mrf.mxu1  ;;  %v1448_v58 = vpop.f32.mrf.mxu0  ;;  %vm663_vm13 = vcmp.lt.f32.partialorder %v640_v54, -50.0 }
 0x361   :  { %v650_v59 = vmul.f32 1.442695, %v1337_v55  ;;  %v658_v60 = vmul.f32 1.442695, %v655_v56 }
 0x362   :  { %v643_v61 = vpop.f32.mrf.mxu0 }
 0x363   :  { %1552 = vpow2.f32 %v650_v59 }
 0x364   :  { %1554 = vpow2.f32 %v658_v60  ;;  %v1449_v62 = vpop.f32.mrf.mxu0 }
 0x36c   :  { %v1549_v63 = vpop.eup %1548 }
 0x36d   :  { %v1551_v1 = vpop.eup %1550  ;;  %v652_v2 = vadd.f32 -51.0, %v1549_v63 }
 0x36e   :  { %v660_v3 = vsub.f32 51.0, %v1551_v1 }
 0x370   :  { %v1553_v4 = vpop.eup %1552  ;;  %v666_v5 = vsel %vm664_vm10, %v660_v3, %v588_v46 }
 0x371   :  { %v1555_v6 = vpop.eup %1554  ;;  %v668_v7 = vsel %vm662_vm11, %v652_v2, %v666_v5  ;;  %v653_v8 = vadd.f32 -51.0, %v1553_v4 }
 0x372   :  { %v670_v10 = vmul.f32 1.442695, %v668_v7  ;;  %v661_v11 = vsub.f32 51.0, %v1555_v6 }
 0x374   :  { %1556 = vpow2.f32 %v670_v10  ;;  %v667_v13 = vsel %vm665_vm12, %v661_v11, %v640_v54 }
 0x375   :  { %v669_v14 = vsel %vm663_vm13, %v653_v8, %v667_v13 }
 0x376   :  { %v672_v16 = vmul.f32 1.442695, %v669_v14 }
 0x378   :  { %1558 = vpow2.f32 %v672_v16 }
 0x381   :  { %v1557_v17 = vpop.eup %1556 }
 0x382   :  { %v674_v18 = vmul.f32 %v1557_v17, %v1865_v9 }
 0x384   :  { %v676_v19 = vsel %vm436_vm9, %v674_v18, 0.0 }
 0x385   :  { %v1559_v20 = vpop.eup %1558  ;;  %677 = vadd.xlane.f32.xlu1 %v676_v19 }
 0x386   :  { %v675_v21 = vmul.f32 %v1559_v20, %v1871_v12 }
 0x388   :  { %v679_v22 = vsel %vm436_vm9, %v675_v21, 0.0 }
 0x389   :  { %680 = vadd.xlane.f32.xlu0 %v679_v22 }
 0x396   :  { %788 = vrot.lane.b32.xlu1 %v1816_v15, %s1715_s2 }
 0x39a   :  { %838 = vrot.lane.b32.xlu1 %v1828_v24, %s1715_s2 }
 0x39e   :  { %786 = vrot.lane.b32.xlu1 %v1837_v34, %s1715_s2 }
 0x39f   :  { %738 = vrot.lane.b32.xlu0 %v1842_v38, %s1714_s15 }
 0x3a2   :  { %836 = vrot.lane.b32.xlu1 %v1844_v39, %s1715_s2 }
 0x3a3   :  { %928 = vrot.lane.b32.xlu0 %v1831_v27, %s1715_s2 }
 0x3a6   :  { %976 = vrot.lane.b32.xlu1 %v1842_v38, %s1715_s2 }
 0x40e   :  { %v678_v23 = vpop.xlane.xlu1 %677 }
 0x40f   :  { %1560 = vrcp.f32 %v678_v23 }
 0x412   :  { %v789_v25 = vpop.permute.xlu1 %788  ;;  %v681_v26 = vpop.xlane.xlu0 %680 }
 0x413   :  { %1562 = vrcp.f32 %v681_v26  ;;  %v794_v40 = vsel %vm301_vm3, %v789_v25, 0 }
 0x416   :  { %v739_v28 = vpop.permute.xlu0 %738  ;;  %v839_v30 = vpop.permute.xlu1 %838 }
 0x417   :  { %v744_v29 = vsel %vm452_vm4, %v739_v28, 0  ;;  %v844_v45 = vsel %vm301_vm3, %v839_v30, 0 }
 0x418   :  { %1457 = vmatpush3.bf16.msra.mxu0 %v744_v29 }
 0x419   :  { %1468 = vmatprep.subr.bf16.mxu0 %v1712_v0 }
 0x41a   :  { %v787_v33 = vpop.permute.xlu1 %786  ;;  %v929_v46 = vpop.permute.xlu0 %928 }
 0x41b   :  { %v934_v47 = vsel %vm452_vm4, %v929_v46, 0 }
 0x41c   :  { %v1561_v31 = vpop.eup %1560 }
 0x41d   :  { %v684_v32 = vmul.f32 %v1561_v31, %v674_v18 }
 0x41e   :  { %v837_v44 = vpop.permute.xlu1 %836 }
 0x41f   :  { %v686_v35 = vpack.c.bf16 %v684_v32, %v684_v32 }
 0x420   :  { %v1563_v36 = vpop.eup %1562 }
 0x421   :  { %1453 = vmatmul.mubr.msk.bf16.vlgmr.msra.gmra.mxu1 %vm301_vm3, %v686_v35  ;;  %v685_v41 = vmul.f32 %v1563_v36, %v675_v21 }
 0x422   :  { %1463 = vmatpush3.bf16.xpose.msra.mxu1 %v794_v40  ;;  %1464 = vmatprep.mubr.msk.bf16.mxu1 %vm1713_vm0, %v1712_v0  ;;  %v977_v48 = vpop.permute.xlu1 %976 }
 0x423   :  { %v687_v43 = vpack.c.bf16 %v685_v41, %v685_v41  ;;  %1474 = vmatprep.subr.bf16.mxu1 %v1712_v0  ;;  %v982_v49 = vsel %vm452_vm4, %v977_v48, 0 }
 0x425   :  { %1459 = vmatmul.mubr.msk.bf16.vlgmr.msra.gmra.mxu0 %vm301_vm3, %v687_v43 }
 0x426   :  { %1469 = vmatpush3.bf16.xpose.msra.mxu0 %v844_v45  ;;  %1470 = vmatprep.mubr.msk.bf16.mxu0 %vm1713_vm0, %v1712_v0 }
 0x427   :  { %1480 = vmatprep.subr.bf16.mxu0 %v1712_v0 }
 0x429   :  { %1465 = vmatmul.mubr.msk.bf16.vlgmr.msra.gmra.mxu1 %vm301_vm3, %v787_v33 }
 0x42a   :  { %1475 = vmatpush3.bf16.msra.mxu1 %v934_v47  ;;  %1476 = vmatprep.mubr.msk.bf16.mxu1 %vm1713_vm0, %v1712_v0 }
 0x42b   :  { %1486 = vmatprep.subr.bf16.mxu1 %v1712_v0 }
 0x42d   :  { %1471 = vmatmul.mubr.msk.bf16.vlgmr.msra.gmra.mxu0 %vm301_vm3, %v837_v44 }
 0x42e   :  { %1481 = vmatpush3.bf16.msra.mxu0 %v982_v49  ;;  %1482 = vmatprep.mubr.msk.bf16.mxu0 %vm1713_vm0, %v1712_v0 }
 0x42f   :  { %1492 = vmatprep.subr.bf16.mxu0 %v1712_v0 }
 0x4e1   :  { %v1934_v50 = vpop.f32.mrf.mxu1 }
 0x4e3   :  { %v1454_v51 = vpop.f32.mrf.mxu1 }
 0x4e5   :  { %v734_v52 = vpop.f32.mrf.mxu1  ;;  %v1936_v53 = vpop.f32.mrf.mxu0 }
 0x4e7   :  { %v1455_v54 = vpop.f32.mrf.mxu1  ;;  %v1460_v55 = vpop.f32.mrf.mxu0 }
 0x4e9   :  { %v783_v56 = vpop.f32.mrf.mxu0  ;;  %v830_v57 = vpop.f32.mrf.mxu1 }
 0x4ea   :  { %v1342_v58 = vadd.f32 50.0, %v830_v57  ;;  %v894_v59 = vsub.f32 50.0, %v830_v57  ;;  %vm904_vm14 = vcmp.gt.f32.partialorder %v830_v57, 50.0  ;;  %vm902_vm15 = vcmp.lt.f32.partialorder %v830_v57, -50.0 }
 0x4eb   :  { %v1461_v60 = vpop.f32.mrf.mxu0  ;;  %v1466_v61 = vpop.f32.mrf.mxu1 }
 0x4ec   :  { %v888_v62 = vmul.f32 1.442695, %v1342_v58  ;;  %v896_v63 = vmul.f32 1.442695, %v894_v59 }
 0x4ed   :  { %v833_v1 = vpop.f32.mrf.mxu1  ;;  %v880_v2 = vpop.f32.mrf.mxu0 }
 0x4ee   :  { %1564 = vpow2.f32 %v888_v62  ;;  %v1343_v3 = vadd.f32 50.0, %v880_v2  ;;  %v895_v4 = vsub.f32 50.0, %v880_v2  ;;  %vm905_vm1 = vcmp.gt.f32.partialorder %v880_v2, 50.0 }
 0x4ef   :  { %1566 = vpow2.f32 %v896_v63  ;;  %v1467_v5 = vpop.f32.mrf.mxu1  ;;  %v1472_v6 = vpop.f32.mrf.mxu0  ;;  %vm903_vm5 = vcmp.lt.f32.partialorder %v880_v2, -50.0 }
 0x4f0   :  { %v890_v7 = vmul.f32 1.442695, %v1343_v3  ;;  %v898_v8 = vmul.f32 1.442695, %v895_v4 }
 0x4f1   :  { %v883_v10 = vpop.f32.mrf.mxu0 }
 0x4f2   :  { %1568 = vpow2.f32 %v890_v7 }
 0x4f3   :  { %1570 = vpow2.f32 %v898_v8  ;;  %v1473_v11 = vpop.f32.mrf.mxu0 }
 0x4fb   :  { %v1565_v13 = vpop.eup %1564 }
 0x4fc   :  { %v1567_v14 = vpop.eup %1566  ;;  %v892_v16 = vadd.f32 -51.0, %v1565_v13 }
 0x4fd   :  { %v900_v17 = vsub.f32 51.0, %v1567_v14 }
 0x4ff   :  { %v1569_v18 = vpop.eup %1568  ;;  %v906_v19 = vsel %vm904_vm14, %v900_v17, %v830_v57 }
 0x500   :  { %v1571_v20 = vpop.eup %1570  ;;  %v908_v21 = vsel %vm902_vm15, %v892_v16, %v906_v19  ;;  %v893_v22 = vadd.f32 -51.0, %v1569_v18 }
 0x501   :  { %v910_v23 = vmul.f32 1.442695, %v908_v21  ;;  %v901_v25 = vsub.f32 51.0, %v1571_v20 }
 0x503   :  { %1572 = vpow2.f32 %v910_v23  ;;  %v907_v26 = vsel %vm905_vm1, %v901_v25, %v880_v2 }
 0x504   :  { %v909_v28 = vsel %vm903_vm5, %v893_v22, %v907_v26 }
 0x505   :  { %v912_v29 = vmul.f32 1.442695, %v909_v28 }
 0x507   :  { %1574 = vpow2.f32 %v912_v29 }
 0x510   :  { %v1573_v30 = vpop.eup %1572 }
 0x511   :  { %v914_v31 = vmul.f32 %v1573_v30, %v1865_v9 }
 0x513   :  { %v916_v32 = vsel %vm436_vm9, %v914_v31, 0.0 }
 0x514   :  { %v1575_v33 = vpop.eup %1574  ;;  %917 = vadd.xlane.f32.xlu1 %v916_v32 }
 0x515   :  { %v915_v35 = vmul.f32 %v1575_v33, %v1871_v12 }
 0x517   :  { %v919_v36 = vsel %vm436_vm9, %v915_v35, 0.0 }
 0x518   :  { %920 = vadd.xlane.f32.xlu0 %v919_v36 }
 0x525   :  { %1026 = vrot.lane.b32.xlu1 %v1816_v15, %s1716_s19 }
 0x529   :  { %1024 = vrot.lane.b32.xlu1 %v1837_v34, %s1716_s19 }
 0x52e   :  { %1076 = vrot.lane.b32.xlu0 %v1828_v24, %s1716_s19 }
 0x532   :  { %1074 = vrot.lane.b32.xlu0 %v1844_v39, %s1716_s19 }
 0x59d   :  { %v918_v40 = vpop.xlane.xlu1 %917 }
 0x59e   :  { %1576 = vrcp.f32 %v918_v40 }
 0x5a1   :  { %v921_v41 = vpop.xlane.xlu0 %920  ;;  %v1027_v45 = vpop.permute.xlu1 %1026 }
 0x5a2   :  { %1578 = vrcp.f32 %v921_v41  ;;  %v1032_v15 = vsel %vm301_vm3, %v1027_v45, 0 }
 0x5a5   :  { %v1077_v48 = vpop.permute.xlu0 %1076  ;;  %v1025_v49 = vpop.permute.xlu1 %1024 }
 0x5a6   :  { %v1082_v39 = vsel %vm301_vm3, %v1077_v48, 0 }
 0x5a9   :  { %v1075_v51 = vpop.permute.xlu0 %1074 }
 0x5ab   :  { %v1577_v43 = vpop.eup %1576 }
 0x5ac   :  { %v924_v44 = vmul.f32 %v1577_v43, %v914_v31 }
 0x5ae   :  { %v926_v46 = vpack.c.bf16 %v924_v44, %v924_v44 }
 0x5af   :  { %v1579_v47 = vpop.eup %1578 }
 0x5b0   :  { %1477 = vmatmul.mubr.msk.bf16.vlgmr.msra.gmra.mxu1 %vm301_vm3, %v926_v46  ;;  %v925_v34 = vmul.f32 %v1579_v47, %v915_v35 }
 0x5b1   :  { %1487 = vmatpush3.bf16.xpose.msra.mxu1 %v1032_v15  ;;  %1488 = vmatprep.mubr.msk.bf16.mxu1 %vm1713_vm0, %v1712_v0 }
 0x5b2   :  { %v927_v24 = vpack.c.bf16 %v925_v34, %v925_v34  ;;  %1498 = vmatprep.subr.bf16.mxu1 %v1712_v0 }
 0x5b4   :  { %1483 = vmatmul.mubr.msk.bf16.vlgmr.msra.gmra.mxu0 %vm301_vm3, %v927_v24 }
 0x5b5   :  { %1493 = vmatpush3.bf16.xpose.msra.mxu0 %v1082_v39  ;;  %1494 = vmatprep.mubr.msk.bf16.mxu0 %vm1713_vm0, %v1712_v0 }
 0x5b6   :  { %1504 = vmatprep.subr.bf16.mxu0 %v1712_v0 }
 0x5b8   :  { %1489 = vmatmul.mubr.msk.bf16.vlgmr.msra.gmra.mxu1 %vm301_vm3, %v1025_v49 }
 0x5b9   :  { %1500 = vmatprep.mubr.msk.bf16.mxu1 %vm1713_vm0, %v1712_v0 }
 0x5bc   :  { %1495 = vmatmul.mubr.msk.bf16.vlgmr.msra.gmra.mxu0 %vm301_vm3, %v1075_v51 }
 0x5bd   :  { %1506 = vmatprep.mubr.msk.bf16.mxu0 %vm1713_vm0, %v1712_v0 }
 0x670   :  { %v970_v52 = vpop.f32.mrf.mxu1 }
 0x672   :  { %v1478_v54 = vpop.f32.mrf.mxu1 }
 0x674   :  { %v973_v55 = vpop.f32.mrf.mxu1  ;;  %v1018_v56 = vpop.f32.mrf.mxu0 }
 0x676   :  { %v1479_v57 = vpop.f32.mrf.mxu1  ;;  %v1484_v58 = vpop.f32.mrf.mxu0 }
 0x678   :  { %v1021_v59 = vpop.f32.mrf.mxu0  ;;  %v1068_v60 = vpop.f32.mrf.mxu1 }
 0x679   :  { %v1348_v61 = vadd.f32 50.0, %v1068_v60  ;;  %v1132_v62 = vsub.f32 50.0, %v1068_v60  ;;  %vm1142_vm0 = vcmp.gt.f32.partialorder %v1068_v60, 50.0  ;;  %vm1140_vm6 = vcmp.lt.f32.partialorder %v1068_v60, -50.0 }
 0x67a   :  { %v1485_v63 = vpop.f32.mrf.mxu0  ;;  %v1490_v1 = vpop.f32.mrf.mxu1 }
 0x67b   :  { %v1126_v2 = vmul.f32 1.442695, %v1348_v61  ;;  %v1134_v3 = vmul.f32 1.442695, %v1132_v62 }
 0x67c   :  { %v1071_v4 = vpop.f32.mrf.mxu1  ;;  %v1118_v5 = vpop.f32.mrf.mxu0 }
 0x67d   :  { %1580 = vpow2.f32 %v1126_v2  ;;  %v1349_v6 = vadd.f32 50.0, %v1118_v5  ;;  %v1133_v7 = vsub.f32 50.0, %v1118_v5  ;;  %vm1143_vm7 = vcmp.gt.f32.partialorder %v1118_v5, 50.0 }
 0x67e   :  { %1582 = vpow2.f32 %v1134_v3  ;;  %v1491_v0 = vpop.f32.mrf.mxu1  ;;  %v1496_v8 = vpop.f32.mrf.mxu0  ;;  %vm1141_vm8 = vcmp.lt.f32.partialorder %v1118_v5, -50.0 }
 0x67f   :  { %v1128_v10 = vmul.f32 1.442695, %v1349_v6  ;;  %v1136_v11 = vmul.f32 1.442695, %v1133_v7 }
 0x680   :  { %v1121_v13 = vpop.f32.mrf.mxu0 }
 0x681   :  { %1584 = vpow2.f32 %v1128_v10 }
 0x682   :  { %1586 = vpow2.f32 %v1136_v11  ;;  %v1497_v14 = vpop.f32.mrf.mxu0 }
 0x68a   :  { %v1581_v16 = vpop.eup %1580 }
 0x68b   :  { %v1583_v17 = vpop.eup %1582  ;;  %v1130_v18 = vadd.f32 -51.0, %v1581_v16 }
 0x68c   :  { %v1138_v19 = vsub.f32 51.0, %v1583_v17 }
 0x68e   :  { %v1585_v20 = vpop.eup %1584  ;;  %v1144_v21 = vsel %vm1142_vm0, %v1138_v19, %v1068_v60 }
 0x68f   :  { %v1587_v22 = vpop.eup %1586  ;;  %v1146_v23 = vsel %vm1140_vm6, %v1130_v18, %v1144_v21  ;;  %v1131_v25 = vadd.f32 -51.0, %v1585_v20 }
 0x690   :  { %v1148_v26 = vmul.f32 1.442695, %v1146_v23  ;;  %v1139_v28 = vsub.f32 51.0, %v1587_v22 }
 0x692   :  { %1588 = vpow2.f32 %v1148_v26  ;;  %v1145_v29 = vsel %vm1143_vm7, %v1139_v28, %v1118_v5 }
 0x693   :  { %v1147_v30 = vsel %vm1141_vm8, %v1131_v25, %v1145_v29 }
 0x694   :  { %v1150_v31 = vmul.f32 1.442695, %v1147_v30 }
 0x696   :  { %1590 = vpow2.f32 %v1150_v31 }
 0x69f   :  { %v1589_v32 = vpop.eup %1588 }
 0x6a0   :  { %v1152_v33 = vmul.f32 %v1589_v32, %v1865_v9 }
 0x6a2   :  { %v1154_v35 = vsel %vm436_vm9, %v1152_v33, 0.0 }
 0x6a3   :  { %v1591_v36 = vpop.eup %1590  ;;  %1155 = vadd.xlane.f32.xlu1 %v1154_v35 }
 0x6a4   :  { %v1153_v40 = vmul.f32 %v1591_v36, %v1871_v12 }
 0x6a6   :  { %v1157_v41 = vsel %vm436_vm9, %v1153_v40, 0.0  ;;  %vm1293_vm9 = vcmask 257024  }
 0x6a7   :  { %1158 = vadd.xlane.f32.xlu0 %v1157_v41 }
 0x6b4   :  { %1214 = vrot.lane.b32.xlu1 %v1842_v38, %s1716_s19 }
 0x6b8   :  { %1264 = vrot.lane.b32.xlu1 %v1934_v50, %s1709_s20 }
 0x6bc   :  { %1272 = vrot.lane.b32.xlu1 %v970_v52, %s1717_s21 }
 0x6bd   :  { %1166 = vrot.lane.b32.xlu0 %v1831_v27, %s1716_s19 }
 0x6c1   :  { %1266 = vrot.lane.b32.xlu0 %v1936_v53, %s1709_s20  ;;  %s1718_s20 = smov 24  }
 0x6c5   :  { %1274 = vrot.lane.b32.xlu0 %v1018_v56, %s1717_s21 }
 0x72c   :  { %v1156_v9 = vpop.xlane.xlu1 %1155 }
 0x72d   :  { %1592 = vrcp.f32 %v1156_v9 }
 0x730   :  { %v1215_v12 = vpop.permute.xlu1 %1214  ;;  %v1159_v43 = vpop.xlane.xlu0 %1158 }
 0x731   :  { %v1220_v44 = vsel %vm452_vm4, %v1215_v12, 0  ;;  %1594 = vrcp.f32 %v1159_v43 }
 0x732   :  { %1505 = vmatpush3.bf16.msra.mxu0 %v1220_v44 }
 0x734   :  { %v1167_v38 = vpop.permute.xlu0 %1166  ;;  %v1265_v55 = vpop.permute.xlu1 %1264 }
 0x735   :  { %v1172_v50 = vsel %vm452_vm4, %v1167_v38, 0  ;;  %vm1290_vm4 = vcmask 195584   ;;  %v1286_v58 = vsel %vm301_vm3, %v1896_v37, %v1265_v55 }
 0x736   :  { %1499 = vmatpush3.bf16.msra.mxu1 %v1172_v50 }
 0x738   :  { %v1267_v56 = vpop.permute.xlu0 %1266  ;;  %v1273_v57 = vpop.permute.xlu1 %1272 }
 0x739   :  { %v1288_v59 = vsel %vm246_vm2, %v1286_v58, %v1273_v57  ;;  %v1287_v63 = vsel %vm301_vm3, %v1898_v42, %v1267_v56 }
 0x73a   :  { %v1593_v45 = vpop.eup %1592 }
 0x73b   :  { %v1162_v46 = vmul.f32 %v1593_v45, %v1152_v33 }
 0x73c   :  { %v1275_v60 = vpop.permute.xlu0 %1274 }
 0x73d   :  { %v1164_v47 = vpack.c.bf16 %v1162_v46, %v1162_v46  ;;  %v1289_v1 = vsel %vm246_vm2, %v1287_v63, %v1275_v60 }
 0x73e   :  { %v1595_v27 = vpop.eup %1594 }
 0x73f   :  { %1501 = vmatmul.mubr.msk.bf16.vlgmr.msra.gmra.mxu1 %vm301_vm3, %v1164_v47  ;;  %v1163_v53 = vmul.f32 %v1595_v27, %v1153_v40 }
 0x741   :  { %v1165_v15 = vpack.c.bf16 %v1163_v53, %v1163_v53 }
 0x743   :  { %1507 = vmatmul.mubr.msk.bf16.vlgmr.msra.gmra.mxu0 %vm301_vm3, %v1165_v15 }
 0x7ff   :  { %v1208_v34 = vpop.f32.mrf.mxu1 }
 0x800   :  { %1280 = vrot.lane.b32.xlu1 %v1208_v34, %s1718_s20 }
 0x801   :  { %v1502_v48 = vpop.f32.mrf.mxu1 }
 0x803   :  { %v1211_v24 = vpop.f32.mrf.mxu1  ;;  %v1256_v39 = vpop.f32.mrf.mxu0 }
 0x804   :  { %1282 = vrot.lane.b32.xlu0 %v1256_v39, %s1718_s20 }
 0x805   :  { %v1503_v49 = vpop.f32.mrf.mxu1  ;;  %v1508_v51 = vpop.f32.mrf.mxu0 }
 0x807   :  { %v1259_v52 = vpop.f32.mrf.mxu0 }
 0x809   :  { %v1509_v54 = vpop.f32.mrf.mxu0 }
 0x872   :  { %v1281_v61 = vpop.permute.xlu1 %1280 }
 0x873   :  { %v1291_v62 = vsel %vm1290_vm4, %v1288_v59, %v1281_v61 }
 0x874   :  { %1294 = vst.msk [vmem:[#allocation10] sm:$0xf] %vm1293_vm9, %v1291_v62 }
 0x876   :  { %v1283_v2 = vpop.permute.xlu0 %1282 }
 0x877   :  { %v1292_v3 = vsel %vm1290_vm4, %v1289_v1, %v1283_v2 }
 0x878   :  { %1295 = vst.msk [vmem:[#allocation10 + $0x4] sm:$0xf] %vm1293_vm9, %v1292_v3 }
 0x879   :  { %1687 = shalt.err (!%p1684_p10)
}
 0x87a   :  { %1307 = dma.vmem_to_hbm [thread:$0]  %s1302_s23, 128, %s2003_s9, [#allocation4], %s1705_s12, %s1705_s12, %s1706_s13  }
 0x87b   :  { %1702 = dma.done.wait [#allocation4], 128  }
 0x87c   :  { %1703 = vsyncadd [#allocation4], 4294967168 }
 0x87d   :  { %1311 = vsyncpa [#allocation3], 1 }
 0x87e   :  { %1312 = vsyncpa [#allocation6], 1 }
 0x87f   :  { %1313 = vsyncpa [#allocation9], 1 }
 0x880   :  { %1314 = vsyncpa [#allocation4], 1 }

</bundles_post_ra>
